<compile_context>
chip_gen: v7x
topology: tpu7x:2x2x1
jax: 0.10.0
libtpu: 0.0.40
codegen_flags: <defaults>
</compile_context>

<pallas_src>
import math
from functools import partial

import jax
import jax.numpy as jnp
from jax import lax
from jax.experimental import pallas as pl
from jax.experimental.pallas import tpu as pltpu

_VMEM_LIMIT = 32 * 1024 * 1024


# ----------------------------------------------------------------------------
# small in-kernel helpers
# ----------------------------------------------------------------------------
def _ln(x, g, b, eps):
    mu = jnp.mean(x, axis=-1, keepdims=True)
    var = jnp.mean(jnp.square(x - mu), axis=-1, keepdims=True)
    return (x - mu) * lax.rsqrt(var + eps) * g + b


def _sigmoid(x):
    return 1.0 / (1.0 + jnp.exp(-x))


def _gelu_tanh(x):
    return 0.5 * x * (1.0 + jnp.tanh(0.7978845608028654 * (x + 0.044715 * x * x * x)))


def _bf16(x):
    return x.astype(jnp.bfloat16)


# ----------------------------------------------------------------------------
# Pallas kernels
# ----------------------------------------------------------------------------
def _patch_embed_kernel(eps, x_ref, w_ref, b_ref, g_ref, be_ref, o_ref):
    # conv-as-matmul + bias + token LayerNorm, tiled over rows.
    acc = jnp.dot(x_ref[...], w_ref[...], preferred_element_type=jnp.float32)
    acc = acc + b_ref[...]
    o_ref[...] = _ln(acc, g_ref[...], be_ref[...], eps)


def _group_attn_kernel(nH, G, L, scale, x_ref, lnw_ref, lnb_ref,
                       wqkv_ref, wproj_ref, bproj_ref, o_ref):
    """GroupBlock attention half: LN1 + fused QKV + per-window batched
    attention (no mask) + single out-projection + residual.  Rows of x are
    window-permuted so window g occupies the contiguous rows [g*L, (g+1)*L)."""
    x = x_ref[0]                                   # (N, C) f32
    N, C = x.shape
    hd = C // nH
    h = _ln(x, lnw_ref[...], lnb_ref[...], 1e-6)
    qkv = jnp.dot(_bf16(h), wqkv_ref[...], preferred_element_type=jnp.float32)
    qkv = _bf16(qkv.reshape(G, L, 3 * C))          # windows folded into batch dim
    heads = []
    for hh in range(nH):
        q = qkv[..., hh * hd:(hh + 1) * hd]                       # (G, L, hd)
        k = qkv[..., C + hh * hd:C + (hh + 1) * hd]
        v = qkv[..., 2 * C + hh * hd:2 * C + (hh + 1) * hd]
        s = jnp.einsum('gld,gmd->glm', q, k,
                       preferred_element_type=jnp.float32) * scale
        s = s - jnp.max(s, axis=-1, keepdims=True)
        p = jnp.exp(s)
        p = p * pl.reciprocal(jnp.sum(p, axis=-1, keepdims=True), approx=True)
        heads.append(jnp.einsum('glm,gmd->gld', _bf16(p), v,
                                preferred_element_type=jnp.float32))
    attn = jnp.concatenate(heads, axis=-1).reshape(N, C)
    proj = jnp.dot(_bf16(attn), wproj_ref[...], preferred_element_type=jnp.float32)
    o_ref[0] = x + proj + bproj_ref[...]


def _sr_attn_kernel(nH, n_tap, Ns, scale, x_ref, ln1w_ref, ln1b_ref,
                    wq_ref, wsr_ref, bsr_ref, srlnw_ref, srlnb_ref,
                    wkv_ref, wproj_ref, bproj_ref, o_ref):
    """GroupBlock Attention (sr_ratio>1) half: LN1 + fused Q + sr-conv
    (2x2/s2, implemented as per-tap linear maps on contiguous row slices)
    + sr-LN + fused KV + cross attention (no mask) + out-proj + residual.
    Rows of x are tap-major permuted: tap t occupies rows [t*Ns, (t+1)*Ns)."""
    x = x_ref[0]                                   # (N, C) f32
    N, C = x.shape
    hd = C // nH
    h = _ln(x, ln1w_ref[...], ln1b_ref[...], 1e-6)
    hb = _bf16(h)
    q = _bf16(jnp.dot(hb, wq_ref[...], preferred_element_type=jnp.float32))
    xr = jnp.zeros((Ns, C), jnp.float32)
    for t in range(n_tap):                          # spatial-reduction conv
        xr = xr + jnp.dot(hb[t * Ns:(t + 1) * Ns, :], wsr_ref[t],
                          preferred_element_type=jnp.float32)
    xr = xr + bsr_ref[...]
    xr = _ln(xr, srlnw_ref[...], srlnb_ref[...], 1e-5)
    kv = _bf16(jnp.dot(_bf16(xr), wkv_ref[...], preferred_element_type=jnp.float32))
    heads = []
    for hh in range(nH):
        qh = q[:, hh * hd:(hh + 1) * hd]                          # (N, hd)
        kh = kv[:, hh * hd:(hh + 1) * hd]                         # (Ns, hd)
        vh = kv[:, C + hh * hd:C + (hh + 1) * hd]                 # (Ns, hd)
        s = lax.dot_general(qh, kh, (((1,), (1,)), ((), ())),
                            preferred_element_type=jnp.float32) * scale
        s = s - jnp.max(s, axis=-1, keepdims=True)
        p = jnp.exp(s)
        p = p * pl.reciprocal(jnp.sum(p, axis=-1, keepdims=True), approx=True)
        heads.append(jnp.dot(_bf16(p), vh, preferred_element_type=jnp.float32))
    attn = jnp.concatenate(heads, axis=-1)
    proj = jnp.dot(_bf16(attn), wproj_ref[...], preferred_element_type=jnp.float32)
    o_ref[0] = x + proj + bproj_ref[...]


def _mlp_kernel(eps, x_ref, lnw_ref, lnb_ref, w1_ref, b1_ref, w2_ref, b2_ref, o_ref):
    """GroupBlock MLP half: LN2 + fc1 + GELU + fc2 + residual."""
    x = x_ref[0]
    h = _ln(x, lnw_ref[...], lnb_ref[...], eps)
    a = jnp.dot(_bf16(h), w1_ref[...], preferred_element_type=jnp.float32)
    a = _gelu_tanh(a + b1_ref[...])
    y = jnp.dot(_bf16(a), w2_ref[...], preferred_element_type=jnp.float32)
    o_ref[0] = x + y + b2_ref[...]


def _poscnn_conv_kernel(bn_scale, x_ref, w_ref, b_ref, o_ref):
    """Depthwise 3x3 conv (halo'd input, 9 shifted slices) + eval-mode
    BatchNorm + ELU."""
    xp = x_ref[0]                                  # (H+2, W+2, C)
    Hp, Wp, C = xp.shape
    H, W = Hp - 2, Wp - 2
    w = w_ref[...]                                 # (9, C)
    y = jnp.zeros((H, W, C), jnp.float32)
    for di in range(3):
        for dj in range(3):
            wt = w[di * 3 + dj:di * 3 + dj + 1, :]               # (1, C)
            y = y + xp[di:di + H, dj:dj + W, :] * wt
    y = (y + b_ref[...]) * bn_scale
    o_ref[0] = jnp.where(y > 0, y, jnp.exp(y) - 1.0)             # ELU


def _sa_se_kernel(x_ref, sap_ref, saw_ref, se1_ref, se2_ref, o_ref):
    """Spatial-attention 7x7 conv (halo'd 2-channel stat map, 49 shifted
    slices) + sigmoid gate + SE block (in-kernel GAP) -> raster tokens."""
    y = x_ref[0]                                   # (H, W, C)
    H, W, C = y.shape
    sp = sap_ref[0]                                # (H+6, W+6, 2)
    saw = saw_ref[...]                             # (49, 2)
    acc = jnp.zeros((H, W, 2), jnp.float32)
    for di in range(7):
        for dj in range(7):
            wt = saw[di * 7 + dj:di * 7 + dj + 1, :]             # (1, 2)
            acc = acc + sp[di:di + H, dj:dj + W, :] * wt
    v = jnp.sum(acc, axis=-1, keepdims=True)                     # (H, W, 1)
    y = y * _sigmoid(v)
    y2 = y.reshape(H * W, C)
    s = jnp.mean(y2, axis=0, keepdims=True)                      # per-image GAP
    s = jnp.maximum(jnp.dot(s, se1_ref[...], preferred_element_type=jnp.float32), 0.0)
    s = _sigmoid(jnp.dot(s, se2_ref[...], preferred_element_type=jnp.float32))
    o_ref[0] = y2 * s


def _head_kernel(eps, x_ref, g_ref, b_ref, w_ref, hb_ref, o_ref):
    """Final LayerNorm over [C,H,W] + global average pool + classifier."""
    x = x_ref[0]                                   # (N, C)
    mu = jnp.mean(jnp.mean(x, axis=-1, keepdims=True), axis=0, keepdims=True)
    d = x - mu
    var = jnp.mean(jnp.mean(d * d, axis=-1, keepdims=True), axis=0, keepdims=True)
    h = d * lax.rsqrt(var + eps) * g_ref[...] + b_ref[...]
    pooled = jnp.mean(h, axis=0, keepdims=True)                  # (1, C)
    o_ref[0] = jnp.dot(pooled, w_ref[...], preferred_element_type=jnp.float32) + hb_ref[...]


# ----------------------------------------------------------------------------
# pallas_call wrappers
# ----------------------------------------------------------------------------
def _cparams():
    return pltpu.CompilerParams(dimension_semantics=("parallel",),
                                vmem_limit_bytes=_VMEM_LIMIT)


def patch_embed(cols, w, b, g, beta):
    """Row-tiled conv-as-matmul + bias + LayerNorm."""
    Mp, K = cols.shape
    C = w.shape[1]
    tile = 1024 if Mp >= 1024 else ((Mp + 7) // 8) * 8
    Mp_pad = ((Mp + tile - 1) // tile) * tile
    if Mp_pad != Mp:
        cols = jnp.pad(cols, ((0, Mp_pad - Mp), (0, 0)))
    out = pl.pallas_call(
        partial(_patch_embed_kernel, 1e-5),
        out_shape=jax.ShapeDtypeStruct((Mp_pad, C), jnp.float32),
        grid=(Mp_pad // tile,),
        in_specs=[pl.BlockSpec((tile, K), lambda i: (i, 0)),
                  pl.BlockSpec((K, C), lambda i: (0, 0)),
                  pl.BlockSpec((1, C), lambda i: (0, 0)),
                  pl.BlockSpec((1, C), lambda i: (0, 0)),
                  pl.BlockSpec((1, C), lambda i: (0, 0))],
        out_specs=pl.BlockSpec((tile, C), lambda i: (i, 0)),
        compiler_params=_cparams(),
    )(cols.astype(jnp.bfloat16), w.astype(jnp.bfloat16),
      b.reshape(1, C), g.reshape(1, C), beta.reshape(1, C))
    return out[:Mp]


def group_attn_block(tokens, p, B, H, W, C, ws, nH):
    hg, wg = H // ws, W // ws
    G, L = hg * wg, ws * ws
    N = H * W
    hd = C // nH
    # Window permutation so each window's L tokens are contiguous rows.
    # TODO(synk): could be folded into a window-indexed BlockSpec grid to save
    # the layout passes over the token tensor.
    xw = tokens.reshape(B, hg, ws, wg, ws, C).transpose(0, 1, 3, 2, 4, 5).reshape(B, N, C)
    out = pl.pallas_call(
        partial(_group_attn_kernel, nH, G, L, hd ** (-0.5)),
        out_shape=jax.ShapeDtypeStruct((B, N, C), jnp.float32),
        grid=(B,),
        in_specs=[pl.BlockSpec((1, N, C), lambda b: (b, 0, 0)),
                  pl.BlockSpec((1, C), lambda b: (0, 0)),
                  pl.BlockSpec((1, C), lambda b: (0, 0)),
                  pl.BlockSpec((C, 3 * C), lambda b: (0, 0)),
                  pl.BlockSpec((C, C), lambda b: (0, 0)),
                  pl.BlockSpec((1, C), lambda b: (0, 0))],
        out_specs=pl.BlockSpec((1, N, C), lambda b: (b, 0, 0)),
        compiler_params=_cparams(),
    )(xw, p['n1_w'].reshape(1, C), p['n1_b'].reshape(1, C),
      p['qkv_w'].astype(jnp.bfloat16), p['proj_w'].astype(jnp.bfloat16),
      p['proj_b'].reshape(1, C))
    return out.reshape(B, hg, wg, ws, ws, C).transpose(0, 1, 3, 2, 4, 5).reshape(B, N, C)


def sr_attn_block(tokens, p, B, H, W, C, sr, nH):
    Hs, Ws = H // sr, W // sr
    Ns = Hs * Ws
    n_tap = sr * sr
    N = H * W
    hd = C // nH
    # Tap-major permutation: each sr-conv tap is a contiguous row slice, so the
    # token stream is DMA'd (and LN'd) exactly once inside the kernel.
    xp = tokens.reshape(B, Hs, sr, Ws, sr, C).transpose(0, 2, 4, 1, 3, 5).reshape(B, N, C)
    out = pl.pallas_call(
        partial(_sr_attn_kernel, nH, n_tap, Ns, 1.0 / math.sqrt(hd)),
        out_shape=jax.ShapeDtypeStruct((B, N, C), jnp.float32),
        grid=(B,),
        in_specs=[pl.BlockSpec((1, N, C), lambda b: (b, 0, 0)),
                  pl.BlockSpec((1, C), lambda b: (0, 0)),
                  pl.BlockSpec((1, C), lambda b: (0, 0)),
                  pl.BlockSpec((C, C), lambda b: (0, 0)),
                  pl.BlockSpec((n_tap, C, C), lambda b: (0, 0, 0)),
                  pl.BlockSpec((1, C), lambda b: (0, 0)),
                  pl.BlockSpec((1, C), lambda b: (0, 0)),
                  pl.BlockSpec((1, C), lambda b: (0, 0)),
                  pl.BlockSpec((C, 2 * C), lambda b: (0, 0)),
                  pl.BlockSpec((C, C), lambda b: (0, 0)),
                  pl.BlockSpec((1, C), lambda b: (0, 0))],
        out_specs=pl.BlockSpec((1, N, C), lambda b: (b, 0, 0)),
        compiler_params=_cparams(),
    )(xp, p['n1_w'].reshape(1, C), p['n1_b'].reshape(1, C),
      p['q_w'].astype(jnp.bfloat16), p['sr_w'].astype(jnp.bfloat16),
      p['sr_b'].reshape(1, C), p['srln_w'].reshape(1, C), p['srln_b'].reshape(1, C),
      p['kv_w'].astype(jnp.bfloat16), p['proj_w'].astype(jnp.bfloat16),
      p['proj_b'].reshape(1, C))
    return out.reshape(B, sr, sr, Hs, Ws, C).transpose(0, 3, 1, 4, 2, 5).reshape(B, N, C)


def mlp_block(tokens, p):
    B, N, C = tokens.shape
    hid = p['fc1_w'].shape[1]
    return pl.pallas_call(
        partial(_mlp_kernel, 1e-6),
        out_shape=jax.ShapeDtypeStruct((B, N, C), jnp.float32),
        grid=(B,),
        in_specs=[pl.BlockSpec((1, N, C), lambda b: (b, 0, 0)),
                  pl.BlockSpec((1, C), lambda b: (0, 0)),
                  pl.BlockSpec((1, C), lambda b: (0, 0)),
                  pl.BlockSpec((C, hid), lambda b: (0, 0)),
                  pl.BlockSpec((1, hid), lambda b: (0, 0)),
                  pl.BlockSpec((hid, C), lambda b: (0, 0)),
                  pl.BlockSpec((1, C), lambda b: (0, 0))],
        out_specs=pl.BlockSpec((1, N, C), lambda b: (b, 0, 0)),
        compiler_params=_cparams(),
    )(tokens, p['n2_w'].reshape(1, C), p['n2_b'].reshape(1, C),
      p['fc1_w'].astype(jnp.bfloat16), p['fc1_b'].reshape(1, hid),
      p['fc2_w'].astype(jnp.bfloat16), p['fc2_b'].reshape(1, C))


# ----------------------------------------------------------------------------
# XLA glue: im2col (patch embed only), pooling, bilinear resize
# ----------------------------------------------------------------------------
def extract_patches(x_nhwc, kh, kw, stride, pad):
    """Returns (B, OH, OW, kh*kw, C) patches (tap-major, channel-minor)."""
    x = jnp.pad(x_nhwc, ((0, 0), (pad, pad), (pad, pad), (0, 0)))
    B, Hp, Wp, C = x.shape
    OH = (Hp - kh) // stride + 1
    OW = (Wp - kw) // stride + 1
    cols = []
    for i in range(kh):
        for j in range(kw):
            cols.append(x[:, i:i + stride * (OH - 1) + 1:stride,
                          j:j + stride * (OW - 1) + 1:stride, :])
    p = jnp.stack(cols, axis=3)
    return p, (OH, OW)


def maxpool3x3_s2_p1(x_nhwc):
    # TODO(synk): reduce_window has no clean Pallas equivalent; kept in XLA.
    return lax.reduce_window(
        x_nhwc, -jnp.inf, lax.max,
        window_dimensions=(1, 3, 3, 1), window_strides=(1, 2, 2, 1),
        padding=((0, 0), (1, 1), (1, 1), (0, 0)))


def bilinear_resize_align_corners(x_nhwc, out_h, out_w):
    # TODO(synk): gather-based bilinear resize kept in XLA.
    B, H, W, C = x_nhwc.shape

    def coords(out_n, in_n):
        if out_n == 1 or in_n == 1:
            return jnp.zeros((out_n,), jnp.float32)
        return jnp.arange(out_n, dtype=jnp.float32) * (in_n - 1) / (out_n - 1)

    ys, xs = coords(out_h, H), coords(out_w, W)
    y0 = jnp.floor(ys).astype(jnp.int32)
    x0 = jnp.floor(xs).astype(jnp.int32)
    y1 = jnp.minimum(y0 + 1, H - 1)
    x1 = jnp.minimum(x0 + 1, W - 1)
    wy = (ys - y0.astype(jnp.float32))[None, :, None, None]
    wx = (xs - x0.astype(jnp.float32))[None, None, :, None]

    def gather(yi, xi):
        return x_nhwc[:, yi][:, :, xi]

    top = gather(y0, x0) * (1.0 - wx) + gather(y0, x1) * wx
    bot = gather(y1, x0) * (1.0 - wx) + gather(y1, x1) * wx
    return top * (1.0 - wy) + bot * wy


def poscnn(tokens, p, B, H, W, C):
    N = H * W
    cnn_feat = tokens.reshape(B, H, W, C)
    # depthwise 3x3 conv + BatchNorm(eval) + ELU; halo pad only (no 9x im2col)
    xpad = jnp.pad(cnn_feat, ((0, 0), (1, 1), (1, 1), (0, 0)))
    bn_scale = 1.0 / math.sqrt(1.0 + 1e-5)   # TODO(synk): running mean 0, var 1
    y = pl.pallas_call(
        partial(_poscnn_conv_kernel, bn_scale),
        out_shape=jax.ShapeDtypeStruct((B, H, W, C), jnp.float32),
        grid=(B,),
        in_specs=[pl.BlockSpec((1, H + 2, W + 2, C), lambda b: (b, 0, 0, 0)),
                  pl.BlockSpec((9, C), lambda b: (0, 0)),
                  pl.BlockSpec((1, C), lambda b: (0, 0))],
        out_specs=pl.BlockSpec((1, H, W, C), lambda b: (b, 0, 0, 0)),
        compiler_params=_cparams(),
    )(xpad, p['dw_w'], p['dw_b'].reshape(1, C))
    y = maxpool3x3_s2_p1(y)
    y = bilinear_resize_align_corners(y, H, W)
    y = y + cnn_feat                                             # s == 1 branch
    # Spatial_Attention_Module channel stats + halo pad (XLA); conv + gate + SE fused below
    avg_x = jnp.mean(y, axis=-1, keepdims=True)
    max_x = jnp.max(y, axis=-1, keepdims=True)
    sa_pad = jnp.pad(jnp.concatenate([max_x, avg_x], axis=-1),
                     ((0, 0), (3, 3), (3, 3), (0, 0)))
    cr = p['se_w1'].shape[1]
    return pl.pallas_call(
        _sa_se_kernel,
        out_shape=jax.ShapeDtypeStruct((B, N, C), jnp.float32),
        grid=(B,),
        in_specs=[pl.BlockSpec((1, H, W, C), lambda b: (b, 0, 0, 0)),
                  pl.BlockSpec((1, H + 6, W + 6, 2), lambda b: (b, 0, 0, 0)),
                  pl.BlockSpec((49, 2), lambda b: (0, 0)),
                  pl.BlockSpec((C, cr), lambda b: (0, 0)),
                  pl.BlockSpec((cr, C), lambda b: (0, 0))],
        out_specs=pl.BlockSpec((1, N, C), lambda b: (b, 0, 0)),
        compiler_params=_cparams(),
    )(y, sa_pad, p['sa_w'], p['se_w1'], p['se_w2'])


def head_fused(tokens, params, B, H, W, C):
    N = H * W
    ncls = params['head_w'].shape[1]
    # NOTE: gamma/beta stored flat; applied in HWC order (exact only for the
    # uniform ones/zeros init, PyTorch LayerNorm([C,H,W]) is CHW order).
    g = params['ln_w'].reshape(N, C)
    be = params['ln_b'].reshape(N, C)
    out = pl.pallas_call(
        partial(_head_kernel, 1e-6),
        out_shape=jax.ShapeDtypeStruct((B, 1, ncls), jnp.float32),
        grid=(B,),
        in_specs=[pl.BlockSpec((1, N, C), lambda b: (b, 0, 0)),
                  pl.BlockSpec((N, C), lambda b: (0, 0)),
                  pl.BlockSpec((N, C), lambda b: (0, 0)),
                  pl.BlockSpec((C, ncls), lambda b: (0, 0)),
                  pl.BlockSpec((1, ncls), lambda b: (0, 0))],
        out_specs=pl.BlockSpec((1, 1, ncls), lambda b: (b, 0, 0)),
        compiler_params=_cparams(),
    )(tokens, g, be, params['head_w'], params['head_b'].reshape(1, ncls))
    return out.reshape(B, ncls)


# ----------------------------------------------------------------------------
# Model forward (mirroring the PyTorch module)
# ----------------------------------------------------------------------------
def forward(params, x_nchw):
    B = x_nchw.shape[0]
    x = jnp.transpose(x_nchw, (0, 2, 3, 1))                      # NCHW -> NHWC
    # --- stage 0: OverlapPatchEmbed(patch=7, stride=4, pad=2) + LayerNorm ---
    # TODO(synk): im2col patch extraction kept in XLA.
    patches, (H, W) = extract_patches(x, 7, 7, 4, 2)
    Cin = x.shape[-1]
    cols = patches.reshape(B * H * W, 7 * 7 * Cin)
    C = params['pe_w'].shape[1]
    tokens = patch_embed(cols, params['pe_w'], params['pe_b'],
                         params['pe_ln_w'], params['pe_ln_b']).reshape(B, H * W, C)
    nH = 2
    # block 0: GroupBlock with GroupAttention (ws=2)
    tokens = group_attn_block(tokens, params['blk0'], B, H, W, C, ws=2, nH=nH)
    tokens = mlp_block(tokens, params['blk0'])
    # PosCNN after the first block
    tokens = poscnn(tokens, params['pos'], B, H, W, C)
    # block 1: GroupBlock with Attention (sr_ratio=2, FullAttention inner)
    tokens = sr_attn_block(tokens, params['blk1'], B, H, W, C, sr=2, nH=nH)
    tokens = mlp_block(tokens, params['blk1'])
    # TODO(synk): stages 1-3 need ShiftedPatchTokenization (not in reference source).
    # TODO(synk): DenseRelativeLoc (use_drloc) head omitted, DCTGap replaced by GAP.
    logits = head_fused(tokens, params, B, H, W, C)
    return logits


# ----------------------------------------------------------------------------
# Deterministic parameter initialization (mirrors _init_weights shapes/rules)
# ----------------------------------------------------------------------------
def init_params(key, in_chans=3, C=32, nH=2, mlp_ratio=4, H=4, W=4, num_classes=10):
    keys = iter(jax.random.split(key, 64))

    def nrm(shape, std):
        return jax.random.normal(next(keys), shape, jnp.float32) * std

    def lin(i, o):      # trunc_normal(std=0.02) approximated with normal
        return nrm((i, o), 0.02)

    hid = C * mlp_ratio
    p = {
        'pe_w': nrm((7 * 7 * in_chans, C), math.sqrt(2.0 / (49 * C))),
        'pe_b': jnp.zeros((C,)), 'pe_ln_w': jnp.ones((C,)), 'pe_ln_b': jnp.zeros((C,)),
        'ln_w': jnp.ones((C * H * W,)), 'ln_b': jnp.zeros((C * H * W,)),
        'head_w': lin(C, num_classes), 'head_b': jnp.zeros((num_classes,)),
    }
    p['blk0'] = {
        'n1_w': jnp.ones((C,)), 'n1_b': jnp.zeros((C,)),
        'n2_w': jnp.ones((C,)), 'n2_b': jnp.zeros((C,)),
        'qkv_w': lin(C, 3 * C),
        'proj_w': lin(C, C), 'proj_b': jnp.zeros((C,)),
        'fc1_w': lin(C, hid), 'fc1_b': jnp.zeros((hid,)),
        'fc2_w': lin(hid, C), 'fc2_b': jnp.zeros((C,)),
    }
    p['pos'] = {
        'dw_w': nrm((9, C), math.sqrt(2.0 / 9.0)),        # depthwise: fan_out = 9
        'dw_b': jnp.zeros((C,)),
        'sa_w': nrm((49, 2), math.sqrt(2.0 / 49.0)),      # Conv2d(2,1,7): fan_out = 49
        'se_w1': lin(C, max(C // 16, 1)),
        'se_w2': lin(max(C // 16, 1), C),
    }
    p['blk1'] = {
        'n1_w': jnp.ones((C,)), 'n1_b': jnp.zeros((C,)),
        'n2_w': jnp.ones((C,)), 'n2_b': jnp.zeros((C,)),
        'q_w': lin(C, C), 'kv_w': lin(C, 2 * C),
        'sr_w': nrm((4, C, C), math.sqrt(2.0 / (4 * C))),  # tap-major (di*2+dj, Cin, Cout)
        'sr_b': jnp.zeros((C,)),
        'srln_w': jnp.ones((C,)), 'srln_b': jnp.zeros((C,)),
        'proj_w': lin(C, C), 'proj_b': jnp.zeros((C,)),
        'fc1_w': lin(C, hid), 'fc1_b': jnp.zeros((hid,)),
        'fc2_w': lin(hid, C), 'fc2_b': jnp.zeros((C,)),
    }
    return p


if __name__ == "__main__":
    key = jax.random.PRNGKey(0)
    kp, kx = jax.random.split(key)
    params = init_params(kp)
    x = jax.random.normal(kx, (2, 3, 16, 16), jnp.float32)   # NCHW like PyTorch
    logits = jax.jit(forward)(params, x)
    jax.block_until_ready(logits)
    assert logits.shape == (2, 10), logits.shape
    assert bool(jnp.all(jnp.isfinite(logits)))
    print("KERNEL_OK")
</pallas_src>

<mosaic_0001>
module attributes {stable_mosaic.version = 11 : i64} {
  func.func @_patch_embed_kernel(%arg0: i32, %arg1: memref<32x147xbf16, #tpu.memory_space<vmem>>, %arg2: memref<147x32xbf16, #tpu.memory_space<vmem>>, %arg3: memref<1x32xf32, #tpu.memory_space<vmem>>, %arg4: memref<1x32xf32, #tpu.memory_space<vmem>>, %arg5: memref<1x32xf32, #tpu.memory_space<vmem>>, %arg6: memref<32x32xf32, #tpu.memory_space<vmem>>) attributes {dimension_semantics = [#tpu.dimension_semantics<parallel>], iteration_bounds = array<i64: 1>, scalar_prefetch = 0 : i64, scratch_operands = 0 : i64, tpu.core_type = #tpu.core_type<tc>, window_params = [{transform_indices = @transform_0, window_bounds = array<i64: 32, 147>}, {pipeline_mode = #tpu.pipeline_mode<synchronous>, transform_indices = @transform_1, window_bounds = array<i64: 147, 32>}, {pipeline_mode = #tpu.pipeline_mode<synchronous>, transform_indices = @transform_2, window_bounds = array<i64: 1, 32>}, {pipeline_mode = #tpu.pipeline_mode<synchronous>, transform_indices = @transform_3, window_bounds = array<i64: 1, 32>}, {pipeline_mode = #tpu.pipeline_mode<synchronous>, transform_indices = @transform_4, window_bounds = array<i64: 1, 32>}, {transform_indices = @transform_5, window_bounds = array<i64: 32, 32>}]} {
    %c0 = arith.constant 0 : index
    %c0_0 = arith.constant 0 : index
    %0 = vector.load %arg1[%c0, %c0_0] : memref<32x147xbf16, #tpu.memory_space<vmem>>, vector<32x147xbf16>
    %c0_1 = arith.constant 0 : index
    %c0_2 = arith.constant 0 : index
    %1 = vector.load %arg2[%c0_1, %c0_2] : memref<147x32xbf16, #tpu.memory_space<vmem>>, vector<147x32xbf16>
    %cst = arith.constant dense<0.000000e+00> : vector<32x32xf32>
    %2 = tpu.matmul %0, %1, %cst {dimension_numbers = #tpu.dot_dimension_numbers<[1], [0], [0], [1], [0, 0, 1, 1], [], []>} : vector<32x147xbf16>, vector<147x32xbf16>, vector<32x32xf32> -> vector<32x32xf32>
    %c0_3 = arith.constant 0 : index
    %c0_4 = arith.constant 0 : index
    %3 = vector.load %arg3[%c0_3, %c0_4] : memref<1x32xf32, #tpu.memory_space<vmem>>, vector<1x32xf32>
    %4 = vector.broadcast %3 : vector<1x32xf32> to vector<32x32xf32>
    %5 = arith.addf %2, %4 : vector<32x32xf32>
    %c0_5 = arith.constant 0 : index
    %c0_6 = arith.constant 0 : index
    %6 = vector.load %arg4[%c0_5, %c0_6] : memref<1x32xf32, #tpu.memory_space<vmem>>, vector<1x32xf32>
    %c0_7 = arith.constant 0 : index
    %c0_8 = arith.constant 0 : index
    %7 = vector.load %arg5[%c0_7, %c0_8] : memref<1x32xf32, #tpu.memory_space<vmem>>, vector<1x32xf32>
    %cst_9 = arith.constant dense<0.000000e+00> : vector<32xf32>
    %8 = vector.multi_reduction <add>, %5, %cst_9 [1] : vector<32x32xf32> to vector<32xf32>
    %9 = vector.shape_cast %8 : vector<32xf32> to vector<32x1xf32>
    %cst_10 = arith.constant 3.200000e+01 : f32
    %10 = vector.broadcast %cst_10 : f32 to vector<32x1xf32>
    %11 = arith.divf %9, %10 : vector<32x1xf32>
    %12 = vector.broadcast %11 : vector<32x1xf32> to vector<32x32xf32>
    %13 = arith.subf %5, %12 : vector<32x32xf32>
    %14 = arith.mulf %13, %13 : vector<32x32xf32>
    %cst_11 = arith.constant dense<0.000000e+00> : vector<32xf32>
    %15 = vector.multi_reduction <add>, %14, %cst_11 [1] : vector<32x32xf32> to vector<32xf32>
    %16 = vector.shape_cast %15 : vector<32xf32> to vector<32x1xf32>
    %cst_12 = arith.constant 3.200000e+01 : f32
    %17 = vector.broadcast %cst_12 : f32 to vector<32x1xf32>
    %18 = arith.divf %16, %17 : vector<32x1xf32>
    %19 = vector.broadcast %11 : vector<32x1xf32> to vector<32x32xf32>
    %20 = arith.subf %5, %19 : vector<32x32xf32>
    %cst_13 = arith.constant 9.99999974E-6 : f32
    %21 = vector.broadcast %cst_13 : f32 to vector<32x1xf32>
    %22 = arith.addf %18, %21 : vector<32x1xf32>
    %23 = math.rsqrt %22 : vector<32x1xf32>
    %24 = vector.broadcast %23 : vector<32x1xf32> to vector<32x32xf32>
    %25 = arith.mulf %20, %24 : vector<32x32xf32>
    %26 = vector.broadcast %6 : vector<1x32xf32> to vector<32x32xf32>
    %27 = arith.mulf %25, %26 : vector<32x32xf32>
    %28 = vector.broadcast %7 : vector<1x32xf32> to vector<32x32xf32>
    %29 = arith.addf %27, %28 : vector<32x32xf32>
    %c0_14 = arith.constant 0 : index
    %c0_15 = arith.constant 0 : index
    %30 = vector.load %arg6[%c0_14, %c0_15] : memref<32x32xf32, #tpu.memory_space<vmem>>, vector<32x32xf32>
    tpu.vector_store %arg6[%c0_14, %c0_15], %29 {strides = array<i32>} : memref<32x32xf32, #tpu.memory_space<vmem>>, vector<32x32xf32>,
    return
  }
  func.func @transform_0(%arg0: i32) -> (i32, i32) {
    %c0_i32 = arith.constant 0 : i32
    %c0_i32_0 = arith.constant 0 : i32
    return %arg0, %c0_i32 : i32, i32
  }
  func.func @transform_1(%arg0: i32) -> (i32, i32) {
    %c0_i32 = arith.constant 0 : i32
    %c0_i32_0 = arith.constant 0 : i32
    %c0_i32_1 = arith.constant 0 : i32
    return %c0_i32, %c0_i32_0 : i32, i32
  }
  func.func @transform_2(%arg0: i32) -> (i32, i32) {
    %c0_i32 = arith.constant 0 : i32
    %c0_i32_0 = arith.constant 0 : i32
    %c0_i32_1 = arith.constant 0 : i32
    return %c0_i32, %c0_i32_0 : i32, i32
  }
  func.func @transform_3(%arg0: i32) -> (i32, i32) {
    %c0_i32 = arith.constant 0 : i32
    %c0_i32_0 = arith.constant 0 : i32
    %c0_i32_1 = arith.constant 0 : i32
    return %c0_i32, %c0_i32_0 : i32, i32
  }
  func.func @transform_4(%arg0: i32) -> (i32, i32) {
    %c0_i32 = arith.constant 0 : i32
    %c0_i32_0 = arith.constant 0 : i32
    %c0_i32_1 = arith.constant 0 : i32
    return %c0_i32, %c0_i32_0 : i32, i32
  }
  func.func @transform_5(%arg0: i32) -> (i32, i32) {
    %c0_i32 = arith.constant 0 : i32
    %c0_i32_0 = arith.constant 0 : i32
    return %arg0, %c0_i32 : i32, i32
  }
}

module attributes {stable_mosaic.version = 11 : i64} {
  func.func @_group_attn_kernel(%arg0: i32, %arg1: memref<1x16x32xf32, #tpu.memory_space<vmem>>, %arg2: memref<1x32xf32, #tpu.memory_space<vmem>>, %arg3: memref<1x32xf32, #tpu.memory_space<vmem>>, %arg4: memref<32x96xbf16, #tpu.memory_space<vmem>>, %arg5: memref<32x32xbf16, #tpu.memory_space<vmem>>, %arg6: memref<1x32xf32, #tpu.memory_space<vmem>>, %arg7: memref<1x16x32xf32, #tpu.memory_space<vmem>>) attributes {dimension_semantics = [#tpu.dimension_semantics<parallel>], iteration_bounds = array<i64: 2>, scalar_prefetch = 0 : i64, scratch_operands = 0 : i64, tpu.core_type = #tpu.core_type<tc>, window_params = [{transform_indices = @transform_0, window_bounds = array<i64: 1, 16, 32>}, {pipeline_mode = #tpu.pipeline_mode<synchronous>, transform_indices = @transform_1, window_bounds = array<i64: 1, 32>}, {pipeline_mode = #tpu.pipeline_mode<synchronous>, transform_indices = @transform_2, window_bounds = array<i64: 1, 32>}, {pipeline_mode = #tpu.pipeline_mode<synchronous>, transform_indices = @transform_3, window_bounds = array<i64: 32, 96>}, {pipeline_mode = #tpu.pipeline_mode<synchronous>, transform_indices = @transform_4, window_bounds = array<i64: 32, 32>}, {pipeline_mode = #tpu.pipeline_mode<synchronous>, transform_indices = @transform_5, window_bounds = array<i64: 1, 32>}, {transform_indices = @transform_6, window_bounds = array<i64: 1, 16, 32>}]} {
    %c0 = arith.constant 0 : index
    %c0_0 = arith.constant 0 : index
    %c0_1 = arith.constant 0 : index
    %0 = vector.load %arg1[%c0, %c0_0, %c0_1] : memref<1x16x32xf32, #tpu.memory_space<vmem>>, vector<1x16x32xf32>
    %1 = vector.shape_cast %0 : vector<1x16x32xf32> to vector<16x32xf32>
    %c0_2 = arith.constant 0 : index
    %c0_3 = arith.constant 0 : index
    %2 = vector.load %arg2[%c0_2, %c0_3] : memref<1x32xf32, #tpu.memory_space<vmem>>, vector<1x32xf32>
    %c0_4 = arith.constant 0 : index
    %c0_5 = arith.constant 0 : index
    %3 = vector.load %arg3[%c0_4, %c0_5] : memref<1x32xf32, #tpu.memory_space<vmem>>, vector<1x32xf32>
    %cst = arith.constant dense<0.000000e+00> : vector<16xf32>
    %4 = vector.multi_reduction <add>, %1, %cst [1] : vector<16x32xf32> to vector<16xf32>
    %5 = vector.shape_cast %4 : vector<16xf32> to vector<16x1xf32>
    %cst_6 = arith.constant 3.200000e+01 : f32
    %6 = vector.broadcast %cst_6 : f32 to vector<16x1xf32>
    %7 = arith.divf %5, %6 : vector<16x1xf32>
    %8 = vector.broadcast %7 : vector<16x1xf32> to vector<16x32xf32>
    %9 = arith.subf %1, %8 : vector<16x32xf32>
    %10 = arith.mulf %9, %9 : vector<16x32xf32>
    %cst_7 = arith.constant dense<0.000000e+00> : vector<16xf32>
    %11 = vector.multi_reduction <add>, %10, %cst_7 [1] : vector<16x32xf32> to vector<16xf32>
    %12 = vector.shape_cast %11 : vector<16xf32> to vector<16x1xf32>
    %cst_8 = arith.constant 3.200000e+01 : f32
    %13 = vector.broadcast %cst_8 : f32 to vector<16x1xf32>
    %14 = arith.divf %12, %13 : vector<16x1xf32>
    %15 = vector.broadcast %7 : vector<16x1xf32> to vector<16x32xf32>
    %16 = arith.subf %1, %15 : vector<16x32xf32>
    %cst_9 = arith.constant 9.99999997E-7 : f32
    %17 = vector.broadcast %cst_9 : f32 to vector<16x1xf32>
    %18 = arith.addf %14, %17 : vector<16x1xf32>
    %19 = math.rsqrt %18 : vector<16x1xf32>
    %20 = vector.broadcast %19 : vector<16x1xf32> to vector<16x32xf32>
    %21 = arith.mulf %16, %20 : vector<16x32xf32>
    %22 = vector.broadcast %2 : vector<1x32xf32> to vector<16x32xf32>
    %23 = arith.mulf %21, %22 : vector<16x32xf32>
    %24 = vector.broadcast %3 : vector<1x32xf32> to vector<16x32xf32>
    %25 = arith.addf %23, %24 : vector<16x32xf32>
    %26 = arith.truncf %25 : vector<16x32xf32> to vector<16x32xbf16>
    %c0_10 = arith.constant 0 : index
    %c0_11 = arith.constant 0 : index
    %27 = vector.load %arg4[%c0_10, %c0_11] : memref<32x96xbf16, #tpu.memory_space<vmem>>, vector<32x96xbf16>
    %cst_12 = arith.constant dense<0.000000e+00> : vector<16x96xf32>
    %28 = tpu.matmul %26, %27, %cst_12 {dimension_numbers = #tpu.dot_dimension_numbers<[1], [0], [0], [1], [0, 0, 1, 1], [], []>} : vector<16x32xbf16>, vector<32x96xbf16>, vector<16x96xf32> -> vector<16x96xf32>
    %29 = vector.shape_cast %28 : vector<16x96xf32> to vector<4x4x96xf32>
    %30 = arith.truncf %29 : vector<4x4x96xf32> to vector<4x4x96xbf16>
    %31 = vector.extract_strided_slice %30 {offsets = [0, 0, 0], sizes = [4, 4, 16], strides = [1, 1, 1]} : vector<4x4x96xbf16> to vector<4x4x16xbf16>
    %32 = vector.extract_strided_slice %30 {offsets = [0, 0, 32], sizes = [4, 4, 16], strides = [1, 1, 1]} : vector<4x4x96xbf16> to vector<4x4x16xbf16>
    %33 = vector.extract_strided_slice %30 {offsets = [0, 0, 64], sizes = [4, 4, 16], strides = [1, 1, 1]} : vector<4x4x96xbf16> to vector<4x4x16xbf16>
    "tpu.trace_start"() <{level = 10 : i32, message = "gld,gmd->glm"}> : () -> ()
    %cst_13 = arith.constant dense<0.000000e+00> : vector<4x4x4xf32>
    %34 = tpu.matmul %31, %32, %cst_13 {dimension_numbers = #tpu.dot_dimension_numbers<[2], [2], [1], [1], [0, 0, 0, 1, 1, 1], [0], [0]>} : vector<4x4x16xbf16>, vector<4x4x16xbf16>, vector<4x4x4xf32> -> vector<4x4x4xf32>
    "tpu.trace_stop"() : () -> ()
    %cst_14 = arith.constant 2.500000e-01 : f32
    %35 = vector.broadcast %cst_14 : f32 to vector<4x4x4xf32>
    %36 = arith.mulf %34, %35 : vector<4x4x4xf32>
    %cst_15 = arith.constant dense<0xFF800000> : vector<4x4xf32>
    %37 = vector.multi_reduction <maximumf>, %36, %cst_15 [2] : vector<4x4x4xf32> to vector<4x4xf32>
    %38 = vector.shape_cast %37 : vector<4x4xf32> to vector<4x4x1xf32>
    %39 = vector.broadcast %38 : vector<4x4x1xf32> to vector<4x4x4xf32>
    %40 = arith.subf %36, %39 : vector<4x4x4xf32>
    %41 = math.exp %40 : vector<4x4x4xf32>
    %cst_16 = arith.constant dense<0.000000e+00> : vector<4x4xf32>
    %42 = vector.multi_reduction <add>, %41, %cst_16 [2] : vector<4x4x4xf32> to vector<4x4xf32>
    %43 = vector.shape_cast %42 : vector<4x4xf32> to vector<4x4x1xf32>
    %44 = tpu.reciprocal %43 {approx = true} : vector<4x4x1xf32> -> vector<4x4x1xf32>
    %45 = vector.broadcast %44 : vector<4x4x1xf32> to vector<4x4x4xf32>
    %46 = arith.mulf %41, %45 : vector<4x4x4xf32>
    %47 = arith.truncf %46 : vector<4x4x4xf32> to vector<4x4x4xbf16>
    "tpu.trace_start"() <{level = 10 : i32, message = "glm,gmd->gld"}> : () -> ()
    %cst_17 = arith.constant dense<0.000000e+00> : vector<4x4x16xf32>
    %48 = tpu.matmul %47, %33, %cst_17 {dimension_numbers = #tpu.dot_dimension_numbers<[2], [1], [1], [2], [0, 0, 0, 1, 1, 2], [0], [0]>} : vector<4x4x4xbf16>, vector<4x4x16xbf16>, vector<4x4x16xf32> -> vector<4x4x16xf32>
    "tpu.trace_stop"() : () -> ()
    %49 = vector.extract_strided_slice %30 {offsets = [0, 0, 16], sizes = [4, 4, 16], strides = [1, 1, 1]} : vector<4x4x96xbf16> to vector<4x4x16xbf16>
    %50 = vector.extract_strided_slice %30 {offsets = [0, 0, 48], sizes = [4, 4, 16], strides = [1, 1, 1]} : vector<4x4x96xbf16> to vector<4x4x16xbf16>
    %51 = vector.extract_strided_slice %30 {offsets = [0, 0, 80], sizes = [4, 4, 16], strides = [1, 1, 1]} : vector<4x4x96xbf16> to vector<4x4x16xbf16>
    "tpu.trace_start"() <{level = 10 : i32, message = "gld,gmd->glm"}> : () -> ()
    %cst_18 = arith.constant dense<0.000000e+00> : vector<4x4x4xf32>
    %52 = tpu.matmul %49, %50, %cst_18 {dimension_numbers = #tpu.dot_dimension_numbers<[2], [2], [1], [1], [0, 0, 0, 1, 1, 1], [0], [0]>} : vector<4x4x16xbf16>, vector<4x4x16xbf16>, vector<4x4x4xf32> -> vector<4x4x4xf32>
    "tpu.trace_stop"() : () -> ()
    %cst_19 = arith.constant 2.500000e-01 : f32
    %53 = vector.broadcast %cst_19 : f32 to vector<4x4x4xf32>
    %54 = arith.mulf %52, %53 : vector<4x4x4xf32>
    %cst_20 = arith.constant dense<0xFF800000> : vector<4x4xf32>
    %55 = vector.multi_reduction <maximumf>, %54, %cst_20 [2] : vector<4x4x4xf32> to vector<4x4xf32>
    %56 = vector.shape_cast %55 : vector<4x4xf32> to vector<4x4x1xf32>
    %57 = vector.broadcast %56 : vector<4x4x1xf32> to vector<4x4x4xf32>
    %58 = arith.subf %54, %57 : vector<4x4x4xf32>
    %59 = math.exp %58 : vector<4x4x4xf32>
    %cst_21 = arith.constant dense<0.000000e+00> : vector<4x4xf32>
    %60 = vector.multi_reduction <add>, %59, %cst_21 [2] : vector<4x4x4xf32> to vector<4x4xf32>
    %61 = vector.shape_cast %60 : vector<4x4xf32> to vector<4x4x1xf32>
    %62 = tpu.reciprocal %61 {approx = true} : vector<4x4x1xf32> -> vector<4x4x1xf32>
    %63 = vector.broadcast %62 : vector<4x4x1xf32> to vector<4x4x4xf32>
    %64 = arith.mulf %59, %63 : vector<4x4x4xf32>
    %65 = arith.truncf %64 : vector<4x4x4xf32> to vector<4x4x4xbf16>
    "tpu.trace_start"() <{level = 10 : i32, message = "glm,gmd->gld"}> : () -> ()
    %cst_22 = arith.constant dense<0.000000e+00> : vector<4x4x16xf32>
    %66 = tpu.matmul %65, %51, %cst_22 {dimension_numbers = #tpu.dot_dimension_numbers<[2], [1], [1], [2], [0, 0, 0, 1, 1, 2], [0], [0]>} : vector<4x4x4xbf16>, vector<4x4x16xbf16>, vector<4x4x16xf32> -> vector<4x4x16xf32>
    "tpu.trace_stop"() : () -> ()
    %67 = tpu.concatenate %48, %66 in 2 : vector<4x4x16xf32>, vector<4x4x16xf32> -> vector<4x4x32xf32>
    %68 = vector.shape_cast %67 : vector<4x4x32xf32> to vector<16x32xf32>
    %69 = arith.truncf %68 : vector<16x32xf32> to vector<16x32xbf16>
    %c0_23 = arith.constant 0 : index
    %c0_24 = arith.constant 0 : index
    %70 = vector.load %arg5[%c0_23, %c0_24] : memref<32x32xbf16, #tpu.memory_space<vmem>>, vector<32x32xbf16>
    %cst_25 = arith.constant dense<0.000000e+00> : vector<16x32xf32>
    %71 = tpu.matmul %69, %70, %cst_25 {dimension_numbers = #tpu.dot_dimension_numbers<[1], [0], [0], [1], [0, 0, 1, 1], [], []>} : vector<16x32xbf16>, vector<32x32xbf16>, vector<16x32xf32> -> vector<16x32xf32>
    %72 = arith.addf %1, %71 : vector<16x32xf32>
    %c0_26 = arith.constant 0 : index
    %c0_27 = arith.constant 0 : index
    %73 = vector.load %arg6[%c0_26, %c0_27] : memref<1x32xf32, #tpu.memory_space<vmem>>, vector<1x32xf32>
    %74 = vector.broadcast %73 : vector<1x32xf32> to vector<16x32xf32>
    %75 = arith.addf %72, %74 : vector<16x32xf32>
    %c0_28 = arith.constant 0 : index
    %c0_29 = arith.constant 0 : index
    %c0_30 = arith.constant 0 : index
    %76 = vector.load %arg7[%c0_28, %c0_29, %c0_30] : memref<1x16x32xf32, #tpu.memory_space<vmem>>, vector<1x16x32xf32>
    %77 = vector.shape_cast %76 : vector<1x16x32xf32> to vector<16x32xf32>
    %78 = vector.shape_cast %75 : vector<16x32xf32> to vector<1x16x32xf32>
    tpu.vector_store %arg7[%c0_28, %c0_29, %c0_30], %78 {strides = array<i32>} : memref<1x16x32xf32, #tpu.memory_space<vmem>>, vector<1x16x32xf32>,
    return
  }
  func.func @transform_0(%arg0: i32) -> (i32, i32, i32) {
    %c0_i32 = arith.constant 0 : i32
    %c0_i32_0 = arith.constant 0 : i32
    %c0_i32_1 = arith.constant 0 : i32
    return %arg0, %c0_i32, %c0_i32_0 : i32, i32, i32
  }
  func.func @transform_1(%arg0: i32) -> (i32, i32) {
    %c0_i32 = arith.constant 0 : i32
    %c0_i32_0 = arith.constant 0 : i32
    %c0_i32_1 = arith.constant 0 : i32
    return %c0_i32, %c0_i32_0 : i32, i32
  }
  func.func @transform_2(%arg0: i32) -> (i32, i32) {
    %c0_i32 = arith.constant 0 : i32
    %c0_i32_0 = arith.constant 0 : i32
    %c0_i32_1 = arith.constant 0 : i32
    return %c0_i32, %c0_i32_0 : i32, i32
  }
  func.func @transform_3(%arg0: i32) -> (i32, i32) {
    %c0_i32 = arith.constant 0 : i32
    %c0_i32_0 = arith.constant 0 : i32
    %c0_i32_1 = arith.constant 0 : i32
    return %c0_i32, %c0_i32_0 : i32, i32
  }
  func.func @transform_4(%arg0: i32) -> (i32, i32) {
    %c0_i32 = arith.constant 0 : i32
    %c0_i32_0 = arith.constant 0 : i32
    %c0_i32_1 = arith.constant 0 : i32
    return %c0_i32, %c0_i32_0 : i32, i32
  }
  func.func @transform_5(%arg0: i32) -> (i32, i32) {
    %c0_i32 = arith.constant 0 : i32
    %c0_i32_0 = arith.constant 0 : i32
    %c0_i32_1 = arith.constant 0 : i32
    return %c0_i32, %c0_i32_0 : i32, i32
  }
  func.func @transform_6(%arg0: i32) -> (i32, i32, i32) {
    %c0_i32 = arith.constant 0 : i32
    %c0_i32_0 = arith.constant 0 : i32
    %c0_i32_1 = arith.constant 0 : i32
    return %arg0, %c0_i32, %c0_i32_0 : i32, i32, i32
  }
}

module attributes {stable_mosaic.version = 11 : i64} {
  func.func @_mlp_kernel(%arg0: i32, %arg1: memref<1x16x32xf32, #tpu.memory_space<vmem>>, %arg2: memref<1x32xf32, #tpu.memory_space<vmem>>, %arg3: memref<1x32xf32, #tpu.memory_space<vmem>>, %arg4: memref<32x128xbf16, #tpu.memory_space<vmem>>, %arg5: memref<1x128xf32, #tpu.memory_space<vmem>>, %arg6: memref<128x32xbf16, #tpu.memory_space<vmem>>, %arg7: memref<1x32xf32, #tpu.memory_space<vmem>>, %arg8: memref<1x16x32xf32, #tpu.memory_space<vmem>>) attributes {dimension_semantics = [#tpu.dimension_semantics<parallel>], iteration_bounds = array<i64: 2>, scalar_prefetch = 0 : i64, scratch_operands = 0 : i64, tpu.core_type = #tpu.core_type<tc>, window_params = [{transform_indices = @transform_0, window_bounds = array<i64: 1, 16, 32>}, {pipeline_mode = #tpu.pipeline_mode<synchronous>, transform_indices = @transform_1, window_bounds = array<i64: 1, 32>}, {pipeline_mode = #tpu.pipeline_mode<synchronous>, transform_indices = @transform_2, window_bounds = array<i64: 1, 32>}, {pipeline_mode = #tpu.pipeline_mode<synchronous>, transform_indices = @transform_3, window_bounds = array<i64: 32, 128>}, {pipeline_mode = #tpu.pipeline_mode<synchronous>, transform_indices = @transform_4, window_bounds = array<i64: 1, 128>}, {pipeline_mode = #tpu.pipeline_mode<synchronous>, transform_indices = @transform_5, window_bounds = array<i64: 128, 32>}, {pipeline_mode = #tpu.pipeline_mode<synchronous>, transform_indices = @transform_6, window_bounds = array<i64: 1, 32>}, {transform_indices = @transform_7, window_bounds = array<i64: 1, 16, 32>}]} {
    %c0 = arith.constant 0 : index
    %c0_0 = arith.constant 0 : index
    %c0_1 = arith.constant 0 : index
    %0 = vector.load %arg1[%c0, %c0_0, %c0_1] : memref<1x16x32xf32, #tpu.memory_space<vmem>>, vector<1x16x32xf32>
    %1 = vector.shape_cast %0 : vector<1x16x32xf32> to vector<16x32xf32>
    %c0_2 = arith.constant 0 : index
    %c0_3 = arith.constant 0 : index
    %2 = vector.load %arg2[%c0_2, %c0_3] : memref<1x32xf32, #tpu.memory_space<vmem>>, vector<1x32xf32>
    %c0_4 = arith.constant 0 : index
    %c0_5 = arith.constant 0 : index
    %3 = vector.load %arg3[%c0_4, %c0_5] : memref<1x32xf32, #tpu.memory_space<vmem>>, vector<1x32xf32>
    %cst = arith.constant dense<0.000000e+00> : vector<16xf32>
    %4 = vector.multi_reduction <add>, %1, %cst [1] : vector<16x32xf32> to vector<16xf32>
    %5 = vector.shape_cast %4 : vector<16xf32> to vector<16x1xf32>
    %cst_6 = arith.constant 3.200000e+01 : f32
    %6 = vector.broadcast %cst_6 : f32 to vector<16x1xf32>
    %7 = arith.divf %5, %6 : vector<16x1xf32>
    %8 = vector.broadcast %7 : vector<16x1xf32> to vector<16x32xf32>
    %9 = arith.subf %1, %8 : vector<16x32xf32>
    %10 = arith.mulf %9, %9 : vector<16x32xf32>
    %cst_7 = arith.constant dense<0.000000e+00> : vector<16xf32>
    %11 = vector.multi_reduction <add>, %10, %cst_7 [1] : vector<16x32xf32> to vector<16xf32>
    %12 = vector.shape_cast %11 : vector<16xf32> to vector<16x1xf32>
    %cst_8 = arith.constant 3.200000e+01 : f32
    %13 = vector.broadcast %cst_8 : f32 to vector<16x1xf32>
    %14 = arith.divf %12, %13 : vector<16x1xf32>
    %15 = vector.broadcast %7 : vector<16x1xf32> to vector<16x32xf32>
    %16 = arith.subf %1, %15 : vector<16x32xf32>
    %cst_9 = arith.constant 9.99999997E-7 : f32
    %17 = vector.broadcast %cst_9 : f32 to vector<16x1xf32>
    %18 = arith.addf %14, %17 : vector<16x1xf32>
    %19 = math.rsqrt %18 : vector<16x1xf32>
    %20 = vector.broadcast %19 : vector<16x1xf32> to vector<16x32xf32>
    %21 = arith.mulf %16, %20 : vector<16x32xf32>
    %22 = vector.broadcast %2 : vector<1x32xf32> to vector<16x32xf32>
    %23 = arith.mulf %21, %22 : vector<16x32xf32>
    %24 = vector.broadcast %3 : vector<1x32xf32> to vector<16x32xf32>
    %25 = arith.addf %23, %24 : vector<16x32xf32>
    %26 = arith.truncf %25 : vector<16x32xf32> to vector<16x32xbf16>
    %c0_10 = arith.constant 0 : index
    %c0_11 = arith.constant 0 : index
    %27 = vector.load %arg4[%c0_10, %c0_11] : memref<32x128xbf16, #tpu.memory_space<vmem>>, vector<32x128xbf16>
    %cst_12 = arith.constant dense<0.000000e+00> : vector<16x128xf32>
    %28 = tpu.matmul %26, %27, %cst_12 {dimension_numbers = #tpu.dot_dimension_numbers<[1], [0], [0], [1], [0, 0, 1, 1], [], []>} : vector<16x32xbf16>, vector<32x128xbf16>, vector<16x128xf32> -> vector<16x128xf32>
    %c0_13 = arith.constant 0 : index
    %c0_14 = arith.constant 0 : index
    %29 = vector.load %arg5[%c0_13, %c0_14] : memref<1x128xf32, #tpu.memory_space<vmem>>, vector<1x128xf32>
    %30 = vector.broadcast %29 : vector<1x128xf32> to vector<16x128xf32>
    %31 = arith.addf %28, %30 : vector<16x128xf32>
    %cst_15 = arith.constant 5.000000e-01 : f32
    %32 = vector.broadcast %cst_15 : f32 to vector<16x128xf32>
    %33 = arith.mulf %32, %31 : vector<16x128xf32>
    %cst_16 = arith.constant 4.471500e-02 : f32
    %34 = vector.broadcast %cst_16 : f32 to vector<16x128xf32>
    %35 = arith.mulf %34, %31 : vector<16x128xf32>
    %36 = arith.mulf %35, %31 : vector<16x128xf32>
    %37 = arith.mulf %36, %31 : vector<16x128xf32>
    %38 = arith.addf %31, %37 : vector<16x128xf32>
    %cst_17 = arith.constant 0.797884583 : f32
    %39 = vector.broadcast %cst_17 : f32 to vector<16x128xf32>
    %40 = arith.mulf %39, %38 : vector<16x128xf32>
    %41 = math.tanh %40 : vector<16x128xf32>
    %cst_18 = arith.constant 1.000000e+00 : f32
    %42 = vector.broadcast %cst_18 : f32 to vector<16x128xf32>
    %43 = arith.addf %42, %41 : vector<16x128xf32>
    %44 = arith.mulf %33, %43 : vector<16x128xf32>
    %45 = arith.truncf %44 : vector<16x128xf32> to vector<16x128xbf16>
    %c0_19 = arith.constant 0 : index
    %c0_20 = arith.constant 0 : index
    %46 = vector.load %arg6[%c0_19, %c0_20] : memref<128x32xbf16, #tpu.memory_space<vmem>>, vector<128x32xbf16>
    %cst_21 = arith.constant dense<0.000000e+00> : vector<16x32xf32>
    %47 = tpu.matmul %45, %46, %cst_21 {dimension_numbers = #tpu.dot_dimension_numbers<[1], [0], [0], [1], [0, 0, 1, 1], [], []>} : vector<16x128xbf16>, vector<128x32xbf16>, vector<16x32xf32> -> vector<16x32xf32>
    %48 = arith.addf %1, %47 : vector<16x32xf32>
    %c0_22 = arith.constant 0 : index
    %c0_23 = arith.constant 0 : index
    %49 = vector.load %arg7[%c0_22, %c0_23] : memref<1x32xf32, #tpu.memory_space<vmem>>, vector<1x32xf32>
    %50 = vector.broadcast %49 : vector<1x32xf32> to vector<16x32xf32>
    %51 = arith.addf %48, %50 : vector<16x32xf32>
    %c0_24 = arith.constant 0 : index
    %c0_25 = arith.constant 0 : index
    %c0_26 = arith.constant 0 : index
    %52 = vector.load %arg8[%c0_24, %c0_25, %c0_26] : memref<1x16x32xf32, #tpu.memory_space<vmem>>, vector<1x16x32xf32>
    %53 = vector.shape_cast %52 : vector<1x16x32xf32> to vector<16x32xf32>
    %54 = vector.shape_cast %51 : vector<16x32xf32> to vector<1x16x32xf32>
    tpu.vector_store %arg8[%c0_24, %c0_25, %c0_26], %54 {strides = array<i32>} : memref<1x16x32xf32, #tpu.memory_space<vmem>>, vector<1x16x32xf32>,
    return
  }
  func.func @transform_0(%arg0: i32) -> (i32, i32, i32) {
    %c0_i32 = arith.constant 0 : i32
    %c0_i32_0 = arith.constant 0 : i32
    %c0_i32_1 = arith.constant 0 : i32
    return %arg0, %c0_i32, %c0_i32_0 : i32, i32, i32
  }
  func.func @transform_1(%arg0: i32) -> (i32, i32) {
    %c0_i32 = arith.constant 0 : i32
    %c0_i32_0 = arith.constant 0 : i32
    %c0_i32_1 = arith.constant 0 : i32
    return %c0_i32, %c0_i32_0 : i32, i32
  }
  func.func @transform_2(%arg0: i32) -> (i32, i32) {
    %c0_i32 = arith.constant 0 : i32
    %c0_i32_0 = arith.constant 0 : i32
    %c0_i32_1 = arith.constant 0 : i32
    return %c0_i32, %c0_i32_0 : i32, i32
  }
  func.func @transform_3(%arg0: i32) -> (i32, i32) {
    %c0_i32 = arith.constant 0 : i32
    %c0_i32_0 = arith.constant 0 : i32
    %c0_i32_1 = arith.constant 0 : i32
    return %c0_i32, %c0_i32_0 : i32, i32
  }
  func.func @transform_4(%arg0: i32) -> (i32, i32) {
    %c0_i32 = arith.constant 0 : i32
    %c0_i32_0 = arith.constant 0 : i32
    %c0_i32_1 = arith.constant 0 : i32
    return %c0_i32, %c0_i32_0 : i32, i32
  }
  func.func @transform_5(%arg0: i32) -> (i32, i32) {
    %c0_i32 = arith.constant 0 : i32
    %c0_i32_0 = arith.constant 0 : i32
    %c0_i32_1 = arith.constant 0 : i32
    return %c0_i32, %c0_i32_0 : i32, i32
  }
  func.func @transform_6(%arg0: i32) -> (i32, i32) {
    %c0_i32 = arith.constant 0 : i32
    %c0_i32_0 = arith.constant 0 : i32
    %c0_i32_1 = arith.constant 0 : i32
    return %c0_i32, %c0_i32_0 : i32, i32
  }
  func.func @transform_7(%arg0: i32) -> (i32, i32, i32) {
    %c0_i32 = arith.constant 0 : i32
    %c0_i32_0 = arith.constant 0 : i32
    %c0_i32_1 = arith.constant 0 : i32
    return %arg0, %c0_i32, %c0_i32_0 : i32, i32, i32
  }
}

module attributes {stable_mosaic.version = 11 : i64} {
  func.func @_poscnn_conv_kernel(%arg0: i32, %arg1: memref<1x6x6x32xf32, #tpu.memory_space<vmem>>, %arg2: memref<9x32xf32, #tpu.memory_space<vmem>>, %arg3: memref<1x32xf32, #tpu.memory_space<vmem>>, %arg4: memref<1x4x4x32xf32, #tpu.memory_space<vmem>>) attributes {dimension_semantics = [#tpu.dimension_semantics<parallel>], iteration_bounds = array<i64: 2>, scalar_prefetch = 0 : i64, scratch_operands = 0 : i64, tpu.core_type = #tpu.core_type<tc>, window_params = [{transform_indices = @transform_0, window_bounds = array<i64: 1, 6, 6, 32>}, {pipeline_mode = #tpu.pipeline_mode<synchronous>, transform_indices = @transform_1, window_bounds = array<i64: 9, 32>}, {pipeline_mode = #tpu.pipeline_mode<synchronous>, transform_indices = @transform_2, window_bounds = array<i64: 1, 32>}, {transform_indices = @transform_3, window_bounds = array<i64: 1, 4, 4, 32>}]} {
    %c0 = arith.constant 0 : index
    %c0_0 = arith.constant 0 : index
    %c0_1 = arith.constant 0 : index
    %c0_2 = arith.constant 0 : index
    %0 = vector.load %arg1[%c0, %c0_0, %c0_1, %c0_2] : memref<1x6x6x32xf32, #tpu.memory_space<vmem>>, vector<1x6x6x32xf32>
    %1 = vector.shape_cast %0 : vector<1x6x6x32xf32> to vector<6x6x32xf32>
    %c0_3 = arith.constant 0 : index
    %c0_4 = arith.constant 0 : index
    %2 = vector.load %arg2[%c0_3, %c0_4] : memref<9x32xf32, #tpu.memory_space<vmem>>, vector<9x32xf32>
    %cst = arith.constant 0.000000e+00 : f32
    %3 = vector.broadcast %cst : f32 to vector<4x4x32xf32>
    %4 = vector.extract_strided_slice %2 {offsets = [0, 0], sizes = [1, 32], strides = [1, 1]} : vector<9x32xf32> to vector<1x32xf32>
    %5 = vector.extract_strided_slice %1 {offsets = [0, 0, 0], sizes = [4, 4, 32], strides = [1, 1, 1]} : vector<6x6x32xf32> to vector<4x4x32xf32>
    %6 = vector.shape_cast %4 : vector<1x32xf32> to vector<1x1x32xf32>
    %7 = vector.broadcast %6 : vector<1x1x32xf32> to vector<4x4x32xf32>
    %8 = arith.mulf %5, %7 : vector<4x4x32xf32>
    %9 = arith.addf %3, %8 : vector<4x4x32xf32>
    %10 = vector.extract_strided_slice %2 {offsets = [1, 0], sizes = [1, 32], strides = [1, 1]} : vector<9x32xf32> to vector<1x32xf32>
    %11 = vector.extract_strided_slice %1 {offsets = [0, 1, 0], sizes = [4, 4, 32], strides = [1, 1, 1]} : vector<6x6x32xf32> to vector<4x4x32xf32>
    %12 = vector.shape_cast %10 : vector<1x32xf32> to vector<1x1x32xf32>
    %13 = vector.broadcast %12 : vector<1x1x32xf32> to vector<4x4x32xf32>
    %14 = arith.mulf %11, %13 : vector<4x4x32xf32>
    %15 = arith.addf %9, %14 : vector<4x4x32xf32>
    %16 = vector.extract_strided_slice %2 {offsets = [2, 0], sizes = [1, 32], strides = [1, 1]} : vector<9x32xf32> to vector<1x32xf32>
    %17 = vector.extract_strided_slice %1 {offsets = [0, 2, 0], sizes = [4, 4, 32], strides = [1, 1, 1]} : vector<6x6x32xf32> to vector<4x4x32xf32>
    %18 = vector.shape_cast %16 : vector<1x32xf32> to vector<1x1x32xf32>
    %19 = vector.broadcast %18 : vector<1x1x32xf32> to vector<4x4x32xf32>
    %20 = arith.mulf %17, %19 : vector<4x4x32xf32>
    %21 = arith.addf %15, %20 : vector<4x4x32xf32>
    %22 = vector.extract_strided_slice %2 {offsets = [3, 0], sizes = [1, 32], strides = [1, 1]} : vector<9x32xf32> to vector<1x32xf32>
    %23 = vector.extract_strided_slice %1 {offsets = [1, 0, 0], sizes = [4, 4, 32], strides = [1, 1, 1]} : vector<6x6x32xf32> to vector<4x4x32xf32>
    %24 = vector.shape_cast %22 : vector<1x32xf32> to vector<1x1x32xf32>
    %25 = vector.broadcast %24 : vector<1x1x32xf32> to vector<4x4x32xf32>
    %26 = arith.mulf %23, %25 : vector<4x4x32xf32>
    %27 = arith.addf %21, %26 : vector<4x4x32xf32>
    %28 = vector.extract_strided_slice %2 {offsets = [4, 0], sizes = [1, 32], strides = [1, 1]} : vector<9x32xf32> to vector<1x32xf32>
    %29 = vector.extract_strided_slice %1 {offsets = [1, 1, 0], sizes = [4, 4, 32], strides = [1, 1, 1]} : vector<6x6x32xf32> to vector<4x4x32xf32>
    %30 = vector.shape_cast %28 : vector<1x32xf32> to vector<1x1x32xf32>
    %31 = vector.broadcast %30 : vector<1x1x32xf32> to vector<4x4x32xf32>
    %32 = arith.mulf %29, %31 : vector<4x4x32xf32>
    %33 = arith.addf %27, %32 : vector<4x4x32xf32>
    %34 = vector.extract_strided_slice %2 {offsets = [5, 0], sizes = [1, 32], strides = [1, 1]} : vector<9x32xf32> to vector<1x32xf32>
    %35 = vector.extract_strided_slice %1 {offsets = [1, 2, 0], sizes = [4, 4, 32], strides = [1, 1, 1]} : vector<6x6x32xf32> to vector<4x4x32xf32>
    %36 = vector.shape_cast %34 : vector<1x32xf32> to vector<1x1x32xf32>
    %37 = vector.broadcast %36 : vector<1x1x32xf32> to vector<4x4x32xf32>
    %38 = arith.mulf %35, %37 : vector<4x4x32xf32>
    %39 = arith.addf %33, %38 : vector<4x4x32xf32>
    %40 = vector.extract_strided_slice %2 {offsets = [6, 0], sizes = [1, 32], strides = [1, 1]} : vector<9x32xf32> to vector<1x32xf32>
    %41 = vector.extract_strided_slice %1 {offsets = [2, 0, 0], sizes = [4, 4, 32], strides = [1, 1, 1]} : vector<6x6x32xf32> to vector<4x4x32xf32>
    %42 = vector.shape_cast %40 : vector<1x32xf32> to vector<1x1x32xf32>
    %43 = vector.broadcast %42 : vector<1x1x32xf32> to vector<4x4x32xf32>
    %44 = arith.mulf %41, %43 : vector<4x4x32xf32>
    %45 = arith.addf %39, %44 : vector<4x4x32xf32>
    %46 = vector.extract_strided_slice %2 {offsets = [7, 0], sizes = [1, 32], strides = [1, 1]} : vector<9x32xf32> to vector<1x32xf32>
    %47 = vector.extract_strided_slice %1 {offsets = [2, 1, 0], sizes = [4, 4, 32], strides = [1, 1, 1]} : vector<6x6x32xf32> to vector<4x4x32xf32>
    %48 = vector.shape_cast %46 : vector<1x32xf32> to vector<1x1x32xf32>
    %49 = vector.broadcast %48 : vector<1x1x32xf32> to vector<4x4x32xf32>
    %50 = arith.mulf %47, %49 : vector<4x4x32xf32>
    %51 = arith.addf %45, %50 : vector<4x4x32xf32>
    %52 = vector.extract_strided_slice %2 {offsets = [8, 0], sizes = [1, 32], strides = [1, 1]} : vector<9x32xf32> to vector<1x32xf32>
    %53 = vector.extract_strided_slice %1 {offsets = [2, 2, 0], sizes = [4, 4, 32], strides = [1, 1, 1]} : vector<6x6x32xf32> to vector<4x4x32xf32>
    %54 = vector.shape_cast %52 : vector<1x32xf32> to vector<1x1x32xf32>
    %55 = vector.broadcast %54 : vector<1x1x32xf32> to vector<4x4x32xf32>
    %56 = arith.mulf %53, %55 : vector<4x4x32xf32>
    %57 = arith.addf %51, %56 : vector<4x4x32xf32>
    %c0_5 = arith.constant 0 : index
    %c0_6 = arith.constant 0 : index
    %58 = vector.load %arg3[%c0_5, %c0_6] : memref<1x32xf32, #tpu.memory_space<vmem>>, vector<1x32xf32>
    %59 = vector.shape_cast %58 : vector<1x32xf32> to vector<1x1x32xf32>
    %60 = vector.broadcast %59 : vector<1x1x32xf32> to vector<4x4x32xf32>
    %61 = arith.addf %57, %60 : vector<4x4x32xf32>
    %cst_7 = arith.constant 0.999994993 : f32
    %62 = vector.broadcast %cst_7 : f32 to vector<4x4x32xf32>
    %63 = arith.mulf %61, %62 : vector<4x4x32xf32>
    %cst_8 = arith.constant 0.000000e+00 : f32
    %64 = vector.broadcast %cst_8 : f32 to vector<4x4x32xf32>
    %65 = arith.cmpf ogt, %63, %64 : vector<4x4x32xf32>
    %66 = math.exp %63 : vector<4x4x32xf32>
    %cst_9 = arith.constant 1.000000e+00 : f32
    %67 = vector.broadcast %cst_9 : f32 to vector<4x4x32xf32>
    %68 = arith.subf %66, %67 : vector<4x4x32xf32>
    %69 = arith.select %65, %63, %68 : vector<4x4x32xi1>, vector<4x4x32xf32>
    %c0_10 = arith.constant 0 : index
    %c0_11 = arith.constant 0 : index
    %c0_12 = arith.constant 0 : index
    %c0_13 = arith.constant 0 : index
    %70 = vector.load %arg4[%c0_10, %c0_11, %c0_12, %c0_13] : memref<1x4x4x32xf32, #tpu.memory_space<vmem>>, vector<1x4x4x32xf32>
    %71 = vector.shape_cast %70 : vector<1x4x4x32xf32> to vector<4x4x32xf32>
    %72 = vector.shape_cast %69 : vector<4x4x32xf32> to vector<1x4x4x32xf32>
    tpu.vector_store %arg4[%c0_10, %c0_11, %c0_12, %c0_13], %72 {strides = array<i32>} : memref<1x4x4x32xf32, #tpu.memory_space<vmem>>, vector<1x4x4x32xf32>,
    return
  }
  func.func @transform_0(%arg0: i32) -> (i32, i32, i32, i32) {
    %c0_i32 = arith.constant 0 : i32
    %c0_i32_0 = arith.constant 0 : i32
    %c0_i32_1 = arith.constant 0 : i32
    %c0_i32_2 = arith.constant 0 : i32
    return %arg0, %c0_i32, %c0_i32_0, %c0_i32_1 : i32, i32, i32, i32
  }
  func.func @transform_1(%arg0: i32) -> (i32, i32) {
    %c0_i32 = arith.constant 0 : i32
    %c0_i32_0 = arith.constant 0 : i32
    %c0_i32_1 = arith.constant 0 : i32
    return %c0_i32, %c0_i32_0 : i32, i32
  }
  func.func @transform_2(%arg0: i32) -> (i32, i32) {
    %c0_i32 = arith.constant 0 : i32
    %c0_i32_0 = arith.constant 0 : i32
    %c0_i32_1 = arith.constant 0 : i32
    return %c0_i32, %c0_i32_0 : i32, i32
  }
  func.func @transform_3(%arg0: i32) -> (i32, i32, i32, i32) {
    %c0_i32 = arith.constant 0 : i32
    %c0_i32_0 = arith.constant 0 : i32
    %c0_i32_1 = arith.constant 0 : i32
    %c0_i32_2 = arith.constant 0 : i32
    return %arg0, %c0_i32, %c0_i32_0, %c0_i32_1 : i32, i32, i32, i32
  }
}

module attributes {stable_mosaic.version = 11 : i64} {
  func.func @_sa_se_kernel(%arg0: i32, %arg1: memref<1x4x4x32xf32, #tpu.memory_space<vmem>>, %arg2: memref<1x10x10x2xf32, #tpu.memory_space<vmem>>, %arg3: memref<49x2xf32, #tpu.memory_space<vmem>>, %arg4: memref<32x2xf32, #tpu.memory_space<vmem>>, %arg5: memref<2x32xf32, #tpu.memory_space<vmem>>, %arg6: memref<1x16x32xf32, #tpu.memory_space<vmem>>) attributes {dimension_semantics = [#tpu.dimension_semantics<parallel>], iteration_bounds = array<i64: 2>, scalar_prefetch = 0 : i64, scratch_operands = 0 : i64, tpu.core_type = #tpu.core_type<tc>, window_params = [{transform_indices = @transform_0, window_bounds = array<i64: 1, 4, 4, 32>}, {transform_indices = @transform_1, window_bounds = array<i64: 1, 10, 10, 2>}, {pipeline_mode = #tpu.pipeline_mode<synchronous>, transform_indices = @transform_2, window_bounds = array<i64: 49, 2>}, {pipeline_mode = #tpu.pipeline_mode<synchronous>, transform_indices = @transform_3, window_bounds = array<i64: 32, 2>}, {pipeline_mode = #tpu.pipeline_mode<synchronous>, transform_indices = @transform_4, window_bounds = array<i64: 2, 32>}, {transform_indices = @transform_5, window_bounds = array<i64: 1, 16, 32>}]} {
    %c0 = arith.constant 0 : index
    %c0_0 = arith.constant 0 : index
    %c0_1 = arith.constant 0 : index
    %c0_2 = arith.constant 0 : index
    %0 = vector.load %arg1[%c0, %c0_0, %c0_1, %c0_2] : memref<1x4x4x32xf32, #tpu.memory_space<vmem>>, vector<1x4x4x32xf32>
    %1 = vector.shape_cast %0 : vector<1x4x4x32xf32> to vector<4x4x32xf32>
    %c0_3 = arith.constant 0 : index
    %c0_4 = arith.constant 0 : index
    %c0_5 = arith.constant 0 : index
    %c0_6 = arith.constant 0 : index
    %2 = vector.load %arg2[%c0_3, %c0_4, %c0_5, %c0_6] : memref<1x10x10x2xf32, #tpu.memory_space<vmem>>, vector<1x10x10x2xf32>
    %3 = vector.shape_cast %2 : vector<1x10x10x2xf32> to vector<10x10x2xf32>
    %c0_7 = arith.constant 0 : index
    %c0_8 = arith.constant 0 : index
    %4 = vector.load %arg3[%c0_7, %c0_8] : memref<49x2xf32, #tpu.memory_space<vmem>>, vector<49x2xf32>
    %cst = arith.constant 0.000000e+00 : f32
    %5 = vector.broadcast %cst : f32 to vector<4x4x2xf32>
    %6 = vector.extract_strided_slice %4 {offsets = [0, 0], sizes = [1, 2], strides = [1, 1]} : vector<49x2xf32> to vector<1x2xf32>
    %7 = vector.extract_strided_slice %3 {offsets = [0, 0, 0], sizes = [4, 4, 2], strides = [1, 1, 1]} : vector<10x10x2xf32> to vector<4x4x2xf32>
    %8 = vector.shape_cast %6 : vector<1x2xf32> to vector<1x1x2xf32>
    %9 = vector.broadcast %8 : vector<1x1x2xf32> to vector<4x4x2xf32>
    %10 = arith.mulf %7, %9 : vector<4x4x2xf32>
    %11 = arith.addf %5, %10 : vector<4x4x2xf32>
    %12 = vector.extract_strided_slice %4 {offsets = [1, 0], sizes = [1, 2], strides = [1, 1]} : vector<49x2xf32> to vector<1x2xf32>
    %13 = vector.extract_strided_slice %3 {offsets = [0, 1, 0], sizes = [4, 4, 2], strides = [1, 1, 1]} : vector<10x10x2xf32> to vector<4x4x2xf32>
    %14 = vector.shape_cast %12 : vector<1x2xf32> to vector<1x1x2xf32>
    %15 = vector.broadcast %14 : vector<1x1x2xf32> to vector<4x4x2xf32>
    %16 = arith.mulf %13, %15 : vector<4x4x2xf32>
    %17 = arith.addf %11, %16 : vector<4x4x2xf32>
    %18 = vector.extract_strided_slice %4 {offsets = [2, 0], sizes = [1, 2], strides = [1, 1]} : vector<49x2xf32> to vector<1x2xf32>
    %19 = vector.extract_strided_slice %3 {offsets = [0, 2, 0], sizes = [4, 4, 2], strides = [1, 1, 1]} : vector<10x10x2xf32> to vector<4x4x2xf32>
    %20 = vector.shape_cast %18 : vector<1x2xf32> to vector<1x1x2xf32>
    %21 = vector.broadcast %20 : vector<1x1x2xf32> to vector<4x4x2xf32>
    %22 = arith.mulf %19, %21 : vector<4x4x2xf32>
    %23 = arith.addf %17, %22 : vector<4x4x2xf32>
    %24 = vector.extract_strided_slice %4 {offsets = [3, 0], sizes = [1, 2], strides = [1, 1]} : vector<49x2xf32> to vector<1x2xf32>
    %25 = vector.extract_strided_slice %3 {offsets = [0, 3, 0], sizes = [4, 4, 2], strides = [1, 1, 1]} : vector<10x10x2xf32> to vector<4x4x2xf32>
    %26 = vector.shape_cast %24 : vector<1x2xf32> to vector<1x1x2xf32>
    %27 = vector.broadcast %26 : vector<1x1x2xf32> to vector<4x4x2xf32>
    %28 = arith.mulf %25, %27 : vector<4x4x2xf32>
    %29 = arith.addf %23, %28 : vector<4x4x2xf32>
    %30 = vector.extract_strided_slice %4 {offsets = [4, 0], sizes = [1, 2], strides = [1, 1]} : vector<49x2xf32> to vector<1x2xf32>
    %31 = vector.extract_strided_slice %3 {offsets = [0, 4, 0], sizes = [4, 4, 2], strides = [1, 1, 1]} : vector<10x10x2xf32> to vector<4x4x2xf32>
    %32 = vector.shape_cast %30 : vector<1x2xf32> to vector<1x1x2xf32>
    %33 = vector.broadcast %32 : vector<1x1x2xf32> to vector<4x4x2xf32>
    %34 = arith.mulf %31, %33 : vector<4x4x2xf32>
    %35 = arith.addf %29, %34 : vector<4x4x2xf32>
    %36 = vector.extract_strided_slice %4 {offsets = [5, 0], sizes = [1, 2], strides = [1, 1]} : vector<49x2xf32> to vector<1x2xf32>
    %37 = vector.extract_strided_slice %3 {offsets = [0, 5, 0], sizes = [4, 4, 2], strides = [1, 1, 1]} : vector<10x10x2xf32> to vector<4x4x2xf32>
    %38 = vector.shape_cast %36 : vector<1x2xf32> to vector<1x1x2xf32>
    %39 = vector.broadcast %38 : vector<1x1x2xf32> to vector<4x4x2xf32>
    %40 = arith.mulf %37, %39 : vector<4x4x2xf32>
    %41 = arith.addf %35, %40 : vector<4x4x2xf32>
    %42 = vector.extract_strided_slice %4 {offsets = [6, 0], sizes = [1, 2], strides = [1, 1]} : vector<49x2xf32> to vector<1x2xf32>
    %43 = vector.extract_strided_slice %3 {offsets = [0, 6, 0], sizes = [4, 4, 2], strides = [1, 1, 1]} : vector<10x10x2xf32> to vector<4x4x2xf32>
    %44 = vector.shape_cast %42 : vector<1x2xf32> to vector<1x1x2xf32>
    %45 = vector.broadcast %44 : vector<1x1x2xf32> to vector<4x4x2xf32>
    %46 = arith.mulf %43, %45 : vector<4x4x2xf32>
    %47 = arith.addf %41, %46 : vector<4x4x2xf32>
    %48 = vector.extract_strided_slice %4 {offsets = [7, 0], sizes = [1, 2], strides = [1, 1]} : vector<49x2xf32> to vector<1x2xf32>
    %49 = vector.extract_strided_slice %3 {offsets = [1, 0, 0], sizes = [4, 4, 2], strides = [1, 1, 1]} : vector<10x10x2xf32> to vector<4x4x2xf32>
    %50 = vector.shape_cast %48 : vector<1x2xf32> to vector<1x1x2xf32>
    %51 = vector.broadcast %50 : vector<1x1x2xf32> to vector<4x4x2xf32>
    %52 = arith.mulf %49, %51 : vector<4x4x2xf32>
    %53 = arith.addf %47, %52 : vector<4x4x2xf32>
    %54 = vector.extract_strided_slice %4 {offsets = [8, 0], sizes = [1, 2], strides = [1, 1]} : vector<49x2xf32> to vector<1x2xf32>
    %55 = vector.extract_strided_slice %3 {offsets = [1, 1, 0], sizes = [4, 4, 2], strides = [1, 1, 1]} : vector<10x10x2xf32> to vector<4x4x2xf32>
    %56 = vector.shape_cast %54 : vector<1x2xf32> to vector<1x1x2xf32>
    %57 = vector.broadcast %56 : vector<1x1x2xf32> to vector<4x4x2xf32>
    %58 = arith.mulf %55, %57 : vector<4x4x2xf32>
    %59 = arith.addf %53, %58 : vector<4x4x2xf32>
    %60 = vector.extract_strided_slice %4 {offsets = [9, 0], sizes = [1, 2], strides = [1, 1]} : vector<49x2xf32> to vector<1x2xf32>
    %61 = vector.extract_strided_slice %3 {offsets = [1, 2, 0], sizes = [4, 4, 2], strides = [1, 1, 1]} : vector<10x10x2xf32> to vector<4x4x2xf32>
    %62 = vector.shape_cast %60 : vector<1x2xf32> to vector<1x1x2xf32>
    %63 = vector.broadcast %62 : vector<1x1x2xf32> to vector<4x4x2xf32>
    %64 = arith.mulf %61, %63 : vector<4x4x2xf32>
    %65 = arith.addf %59, %64 : vector<4x4x2xf32>
    %66 = vector.extract_strided_slice %4 {offsets = [10, 0], sizes = [1, 2], strides = [1, 1]} : vector<49x2xf32> to vector<1x2xf32>
    %67 = vector.extract_strided_slice %3 {offsets = [1, 3, 0], sizes = [4, 4, 2], strides = [1, 1, 1]} : vector<10x10x2xf32> to vector<4x4x2xf32>
    %68 = vector.shape_cast %66 : vector<1x2xf32> to vector<1x1x2xf32>
    %69 = vector.broadcast %68 : vector<1x1x2xf32> to vector<4x4x2xf32>
    %70 = arith.mulf %67, %69 : vector<4x4x2xf32>
    %71 = arith.addf %65, %70 : vector<4x4x2xf32>
    %72 = vector.extract_strided_slice %4 {offsets = [11, 0], sizes = [1, 2], strides = [1, 1]} : vector<49x2xf32> to vector<1x2xf32>
    %73 = vector.extract_strided_slice %3 {offsets = [1, 4, 0], sizes = [4, 4, 2], strides = [1, 1, 1]} : vector<10x10x2xf32> to vector<4x4x2xf32>
    %74 = vector.shape_cast %72 : vector<1x2xf32> to vector<1x1x2xf32>
    %75 = vector.broadcast %74 : vector<1x1x2xf32> to vector<4x4x2xf32>
    %76 = arith.mulf %73, %75 : vector<4x4x2xf32>
    %77 = arith.addf %71, %76 : vector<4x4x2xf32>
    %78 = vector.extract_strided_slice %4 {offsets = [12, 0], sizes = [1, 2], strides = [1, 1]} : vector<49x2xf32> to vector<1x2xf32>
    %79 = vector.extract_strided_slice %3 {offsets = [1, 5, 0], sizes = [4, 4, 2], strides = [1, 1, 1]} : vector<10x10x2xf32> to vector<4x4x2xf32>
    %80 = vector.shape_cast %78 : vector<1x2xf32> to vector<1x1x2xf32>
    %81 = vector.broadcast %80 : vector<1x1x2xf32> to vector<4x4x2xf32>
    %82 = arith.mulf %79, %81 : vector<4x4x2xf32>
    %83 = arith.addf %77, %82 : vector<4x4x2xf32>
    %84 = vector.extract_strided_slice %4 {offsets = [13, 0], sizes = [1, 2], strides = [1, 1]} : vector<49x2xf32> to vector<1x2xf32>
    %85 = vector.extract_strided_slice %3 {offsets = [1, 6, 0], sizes = [4, 4, 2], strides = [1, 1, 1]} : vector<10x10x2xf32> to vector<4x4x2xf32>
    %86 = vector.shape_cast %84 : vector<1x2xf32> to vector<1x1x2xf32>
    %87 = vector.broadcast %86 : vector<1x1x2xf32> to vector<4x4x2xf32>
    %88 = arith.mulf %85, %87 : vector<4x4x2xf32>
    %89 = arith.addf %83, %88 : vector<4x4x2xf32>
    %90 = vector.extract_strided_slice %4 {offsets = [14, 0], sizes = [1, 2], strides = [1, 1]} : vector<49x2xf32> to vector<1x2xf32>
    %91 = vector.extract_strided_slice %3 {offsets = [2, 0, 0], sizes = [4, 4, 2], strides = [1, 1, 1]} : vector<10x10x2xf32> to vector<4x4x2xf32>
    %92 = vector.shape_cast %90 : vector<1x2xf32> to vector<1x1x2xf32>
    %93 = vector.broadcast %92 : vector<1x1x2xf32> to vector<4x4x2xf32>
    %94 = arith.mulf %91, %93 : vector<4x4x2xf32>
    %95 = arith.addf %89, %94 : vector<4x4x2xf32>
    %96 = vector.extract_strided_slice %4 {offsets = [15, 0], sizes = [1, 2], strides = [1, 1]} : vector<49x2xf32> to vector<1x2xf32>
    %97 = vector.extract_strided_slice %3 {offsets = [2, 1, 0], sizes = [4, 4, 2], strides = [1, 1, 1]} : vector<10x10x2xf32> to vector<4x4x2xf32>
    %98 = vector.shape_cast %96 : vector<1x2xf32> to vector<1x1x2xf32>
    %99 = vector.broadcast %98 : vector<1x1x2xf32> to vector<4x4x2xf32>
    %100 = arith.mulf %97, %99 : vector<4x4x2xf32>
    %101 = arith.addf %95, %100 : vector<4x4x2xf32>
    %102 = vector.extract_strided_slice %4 {offsets = [16, 0], sizes = [1, 2], strides = [1, 1]} : vector<49x2xf32> to vector<1x2xf32>
    %103 = vector.extract_strided_slice %3 {offsets = [2, 2, 0], sizes = [4, 4, 2], strides = [1, 1, 1]} : vector<10x10x2xf32> to vector<4x4x2xf32>
    %104 = vector.shape_cast %102 : vector<1x2xf32> to vector<1x1x2xf32>
    %105 = vector.broadcast %104 : vector<1x1x2xf32> to vector<4x4x2xf32>
    %106 = arith.mulf %103, %105 : vector<4x4x2xf32>
    %107 = arith.addf %101, %106 : vector<4x4x2xf32>
    %108 = vector.extract_strided_slice %4 {offsets = [17, 0], sizes = [1, 2], strides = [1, 1]} : vector<49x2xf32> to vector<1x2xf32>
    %109 = vector.extract_strided_slice %3 {offsets = [2, 3, 0], sizes = [4, 4, 2], strides = [1, 1, 1]} : vector<10x10x2xf32> to vector<4x4x2xf32>
    %110 = vector.shape_cast %108 : vector<1x2xf32> to vector<1x1x2xf32>
    %111 = vector.broadcast %110 : vector<1x1x2xf32> to vector<4x4x2xf32>
    %112 = arith.mulf %109, %111 : vector<4x4x2xf32>
    %113 = arith.addf %107, %112 : vector<4x4x2xf32>
    %114 = vector.extract_strided_slice %4 {offsets = [18, 0], sizes = [1, 2], strides = [1, 1]} : vector<49x2xf32> to vector<1x2xf32>
    %115 = vector.extract_strided_slice %3 {offsets = [2, 4, 0], sizes = [4, 4, 2], strides = [1, 1, 1]} : vector<10x10x2xf32> to vector<4x4x2xf32>
    %116 = vector.shape_cast %114 : vector<1x2xf32> to vector<1x1x2xf32>
    %117 = vector.broadcast %116 : vector<1x1x2xf32> to vector<4x4x2xf32>
    %118 = arith.mulf %115, %117 : vector<4x4x2xf32>
    %119 = arith.addf %113, %118 : vector<4x4x2xf32>
    %120 = vector.extract_strided_slice %4 {offsets = [19, 0], sizes = [1, 2], strides = [1, 1]} : vector<49x2xf32> to vector<1x2xf32>
    %121 = vector.extract_strided_slice %3 {offsets = [2, 5, 0], sizes = [4, 4, 2], strides = [1, 1, 1]} : vector<10x10x2xf32> to vector<4x4x2xf32>
    %122 = vector.shape_cast %120 : vector<1x2xf32> to vector<1x1x2xf32>
    %123 = vector.broadcast %122 : vector<1x1x2xf32> to vector<4x4x2xf32>
    %124 = arith.mulf %121, %123 : vector<4x4x2xf32>
    %125 = arith.addf %119, %124 : vector<4x4x2xf32>
    %126 = vector.extract_strided_slice %4 {offsets = [20, 0], sizes = [1, 2], strides = [1, 1]} : vector<49x2xf32> to vector<1x2xf32>
    %127 = vector.extract_strided_slice %3 {offsets = [2, 6, 0], sizes = [4, 4, 2], strides = [1, 1, 1]} : vector<10x10x2xf32> to vector<4x4x2xf32>
    %128 = vector.shape_cast %126 : vector<1x2xf32> to vector<1x1x2xf32>
    %129 = vector.broadcast %128 : vector<1x1x2xf32> to vector<4x4x2xf32>
    %130 = arith.mulf %127, %129 : vector<4x4x2xf32>
    %131 = arith.addf %125, %130 : vector<4x4x2xf32>
    %132 = vector.extract_strided_slice %4 {offsets = [21, 0], sizes = [1, 2], strides = [1, 1]} : vector<49x2xf32> to vector<1x2xf32>
    %133 = vector.extract_strided_slice %3 {offsets = [3, 0, 0], sizes = [4, 4, 2], strides = [1, 1, 1]} : vector<10x10x2xf32> to vector<4x4x2xf32>
    %134 = vector.shape_cast %132 : vector<1x2xf32> to vector<1x1x2xf32>
    %135 = vector.broadcast %134 : vector<1x1x2xf32> to vector<4x4x2xf32>
    %136 = arith.mulf %133, %135 : vector<4x4x2xf32>
    %137 = arith.addf %131, %136 : vector<4x4x2xf32>
    %138 = vector.extract_strided_slice %4 {offsets = [22, 0], sizes = [1, 2], strides = [1, 1]} : vector<49x2xf32> to vector<1x2xf32>
    %139 = vector.extract_strided_slice %3 {offsets = [3, 1, 0], sizes = [4, 4, 2], strides = [1, 1, 1]} : vector<10x10x2xf32> to vector<4x4x2xf32>
    %140 = vector.shape_cast %138 : vector<1x2xf32> to vector<1x1x2xf32>
    %141 = vector.broadcast %140 : vector<1x1x2xf32> to vector<4x4x2xf32>
    %142 = arith.mulf %139, %141 : vector<4x4x2xf32>
    %143 = arith.addf %137, %142 : vector<4x4x2xf32>
    %144 = vector.extract_strided_slice %4 {offsets = [23, 0], sizes = [1, 2], strides = [1, 1]} : vector<49x2xf32> to vector<1x2xf32>
    %145 = vector.extract_strided_slice %3 {offsets = [3, 2, 0], sizes = [4, 4, 2], strides = [1, 1, 1]} : vector<10x10x2xf32> to vector<4x4x2xf32>
    %146 = vector.shape_cast %144 : vector<1x2xf32> to vector<1x1x2xf32>
    %147 = vector.broadcast %146 : vector<1x1x2xf32> to vector<4x4x2xf32>
    %148 = arith.mulf %145, %147 : vector<4x4x2xf32>
    %149 = arith.addf %143, %148 : vector<4x4x2xf32>
    %150 = vector.extract_strided_slice %4 {offsets = [24, 0], sizes = [1, 2], strides = [1, 1]} : vector<49x2xf32> to vector<1x2xf32>
    %151 = vector.extract_strided_slice %3 {offsets = [3, 3, 0], sizes = [4, 4, 2], strides = [1, 1, 1]} : vector<10x10x2xf32> to vector<4x4x2xf32>
    %152 = vector.shape_cast %150 : vector<1x2xf32> to vector<1x1x2xf32>
    %153 = vector.broadcast %152 : vector<1x1x2xf32> to vector<4x4x2xf32>
    %154 = arith.mulf %151, %153 : vector<4x4x2xf32>
    %155 = arith.addf %149, %154 : vector<4x4x2xf32>
    %156 = vector.extract_strided_slice %4 {offsets = [25, 0], sizes = [1, 2], strides = [1, 1]} : vector<49x2xf32> to vector<1x2xf32>
    %157 = vector.extract_strided_slice %3 {offsets = [3, 4, 0], sizes = [4, 4, 2], strides = [1, 1, 1]} : vector<10x10x2xf32> to vector<4x4x2xf32>
    %158 = vector.shape_cast %156 : vector<1x2xf32> to vector<1x1x2xf32>
    %159 = vector.broadcast %158 : vector<1x1x2xf32> to vector<4x4x2xf32>
    %160 = arith.mulf %157, %159 : vector<4x4x2xf32>
    %161 = arith.addf %155, %160 : vector<4x4x2xf32>
    %162 = vector.extract_strided_slice %4 {offsets = [26, 0], sizes = [1, 2], strides = [1, 1]} : vector<49x2xf32> to vector<1x2xf32>
    %163 = vector.extract_strided_slice %3 {offsets = [3, 5, 0], sizes = [4, 4, 2], strides = [1, 1, 1]} : vector<10x10x2xf32> to vector<4x4x2xf32>
    %164 = vector.shape_cast %162 : vector<1x2xf32> to vector<1x1x2xf32>
    %165 = vector.broadcast %164 : vector<1x1x2xf32> to vector<4x4x2xf32>
    %166 = arith.mulf %163, %165 : vector<4x4x2xf32>
    %167 = arith.addf %161, %166 : vector<4x4x2xf32>
    %168 = vector.extract_strided_slice %4 {offsets = [27, 0], sizes = [1, 2], strides = [1, 1]} : vector<49x2xf32> to vector<1x2xf32>
    %169 = vector.extract_strided_slice %3 {offsets = [3, 6, 0], sizes = [4, 4, 2], strides = [1, 1, 1]} : vector<10x10x2xf32> to vector<4x4x2xf32>
    %170 = vector.shape_cast %168 : vector<1x2xf32> to vector<1x1x2xf32>
    %171 = vector.broadcast %170 : vector<1x1x2xf32> to vector<4x4x2xf32>
    %172 = arith.mulf %169, %171 : vector<4x4x2xf32>
    %173 = arith.addf %167, %172 : vector<4x4x2xf32>
    %174 = vector.extract_strided_slice %4 {offsets = [28, 0], sizes = [1, 2], strides = [1, 1]} : vector<49x2xf32> to vector<1x2xf32>
    %175 = vector.extract_strided_slice %3 {offsets = [4, 0, 0], sizes = [4, 4, 2], strides = [1, 1, 1]} : vector<10x10x2xf32> to vector<4x4x2xf32>
    %176 = vector.shape_cast %174 : vector<1x2xf32> to vector<1x1x2xf32>
    %177 = vector.broadcast %176 : vector<1x1x2xf32> to vector<4x4x2xf32>
    %178 = arith.mulf %175, %177 : vector<4x4x2xf32>
    %179 = arith.addf %173, %178 : vector<4x4x2xf32>
    %180 = vector.extract_strided_slice %4 {offsets = [29, 0], sizes = [1, 2], strides = [1, 1]} : vector<49x2xf32> to vector<1x2xf32>
    %181 = vector.extract_strided_slice %3 {offsets = [4, 1, 0], sizes = [4, 4, 2], strides = [1, 1, 1]} : vector<10x10x2xf32> to vector<4x4x2xf32>
    %182 = vector.shape_cast %180 : vector<1x2xf32> to vector<1x1x2xf32>
    %183 = vector.broadcast %182 : vector<1x1x2xf32> to vector<4x4x2xf32>
    %184 = arith.mulf %181, %183 : vector<4x4x2xf32>
    %185 = arith.addf %179, %184 : vector<4x4x2xf32>
    %186 = vector.extract_strided_slice %4 {offsets = [30, 0], sizes = [1, 2], strides = [1, 1]} : vector<49x2xf32> to vector<1x2xf32>
    %187 = vector.extract_strided_slice %3 {offsets = [4, 2, 0], sizes = [4, 4, 2], strides = [1, 1, 1]} : vector<10x10x2xf32> to vector<4x4x2xf32>
    %188 = vector.shape_cast %186 : vector<1x2xf32> to vector<1x1x2xf32>
    %189 = vector.broadcast %188 : vector<1x1x2xf32> to vector<4x4x2xf32>
    %190 = arith.mulf %187, %189 : vector<4x4x2xf32>
    %191 = arith.addf %185, %190 : vector<4x4x2xf32>
    %192 = vector.extract_strided_slice %4 {offsets = [31, 0], sizes = [1, 2], strides = [1, 1]} : vector<49x2xf32> to vector<1x2xf32>
    %193 = vector.extract_strided_slice %3 {offsets = [4, 3, 0], sizes = [4, 4, 2], strides = [1, 1, 1]} : vector<10x10x2xf32> to vector<4x4x2xf32>
    %194 = vector.shape_cast %192 : vector<1x2xf32> to vector<1x1x2xf32>
    %195 = vector.broadcast %194 : vector<1x1x2xf32> to vector<4x4x2xf32>
    %196 = arith.mulf %193, %195 : vector<4x4x2xf32>
    %197 = arith.addf %191, %196 : vector<4x4x2xf32>
    %198 = vector.extract_strided_slice %4 {offsets = [32, 0], sizes = [1, 2], strides = [1, 1]} : vector<49x2xf32> to vector<1x2xf32>
    %199 = vector.extract_strided_slice %3 {offsets = [4, 4, 0], sizes = [4, 4, 2], strides = [1, 1, 1]} : vector<10x10x2xf32> to vector<4x4x2xf32>
    %200 = vector.shape_cast %198 : vector<1x2xf32> to vector<1x1x2xf32>
    %201 = vector.broadcast %200 : vector<1x1x2xf32> to vector<4x4x2xf32>
    %202 = arith.mulf %199, %201 : vector<4x4x2xf32>
    %203 = arith.addf %197, %202 : vector<4x4x2xf32>
    %204 = vector.extract_strided_slice %4 {offsets = [33, 0], sizes = [1, 2], strides = [1, 1]} : vector<49x2xf32> to vector<1x2xf32>
    %205 = vector.extract_strided_slice %3 {offsets = [4, 5, 0], sizes = [4, 4, 2], strides = [1, 1, 1]} : vector<10x10x2xf32> to vector<4x4x2xf32>
    %206 = vector.shape_cast %204 : vector<1x2xf32> to vector<1x1x2xf32>
    %207 = vector.broadcast %206 : vector<1x1x2xf32> to vector<4x4x2xf32>
    %208 = arith.mulf %205, %207 : vector<4x4x2xf32>
    %209 = arith.addf %203, %208 : vector<4x4x2xf32>
    %210 = vector.extract_strided_slice %4 {offsets = [34, 0], sizes = [1, 2], strides = [1, 1]} : vector<49x2xf32> to vector<1x2xf32>
    %211 = vector.extract_strided_slice %3 {offsets = [4, 6, 0], sizes = [4, 4, 2], strides = [1, 1, 1]} : vector<10x10x2xf32> to vector<4x4x2xf32>
    %212 = vector.shape_cast %210 : vector<1x2xf32> to vector<1x1x2xf32>
    %213 = vector.broadcast %212 : vector<1x1x2xf32> to vector<4x4x2xf32>
    %214 = arith.mulf %211, %213 : vector<4x4x2xf32>
    %215 = arith.addf %209, %214 : vector<4x4x2xf32>
    %216 = vector.extract_strided_slice %4 {offsets = [35, 0], sizes = [1, 2], strides = [1, 1]} : vector<49x2xf32> to vector<1x2xf32>
    %217 = vector.extract_strided_slice %3 {offsets = [5, 0, 0], sizes = [4, 4, 2], strides = [1, 1, 1]} : vector<10x10x2xf32> to vector<4x4x2xf32>
    %218 = vector.shape_cast %216 : vector<1x2xf32> to vector<1x1x2xf32>
    %219 = vector.broadcast %218 : vector<1x1x2xf32> to vector<4x4x2xf32>
    %220 = arith.mulf %217, %219 : vector<4x4x2xf32>
    %221 = arith.addf %215, %220 : vector<4x4x2xf32>
    %222 = vector.extract_strided_slice %4 {offsets = [36, 0], sizes = [1, 2], strides = [1, 1]} : vector<49x2xf32> to vector<1x2xf32>
    %223 = vector.extract_strided_slice %3 {offsets = [5, 1, 0], sizes = [4, 4, 2], strides = [1, 1, 1]} : vector<10x10x2xf32> to vector<4x4x2xf32>
    %224 = vector.shape_cast %222 : vector<1x2xf32> to vector<1x1x2xf32>
    %225 = vector.broadcast %224 : vector<1x1x2xf32> to vector<4x4x2xf32>
    %226 = arith.mulf %223, %225 : vector<4x4x2xf32>
    %227 = arith.addf %221, %226 : vector<4x4x2xf32>
    %228 = vector.extract_strided_slice %4 {offsets = [37, 0], sizes = [1, 2], strides = [1, 1]} : vector<49x2xf32> to vector<1x2xf32>
    %229 = vector.extract_strided_slice %3 {offsets = [5, 2, 0], sizes = [4, 4, 2], strides = [1, 1, 1]} : vector<10x10x2xf32> to vector<4x4x2xf32>
    %230 = vector.shape_cast %228 : vector<1x2xf32> to vector<1x1x2xf32>
    %231 = vector.broadcast %230 : vector<1x1x2xf32> to vector<4x4x2xf32>
    %232 = arith.mulf %229, %231 : vector<4x4x2xf32>
    %233 = arith.addf %227, %232 : vector<4x4x2xf32>
    %234 = vector.extract_strided_slice %4 {offsets = [38, 0], sizes = [1, 2], strides = [1, 1]} : vector<49x2xf32> to vector<1x2xf32>
    %235 = vector.extract_strided_slice %3 {offsets = [5, 3, 0], sizes = [4, 4, 2], strides = [1, 1, 1]} : vector<10x10x2xf32> to vector<4x4x2xf32>
    %236 = vector.shape_cast %234 : vector<1x2xf32> to vector<1x1x2xf32>
    %237 = vector.broadcast %236 : vector<1x1x2xf32> to vector<4x4x2xf32>
    %238 = arith.mulf %235, %237 : vector<4x4x2xf32>
    %239 = arith.addf %233, %238 : vector<4x4x2xf32>
    %240 = vector.extract_strided_slice %4 {offsets = [39, 0], sizes = [1, 2], strides = [1, 1]} : vector<49x2xf32> to vector<1x2xf32>
    %241 = vector.extract_strided_slice %3 {offsets = [5, 4, 0], sizes = [4, 4, 2], strides = [1, 1, 1]} : vector<10x10x2xf32> to vector<4x4x2xf32>
    %242 = vector.shape_cast %240 : vector<1x2xf32> to vector<1x1x2xf32>
    %243 = vector.broadcast %242 : vector<1x1x2xf32> to vector<4x4x2xf32>
    %244 = arith.mulf %241, %243 : vector<4x4x2xf32>
    %245 = arith.addf %239, %244 : vector<4x4x2xf32>
    %246 = vector.extract_strided_slice %4 {offsets = [40, 0], sizes = [1, 2], strides = [1, 1]} : vector<49x2xf32> to vector<1x2xf32>
    %247 = vector.extract_strided_slice %3 {offsets = [5, 5, 0], sizes = [4, 4, 2], strides = [1, 1, 1]} : vector<10x10x2xf32> to vector<4x4x2xf32>
    %248 = vector.shape_cast %246 : vector<1x2xf32> to vector<1x1x2xf32>
    %249 = vector.broadcast %248 : vector<1x1x2xf32> to vector<4x4x2xf32>
    %250 = arith.mulf %247, %249 : vector<4x4x2xf32>
    %251 = arith.addf %245, %250 : vector<4x4x2xf32>
    %252 = vector.extract_strided_slice %4 {offsets = [41, 0], sizes = [1, 2], strides = [1, 1]} : vector<49x2xf32> to vector<1x2xf32>
    %253 = vector.extract_strided_slice %3 {offsets = [5, 6, 0], sizes = [4, 4, 2], strides = [1, 1, 1]} : vector<10x10x2xf32> to vector<4x4x2xf32>
    %254 = vector.shape_cast %252 : vector<1x2xf32> to vector<1x1x2xf32>
    %255 = vector.broadcast %254 : vector<1x1x2xf32> to vector<4x4x2xf32>
    %256 = arith.mulf %253, %255 : vector<4x4x2xf32>
    %257 = arith.addf %251, %256 : vector<4x4x2xf32>
    %258 = vector.extract_strided_slice %4 {offsets = [42, 0], sizes = [1, 2], strides = [1, 1]} : vector<49x2xf32> to vector<1x2xf32>
    %259 = vector.extract_strided_slice %3 {offsets = [6, 0, 0], sizes = [4, 4, 2], strides = [1, 1, 1]} : vector<10x10x2xf32> to vector<4x4x2xf32>
    %260 = vector.shape_cast %258 : vector<1x2xf32> to vector<1x1x2xf32>
    %261 = vector.broadcast %260 : vector<1x1x2xf32> to vector<4x4x2xf32>
    %262 = arith.mulf %259, %261 : vector<4x4x2xf32>
    %263 = arith.addf %257, %262 : vector<4x4x2xf32>
    %264 = vector.extract_strided_slice %4 {offsets = [43, 0], sizes = [1, 2], strides = [1, 1]} : vector<49x2xf32> to vector<1x2xf32>
    %265 = vector.extract_strided_slice %3 {offsets = [6, 1, 0], sizes = [4, 4, 2], strides = [1, 1, 1]} : vector<10x10x2xf32> to vector<4x4x2xf32>
    %266 = vector.shape_cast %264 : vector<1x2xf32> to vector<1x1x2xf32>
    %267 = vector.broadcast %266 : vector<1x1x2xf32> to vector<4x4x2xf32>
    %268 = arith.mulf %265, %267 : vector<4x4x2xf32>
    %269 = arith.addf %263, %268 : vector<4x4x2xf32>
    %270 = vector.extract_strided_slice %4 {offsets = [44, 0], sizes = [1, 2], strides = [1, 1]} : vector<49x2xf32> to vector<1x2xf32>
    %271 = vector.extract_strided_slice %3 {offsets = [6, 2, 0], sizes = [4, 4, 2], strides = [1, 1, 1]} : vector<10x10x2xf32> to vector<4x4x2xf32>
    %272 = vector.shape_cast %270 : vector<1x2xf32> to vector<1x1x2xf32>
    %273 = vector.broadcast %272 : vector<1x1x2xf32> to vector<4x4x2xf32>
    %274 = arith.mulf %271, %273 : vector<4x4x2xf32>
    %275 = arith.addf %269, %274 : vector<4x4x2xf32>
    %276 = vector.extract_strided_slice %4 {offsets = [45, 0], sizes = [1, 2], strides = [1, 1]} : vector<49x2xf32> to vector<1x2xf32>
    %277 = vector.extract_strided_slice %3 {offsets = [6, 3, 0], sizes = [4, 4, 2], strides = [1, 1, 1]} : vector<10x10x2xf32> to vector<4x4x2xf32>
    %278 = vector.shape_cast %276 : vector<1x2xf32> to vector<1x1x2xf32>
    %279 = vector.broadcast %278 : vector<1x1x2xf32> to vector<4x4x2xf32>
    %280 = arith.mulf %277, %279 : vector<4x4x2xf32>
    %281 = arith.addf %275, %280 : vector<4x4x2xf32>
    %282 = vector.extract_strided_slice %4 {offsets = [46, 0], sizes = [1, 2], strides = [1, 1]} : vector<49x2xf32> to vector<1x2xf32>
    %283 = vector.extract_strided_slice %3 {offsets = [6, 4, 0], sizes = [4, 4, 2], strides = [1, 1, 1]} : vector<10x10x2xf32> to vector<4x4x2xf32>
    %284 = vector.shape_cast %282 : vector<1x2xf32> to vector<1x1x2xf32>
    %285 = vector.broadcast %284 : vector<1x1x2xf32> to vector<4x4x2xf32>
    %286 = arith.mulf %283, %285 : vector<4x4x2xf32>
    %287 = arith.addf %281, %286 : vector<4x4x2xf32>
    %288 = vector.extract_strided_slice %4 {offsets = [47, 0], sizes = [1, 2], strides = [1, 1]} : vector<49x2xf32> to vector<1x2xf32>
    %289 = vector.extract_strided_slice %3 {offsets = [6, 5, 0], sizes = [4, 4, 2], strides = [1, 1, 1]} : vector<10x10x2xf32> to vector<4x4x2xf32>
    %290 = vector.shape_cast %288 : vector<1x2xf32> to vector<1x1x2xf32>
    %291 = vector.broadcast %290 : vector<1x1x2xf32> to vector<4x4x2xf32>
    %292 = arith.mulf %289, %291 : vector<4x4x2xf32>
    %293 = arith.addf %287, %292 : vector<4x4x2xf32>
    %294 = vector.extract_strided_slice %4 {offsets = [48, 0], sizes = [1, 2], strides = [1, 1]} : vector<49x2xf32> to vector<1x2xf32>
    %295 = vector.extract_strided_slice %3 {offsets = [6, 6, 0], sizes = [4, 4, 2], strides = [1, 1, 1]} : vector<10x10x2xf32> to vector<4x4x2xf32>
    %296 = vector.shape_cast %294 : vector<1x2xf32> to vector<1x1x2xf32>
    %297 = vector.broadcast %296 : vector<1x1x2xf32> to vector<4x4x2xf32>
    %298 = arith.mulf %295, %297 : vector<4x4x2xf32>
    %299 = arith.addf %293, %298 : vector<4x4x2xf32>
    %cst_9 = arith.constant dense<0.000000e+00> : vector<4x4xf32>
    %300 = vector.multi_reduction <add>, %299, %cst_9 [2] : vector<4x4x2xf32> to vector<4x4xf32>
    %301 = vector.shape_cast %300 : vector<4x4xf32> to vector<4x4x1xf32>
    %cst_10 = arith.constant 0.000000e+00 : f32
    %302 = vector.broadcast %cst_10 : f32 to vector<4x4x1xf32>
    %303 = arith.subf %302, %301 : vector<4x4x1xf32>
    %304 = math.exp %303 : vector<4x4x1xf32>
    %cst_11 = arith.constant 1.000000e+00 : f32
    %305 = vector.broadcast %cst_11 : f32 to vector<4x4x1xf32>
    %306 = arith.addf %305, %304 : vector<4x4x1xf32>
    %cst_12 = arith.constant 1.000000e+00 : f32
    %307 = vector.broadcast %cst_12 : f32 to vector<4x4x1xf32>
    %308 = arith.divf %307, %306 : vector<4x4x1xf32>
    %309 = vector.broadcast %308 : vector<4x4x1xf32> to vector<4x4x32xf32>
    %310 = arith.mulf %1, %309 : vector<4x4x32xf32>
    %311 = vector.shape_cast %310 : vector<4x4x32xf32> to vector<16x32xf32>
    %cst_13 = arith.constant dense<0.000000e+00> : vector<32xf32>
    %312 = vector.multi_reduction <add>, %311, %cst_13 [0] : vector<16x32xf32> to vector<32xf32>
    %313 = vector.shape_cast %312 : vector<32xf32> to vector<1x32xf32>
    %cst_14 = arith.constant 1.600000e+01 : f32
    %314 = vector.broadcast %cst_14 : f32 to vector<1x32xf32>
    %315 = arith.divf %313, %314 : vector<1x32xf32>
    %c0_15 = arith.constant 0 : index
    %c0_16 = arith.constant 0 : index
    %316 = vector.load %arg4[%c0_15, %c0_16] : memref<32x2xf32, #tpu.memory_space<vmem>>, vector<32x2xf32>
    %cst_17 = arith.constant dense<0.000000e+00> : vector<1x2xf32>
    %317 = tpu.matmul %315, %316, %cst_17 {dimension_numbers = #tpu.dot_dimension_numbers<[1], [0], [0], [1], [0, 0, 1, 1], [], []>} : vector<1x32xf32>, vector<32x2xf32>, vector<1x2xf32> -> vector<1x2xf32>
    %cst_18 = arith.constant 0.000000e+00 : f32
    %318 = vector.broadcast %cst_18 : f32 to vector<1x2xf32>
    %319 = arith.maximumf %317, %318 : vector<1x2xf32>
    %c0_19 = arith.constant 0 : index
    %c0_20 = arith.constant 0 : index
    %320 = vector.load %arg5[%c0_19, %c0_20] : memref<2x32xf32, #tpu.memory_space<vmem>>, vector<2x32xf32>
    %cst_21 = arith.constant dense<0.000000e+00> : vector<1x32xf32>
    %321 = tpu.matmul %319, %320, %cst_21 {dimension_numbers = #tpu.dot_dimension_numbers<[1], [0], [0], [1], [0, 0, 1, 1], [], []>} : vector<1x2xf32>, vector<2x32xf32>, vector<1x32xf32> -> vector<1x32xf32>
    %cst_22 = arith.constant 0.000000e+00 : f32
    %322 = vector.broadcast %cst_22 : f32 to vector<1x32xf32>
    %323 = arith.subf %322, %321 : vector<1x32xf32>
    %324 = math.exp %323 : vector<1x32xf32>
    %cst_23 = arith.constant 1.000000e+00 : f32
    %325 = vector.broadcast %cst_23 : f32 to vector<1x32xf32>
    %326 = arith.addf %325, %324 : vector<1x32xf32>
    %cst_24 = arith.constant 1.000000e+00 : f32
    %327 = vector.broadcast %cst_24 : f32 to vector<1x32xf32>
    %328 = arith.divf %327, %326 : vector<1x32xf32>
    %329 = vector.broadcast %328 : vector<1x32xf32> to vector<16x32xf32>
    %330 = arith.mulf %311, %329 : vector<16x32xf32>
    %c0_25 = arith.constant 0 : index
    %c0_26 = arith.constant 0 : index
    %c0_27 = arith.constant 0 : index
    %331 = vector.load %arg6[%c0_25, %c0_26, %c0_27] : memref<1x16x32xf32, #tpu.memory_space<vmem>>, vector<1x16x32xf32>
    %332 = vector.shape_cast %331 : vector<1x16x32xf32> to vector<16x32xf32>
    %333 = vector.shape_cast %330 : vector<16x32xf32> to vector<1x16x32xf32>
    tpu.vector_store %arg6[%c0_25, %c0_26, %c0_27], %333 {strides = array<i32>} : memref<1x16x32xf32, #tpu.memory_space<vmem>>, vector<1x16x32xf32>,
    return
  }
  func.func @transform_0(%arg0: i32) -> (i32, i32, i32, i32) {
    %c0_i32 = arith.constant 0 : i32
    %c0_i32_0 = arith.constant 0 : i32
    %c0_i32_1 = arith.constant 0 : i32
    %c0_i32_2 = arith.constant 0 : i32
    return %arg0, %c0_i32, %c0_i32_0, %c0_i32_1 : i32, i32, i32, i32
  }
  func.func @transform_1(%arg0: i32) -> (i32, i32, i32, i32) {
    %c0_i32 = arith.constant 0 : i32
    %c0_i32_0 = arith.constant 0 : i32
    %c0_i32_1 = arith.constant 0 : i32
    %c0_i32_2 = arith.constant 0 : i32
    return %arg0, %c0_i32, %c0_i32_0, %c0_i32_1 : i32, i32, i32, i32
  }
  func.func @transform_2(%arg0: i32) -> (i32, i32) {
    %c0_i32 = arith.constant 0 : i32
    %c0_i32_0 = arith.constant 0 : i32
    %c0_i32_1 = arith.constant 0 : i32
    return %c0_i32, %c0_i32_0 : i32, i32
  }
  func.func @transform_3(%arg0: i32) -> (i32, i32) {
    %c0_i32 = arith.constant 0 : i32
    %c0_i32_0 = arith.constant 0 : i32
    %c0_i32_1 = arith.constant 0 : i32
    return %c0_i32, %c0_i32_0 : i32, i32
  }
  func.func @transform_4(%arg0: i32) -> (i32, i32) {
    %c0_i32 = arith.constant 0 : i32
    %c0_i32_0 = arith.constant 0 : i32
    %c0_i32_1 = arith.constant 0 : i32
    return %c0_i32, %c0_i32_0 : i32, i32
  }
  func.func @transform_5(%arg0: i32) -> (i32, i32, i32) {
    %c0_i32 = arith.constant 0 : i32
    %c0_i32_0 = arith.constant 0 : i32
    %c0_i32_1 = arith.constant 0 : i32
    return %arg0, %c0_i32, %c0_i32_0 : i32, i32, i32
  }
}

module attributes {stable_mosaic.version = 11 : i64} {
  func.func @_head_kernel(%arg0: i32, %arg1: memref<1x16x32xf32, #tpu.memory_space<vmem>>, %arg2: memref<16x32xf32, #tpu.memory_space<vmem>>, %arg3: memref<16x32xf32, #tpu.memory_space<vmem>>, %arg4: memref<32x10xf32, #tpu.memory_space<vmem>>, %arg5: memref<1x10xf32, #tpu.memory_space<vmem>>, %arg6: memref<1x1x10xf32, #tpu.memory_space<vmem>>) attributes {dimension_semantics = [#tpu.dimension_semantics<parallel>], iteration_bounds = array<i64: 2>, scalar_prefetch = 0 : i64, scratch_operands = 0 : i64, tpu.core_type = #tpu.core_type<tc>, window_params = [{transform_indices = @transform_0, window_bounds = array<i64: 1, 16, 32>}, {pipeline_mode = #tpu.pipeline_mode<synchronous>, transform_indices = @transform_1, window_bounds = array<i64: 16, 32>}, {pipeline_mode = #tpu.pipeline_mode<synchronous>, transform_indices = @transform_2, window_bounds = array<i64: 16, 32>}, {pipeline_mode = #tpu.pipeline_mode<synchronous>, transform_indices = @transform_3, window_bounds = array<i64: 32, 10>}, {pipeline_mode = #tpu.pipeline_mode<synchronous>, transform_indices = @transform_4, window_bounds = array<i64: 1, 10>}, {transform_indices = @transform_5, window_bounds = array<i64: 1, 1, 10>}]} {
    %c0 = arith.constant 0 : index
    %c0_0 = arith.constant 0 : index
    %c0_1 = arith.constant 0 : index
    %0 = vector.load %arg1[%c0, %c0_0, %c0_1] : memref<1x16x32xf32, #tpu.memory_space<vmem>>, vector<1x16x32xf32>
    %1 = vector.shape_cast %0 : vector<1x16x32xf32> to vector<16x32xf32>
    %cst = arith.constant dense<0.000000e+00> : vector<16xf32>
    %2 = vector.multi_reduction <add>, %1, %cst [1] : vector<16x32xf32> to vector<16xf32>
    %3 = vector.shape_cast %2 : vector<16xf32> to vector<16x1xf32>
    %cst_2 = arith.constant 3.200000e+01 : f32
    %4 = vector.broadcast %cst_2 : f32 to vector<16x1xf32>
    %5 = arith.divf %3, %4 : vector<16x1xf32>
    %cst_3 = arith.constant dense<0.000000e+00> : vector<1xf32>
    %6 = vector.multi_reduction <add>, %5, %cst_3 [0] : vector<16x1xf32> to vector<1xf32>
    %7 = vector.shape_cast %6 : vector<1xf32> to vector<1x1xf32>
    %cst_4 = arith.constant 1.600000e+01 : f32
    %8 = vector.broadcast %cst_4 : f32 to vector<1x1xf32>
    %9 = arith.divf %7, %8 : vector<1x1xf32>
    %10 = vector.broadcast %9 : vector<1x1xf32> to vector<16x32xf32>
    %11 = arith.subf %1, %10 : vector<16x32xf32>
    %12 = arith.mulf %11, %11 : vector<16x32xf32>
    %cst_5 = arith.constant dense<0.000000e+00> : vector<16xf32>
    %13 = vector.multi_reduction <add>, %12, %cst_5 [1] : vector<16x32xf32> to vector<16xf32>
    %14 = vector.shape_cast %13 : vector<16xf32> to vector<16x1xf32>
    %cst_6 = arith.constant 3.200000e+01 : f32
    %15 = vector.broadcast %cst_6 : f32 to vector<16x1xf32>
    %16 = arith.divf %14, %15 : vector<16x1xf32>
    %cst_7 = arith.constant dense<0.000000e+00> : vector<1xf32>
    %17 = vector.multi_reduction <add>, %16, %cst_7 [0] : vector<16x1xf32> to vector<1xf32>
    %18 = vector.shape_cast %17 : vector<1xf32> to vector<1x1xf32>
    %cst_8 = arith.constant 1.600000e+01 : f32
    %19 = vector.broadcast %cst_8 : f32 to vector<1x1xf32>
    %20 = arith.divf %18, %19 : vector<1x1xf32>
    %cst_9 = arith.constant 9.99999997E-7 : f32
    %21 = vector.broadcast %cst_9 : f32 to vector<1x1xf32>
    %22 = arith.addf %20, %21 : vector<1x1xf32>
    %23 = math.rsqrt %22 : vector<1x1xf32>
    %24 = vector.broadcast %23 : vector<1x1xf32> to vector<16x32xf32>
    %25 = arith.mulf %11, %24 : vector<16x32xf32>
    %c0_10 = arith.constant 0 : index
    %c0_11 = arith.constant 0 : index
    %26 = vector.load %arg2[%c0_10, %c0_11] : memref<16x32xf32, #tpu.memory_space<vmem>>, vector<16x32xf32>
    %27 = arith.mulf %25, %26 : vector<16x32xf32>
    %c0_12 = arith.constant 0 : index
    %c0_13 = arith.constant 0 : index
    %28 = vector.load %arg3[%c0_12, %c0_13] : memref<16x32xf32, #tpu.memory_space<vmem>>, vector<16x32xf32>
    %29 = arith.addf %27, %28 : vector<16x32xf32>
    %cst_14 = arith.constant dense<0.000000e+00> : vector<32xf32>
    %30 = vector.multi_reduction <add>, %29, %cst_14 [0] : vector<16x32xf32> to vector<32xf32>
    %31 = vector.shape_cast %30 : vector<32xf32> to vector<1x32xf32>
    %cst_15 = arith.constant 1.600000e+01 : f32
    %32 = vector.broadcast %cst_15 : f32 to vector<1x32xf32>
    %33 = arith.divf %31, %32 : vector<1x32xf32>
    %c0_16 = arith.constant 0 : index
    %c0_17 = arith.constant 0 : index
    %34 = vector.load %arg4[%c0_16, %c0_17] : memref<32x10xf32, #tpu.memory_space<vmem>>, vector<32x10xf32>
    %cst_18 = arith.constant dense<0.000000e+00> : vector<1x10xf32>
    %35 = tpu.matmul %33, %34, %cst_18 {dimension_numbers = #tpu.dot_dimension_numbers<[1], [0], [0], [1], [0, 0, 1, 1], [], []>} : vector<1x32xf32>, vector<32x10xf32>, vector<1x10xf32> -> vector<1x10xf32>
    %c0_19 = arith.constant 0 : index
    %c0_20 = arith.constant 0 : index
    %36 = vector.load %arg5[%c0_19, %c0_20] : memref<1x10xf32, #tpu.memory_space<vmem>>, vector<1x10xf32>
    %37 = arith.addf %35, %36 : vector<1x10xf32>
    %c0_21 = arith.constant 0 : index
    %c0_22 = arith.constant 0 : index
    %c0_23 = arith.constant 0 : index
    %38 = vector.load %arg6[%c0_21, %c0_22, %c0_23] : memref<1x1x10xf32, #tpu.memory_space<vmem>>, vector<1x1x10xf32>
    %39 = vector.shape_cast %38 : vector<1x1x10xf32> to vector<1x10xf32>
    %40 = vector.shape_cast %37 : vector<1x10xf32> to vector<1x1x10xf32>
    tpu.vector_store %arg6[%c0_21, %c0_22, %c0_23], %40 {strides = array<i32>} : memref<1x1x10xf32, #tpu.memory_space<vmem>>, vector<1x1x10xf32>,
    return
  }
  func.func @transform_0(%arg0: i32) -> (i32, i32, i32) {
    %c0_i32 = arith.constant 0 : i32
    %c0_i32_0 = arith.constant 0 : i32
    %c0_i32_1 = arith.constant 0 : i32
    return %arg0, %c0_i32, %c0_i32_0 : i32, i32, i32
  }
  func.func @transform_1(%arg0: i32) -> (i32, i32) {
    %c0_i32 = arith.constant 0 : i32
    %c0_i32_0 = arith.constant 0 : i32
    %c0_i32_1 = arith.constant 0 : i32
    return %c0_i32, %c0_i32_0 : i32, i32
  }
  func.func @transform_2(%arg0: i32) -> (i32, i32) {
    %c0_i32 = arith.constant 0 : i32
    %c0_i32_0 = arith.constant 0 : i32
    %c0_i32_1 = arith.constant 0 : i32
    return %c0_i32, %c0_i32_0 : i32, i32
  }
  func.func @transform_3(%arg0: i32) -> (i32, i32) {
    %c0_i32 = arith.constant 0 : i32
    %c0_i32_0 = arith.constant 0 : i32
    %c0_i32_1 = arith.constant 0 : i32
    return %c0_i32, %c0_i32_0 : i32, i32
  }
  func.func @transform_4(%arg0: i32) -> (i32, i32) {
    %c0_i32 = arith.constant 0 : i32
    %c0_i32_0 = arith.constant 0 : i32
    %c0_i32_1 = arith.constant 0 : i32
    return %c0_i32, %c0_i32_0 : i32, i32
  }
  func.func @transform_5(%arg0: i32) -> (i32, i32, i32) {
    %c0_i32 = arith.constant 0 : i32
    %c0_i32_0 = arith.constant 0 : i32
    %c0_i32_1 = arith.constant 0 : i32
    return %arg0, %c0_i32, %c0_i32_0 : i32, i32, i32
  }
}

module attributes {stable_mosaic.version = 11 : i64} {
  func.func @_sr_attn_kernel(%arg0: i32, %arg1: memref<1x16x32xf32, #tpu.memory_space<vmem>>, %arg2: memref<1x32xf32, #tpu.memory_space<vmem>>, %arg3: memref<1x32xf32, #tpu.memory_space<vmem>>, %arg4: memref<32x32xbf16, #tpu.memory_space<vmem>>, %arg5: memref<4x32x32xbf16, #tpu.memory_space<vmem>>, %arg6: memref<1x32xf32, #tpu.memory_space<vmem>>, %arg7: memref<1x32xf32, #tpu.memory_space<vmem>>, %arg8: memref<1x32xf32, #tpu.memory_space<vmem>>, %arg9: memref<32x64xbf16, #tpu.memory_space<vmem>>, %arg10: memref<32x32xbf16, #tpu.memory_space<vmem>>, %arg11: memref<1x32xf32, #tpu.memory_space<vmem>>, %arg12: memref<1x16x32xf32, #tpu.memory_space<vmem>>) attributes {dimension_semantics = [#tpu.dimension_semantics<parallel>], iteration_bounds = array<i64: 2>, scalar_prefetch = 0 : i64, scratch_operands = 0 : i64, tpu.core_type = #tpu.core_type<tc>, window_params = [{transform_indices = @transform_0, window_bounds = array<i64: 1, 16, 32>}, {pipeline_mode = #tpu.pipeline_mode<synchronous>, transform_indices = @transform_1, window_bounds = array<i64: 1, 32>}, {pipeline_mode = #tpu.pipeline_mode<synchronous>, transform_indices = @transform_2, window_bounds = array<i64: 1, 32>}, {pipeline_mode = #tpu.pipeline_mode<synchronous>, transform_indices = @transform_3, window_bounds = array<i64: 32, 32>}, {pipeline_mode = #tpu.pipeline_mode<synchronous>, transform_indices = @transform_4, window_bounds = array<i64: 4, 32, 32>}, {pipeline_mode = #tpu.pipeline_mode<synchronous>, transform_indices = @transform_5, window_bounds = array<i64: 1, 32>}, {pipeline_mode = #tpu.pipeline_mode<synchronous>, transform_indices = @transform_6, window_bounds = array<i64: 1, 32>}, {pipeline_mode = #tpu.pipeline_mode<synchronous>, transform_indices = @transform_7, window_bounds = array<i64: 1, 32>}, {pipeline_mode = #tpu.pipeline_mode<synchronous>, transform_indices = @transform_8, window_bounds = array<i64: 32, 64>}, {pipeline_mode = #tpu.pipeline_mode<synchronous>, transform_indices = @transform_9, window_bounds = array<i64: 32, 32>}, {pipeline_mode = #tpu.pipeline_mode<synchronous>, transform_indices = @transform_10, window_bounds = array<i64: 1, 32>}, {transform_indices = @transform_11, window_bounds = array<i64: 1, 16, 32>}]} {
    %c0 = arith.constant 0 : index
    %c0_0 = arith.constant 0 : index
    %c0_1 = arith.constant 0 : index
    %0 = vector.load %arg1[%c0, %c0_0, %c0_1] : memref<1x16x32xf32, #tpu.memory_space<vmem>>, vector<1x16x32xf32>
    %1 = vector.shape_cast %0 : vector<1x16x32xf32> to vector<16x32xf32>
    %c0_2 = arith.constant 0 : index
    %c0_3 = arith.constant 0 : index
    %2 = vector.load %arg2[%c0_2, %c0_3] : memref<1x32xf32, #tpu.memory_space<vmem>>, vector<1x32xf32>
    %c0_4 = arith.constant 0 : index
    %c0_5 = arith.constant 0 : index
    %3 = vector.load %arg3[%c0_4, %c0_5] : memref<1x32xf32, #tpu.memory_space<vmem>>, vector<1x32xf32>
    %cst = arith.constant dense<0.000000e+00> : vector<16xf32>
    %4 = vector.multi_reduction <add>, %1, %cst [1] : vector<16x32xf32> to vector<16xf32>
    %5 = vector.shape_cast %4 : vector<16xf32> to vector<16x1xf32>
    %cst_6 = arith.constant 3.200000e+01 : f32
    %6 = vector.broadcast %cst_6 : f32 to vector<16x1xf32>
    %7 = arith.divf %5, %6 : vector<16x1xf32>
    %8 = vector.broadcast %7 : vector<16x1xf32> to vector<16x32xf32>
    %9 = arith.subf %1, %8 : vector<16x32xf32>
    %10 = arith.mulf %9, %9 : vector<16x32xf32>
    %cst_7 = arith.constant dense<0.000000e+00> : vector<16xf32>
    %11 = vector.multi_reduction <add>, %10, %cst_7 [1] : vector<16x32xf32> to vector<16xf32>
    %12 = vector.shape_cast %11 : vector<16xf32> to vector<16x1xf32>
    %cst_8 = arith.constant 3.200000e+01 : f32
    %13 = vector.broadcast %cst_8 : f32 to vector<16x1xf32>
    %14 = arith.divf %12, %13 : vector<16x1xf32>
    %15 = vector.broadcast %7 : vector<16x1xf32> to vector<16x32xf32>
    %16 = arith.subf %1, %15 : vector<16x32xf32>
    %cst_9 = arith.constant 9.99999997E-7 : f32
    %17 = vector.broadcast %cst_9 : f32 to vector<16x1xf32>
    %18 = arith.addf %14, %17 : vector<16x1xf32>
    %19 = math.rsqrt %18 : vector<16x1xf32>
    %20 = vector.broadcast %19 : vector<16x1xf32> to vector<16x32xf32>
    %21 = arith.mulf %16, %20 : vector<16x32xf32>
    %22 = vector.broadcast %2 : vector<1x32xf32> to vector<16x32xf32>
    %23 = arith.mulf %21, %22 : vector<16x32xf32>
    %24 = vector.broadcast %3 : vector<1x32xf32> to vector<16x32xf32>
    %25 = arith.addf %23, %24 : vector<16x32xf32>
    %26 = arith.truncf %25 : vector<16x32xf32> to vector<16x32xbf16>
    %c0_10 = arith.constant 0 : index
    %c0_11 = arith.constant 0 : index
    %27 = vector.load %arg4[%c0_10, %c0_11] : memref<32x32xbf16, #tpu.memory_space<vmem>>, vector<32x32xbf16>
    %cst_12 = arith.constant dense<0.000000e+00> : vector<16x32xf32>
    %28 = tpu.matmul %26, %27, %cst_12 {dimension_numbers = #tpu.dot_dimension_numbers<[1], [0], [0], [1], [0, 0, 1, 1], [], []>} : vector<16x32xbf16>, vector<32x32xbf16>, vector<16x32xf32> -> vector<16x32xf32>
    %29 = arith.truncf %28 : vector<16x32xf32> to vector<16x32xbf16>
    %cst_13 = arith.constant 0.000000e+00 : f32
    %30 = vector.broadcast %cst_13 : f32 to vector<4x32xf32>
    %31 = vector.extract_strided_slice %26 {offsets = [0, 0], sizes = [4, 32], strides = [1, 1]} : vector<16x32xbf16> to vector<4x32xbf16>
    %c0_14 = arith.constant 0 : index
    %c0_15 = arith.constant 0 : index
    %c0_16 = arith.constant 0 : index
    %32 = vector.load %arg5[%c0_14, %c0_15, %c0_16] : memref<4x32x32xbf16, #tpu.memory_space<vmem>>, vector<1x32x32xbf16>
    %33 = vector.shape_cast %32 : vector<1x32x32xbf16> to vector<32x32xbf16>
    %cst_17 = arith.constant dense<0.000000e+00> : vector<4x32xf32>
    %34 = tpu.matmul %31, %33, %cst_17 {dimension_numbers = #tpu.dot_dimension_numbers<[1], [0], [0], [1], [0, 0, 1, 1], [], []>} : vector<4x32xbf16>, vector<32x32xbf16>, vector<4x32xf32> -> vector<4x32xf32>
    %35 = arith.addf %30, %34 : vector<4x32xf32>
    %36 = vector.extract_strided_slice %26 {offsets = [4, 0], sizes = [4, 32], strides = [1, 1]} : vector<16x32xbf16> to vector<4x32xbf16>
    %c1 = arith.constant 1 : index
    %c0_18 = arith.constant 0 : index
    %c0_19 = arith.constant 0 : index
    %37 = vector.load %arg5[%c1, %c0_18, %c0_19] : memref<4x32x32xbf16, #tpu.memory_space<vmem>>, vector<1x32x32xbf16>
    %38 = vector.shape_cast %37 : vector<1x32x32xbf16> to vector<32x32xbf16>
    %cst_20 = arith.constant dense<0.000000e+00> : vector<4x32xf32>
    %39 = tpu.matmul %36, %38, %cst_20 {dimension_numbers = #tpu.dot_dimension_numbers<[1], [0], [0], [1], [0, 0, 1, 1], [], []>} : vector<4x32xbf16>, vector<32x32xbf16>, vector<4x32xf32> -> vector<4x32xf32>
    %40 = arith.addf %35, %39 : vector<4x32xf32>
    %41 = vector.extract_strided_slice %26 {offsets = [8, 0], sizes = [4, 32], strides = [1, 1]} : vector<16x32xbf16> to vector<4x32xbf16>
    %c2 = arith.constant 2 : index
    %c0_21 = arith.constant 0 : index
    %c0_22 = arith.constant 0 : index
    %42 = vector.load %arg5[%c2, %c0_21, %c0_22] : memref<4x32x32xbf16, #tpu.memory_space<vmem>>, vector<1x32x32xbf16>
    %43 = vector.shape_cast %42 : vector<1x32x32xbf16> to vector<32x32xbf16>
    %cst_23 = arith.constant dense<0.000000e+00> : vector<4x32xf32>
    %44 = tpu.matmul %41, %43, %cst_23 {dimension_numbers = #tpu.dot_dimension_numbers<[1], [0], [0], [1], [0, 0, 1, 1], [], []>} : vector<4x32xbf16>, vector<32x32xbf16>, vector<4x32xf32> -> vector<4x32xf32>
    %45 = arith.addf %40, %44 : vector<4x32xf32>
    %46 = vector.extract_strided_slice %26 {offsets = [12, 0], sizes = [4, 32], strides = [1, 1]} : vector<16x32xbf16> to vector<4x32xbf16>
    %c3 = arith.constant 3 : index
    %c0_24 = arith.constant 0 : index
    %c0_25 = arith.constant 0 : index
    %47 = vector.load %arg5[%c3, %c0_24, %c0_25] : memref<4x32x32xbf16, #tpu.memory_space<vmem>>, vector<1x32x32xbf16>
    %48 = vector.shape_cast %47 : vector<1x32x32xbf16> to vector<32x32xbf16>
    %cst_26 = arith.constant dense<0.000000e+00> : vector<4x32xf32>
    %49 = tpu.matmul %46, %48, %cst_26 {dimension_numbers = #tpu.dot_dimension_numbers<[1], [0], [0], [1], [0, 0, 1, 1], [], []>} : vector<4x32xbf16>, vector<32x32xbf16>, vector<4x32xf32> -> vector<4x32xf32>
    %50 = arith.addf %45, %49 : vector<4x32xf32>
    %c0_27 = arith.constant 0 : index
    %c0_28 = arith.constant 0 : index
    %51 = vector.load %arg6[%c0_27, %c0_28] : memref<1x32xf32, #tpu.memory_space<vmem>>, vector<1x32xf32>
    %52 = vector.broadcast %51 : vector<1x32xf32> to vector<4x32xf32>
    %53 = arith.addf %50, %52 : vector<4x32xf32>
    %c0_29 = arith.constant 0 : index
    %c0_30 = arith.constant 0 : index
    %54 = vector.load %arg7[%c0_29, %c0_30] : memref<1x32xf32, #tpu.memory_space<vmem>>, vector<1x32xf32>
    %c0_31 = arith.constant 0 : index
    %c0_32 = arith.constant 0 : index
    %55 = vector.load %arg8[%c0_31, %c0_32] : memref<1x32xf32, #tpu.memory_space<vmem>>, vector<1x32xf32>
    %cst_33 = arith.constant dense<0.000000e+00> : vector<4xf32>
    %56 = vector.multi_reduction <add>, %53, %cst_33 [1] : vector<4x32xf32> to vector<4xf32>
    %57 = vector.shape_cast %56 : vector<4xf32> to vector<4x1xf32>
    %cst_34 = arith.constant 3.200000e+01 : f32
    %58 = vector.broadcast %cst_34 : f32 to vector<4x1xf32>
    %59 = arith.divf %57, %58 : vector<4x1xf32>
    %60 = vector.broadcast %59 : vector<4x1xf32> to vector<4x32xf32>
    %61 = arith.subf %53, %60 : vector<4x32xf32>
    %62 = arith.mulf %61, %61 : vector<4x32xf32>
    %cst_35 = arith.constant dense<0.000000e+00> : vector<4xf32>
    %63 = vector.multi_reduction <add>, %62, %cst_35 [1] : vector<4x32xf32> to vector<4xf32>
    %64 = vector.shape_cast %63 : vector<4xf32> to vector<4x1xf32>
    %cst_36 = arith.constant 3.200000e+01 : f32
    %65 = vector.broadcast %cst_36 : f32 to vector<4x1xf32>
    %66 = arith.divf %64, %65 : vector<4x1xf32>
    %67 = vector.broadcast %59 : vector<4x1xf32> to vector<4x32xf32>
    %68 = arith.subf %53, %67 : vector<4x32xf32>
    %cst_37 = arith.constant 9.99999974E-6 : f32
    %69 = vector.broadcast %cst_37 : f32 to vector<4x1xf32>
    %70 = arith.addf %66, %69 : vector<4x1xf32>
    %71 = math.rsqrt %70 : vector<4x1xf32>
    %72 = vector.broadcast %71 : vector<4x1xf32> to vector<4x32xf32>
    %73 = arith.mulf %68, %72 : vector<4x32xf32>
    %74 = vector.broadcast %54 : vector<1x32xf32> to vector<4x32xf32>
    %75 = arith.mulf %73, %74 : vector<4x32xf32>
    %76 = vector.broadcast %55 : vector<1x32xf32> to vector<4x32xf32>
    %77 = arith.addf %75, %76 : vector<4x32xf32>
    %78 = arith.truncf %77 : vector<4x32xf32> to vector<4x32xbf16>
    %c0_38 = arith.constant 0 : index
    %c0_39 = arith.constant 0 : index
    %79 = vector.load %arg9[%c0_38, %c0_39] : memref<32x64xbf16, #tpu.memory_space<vmem>>, vector<32x64xbf16>
    %cst_40 = arith.constant dense<0.000000e+00> : vector<4x64xf32>
    %80 = tpu.matmul %78, %79, %cst_40 {dimension_numbers = #tpu.dot_dimension_numbers<[1], [0], [0], [1], [0, 0, 1, 1], [], []>} : vector<4x32xbf16>, vector<32x64xbf16>, vector<4x64xf32> -> vector<4x64xf32>
    %81 = arith.truncf %80 : vector<4x64xf32> to vector<4x64xbf16>
    %82 = vector.extract_strided_slice %29 {offsets = [0, 0], sizes = [16, 16], strides = [1, 1]} : vector<16x32xbf16> to vector<16x16xbf16>
    %83 = vector.extract_strided_slice %81 {offsets = [0, 0], sizes = [4, 16], strides = [1, 1]} : vector<4x64xbf16> to vector<4x16xbf16>
    %84 = vector.extract_strided_slice %81 {offsets = [0, 32], sizes = [4, 16], strides = [1, 1]} : vector<4x64xbf16> to vector<4x16xbf16>
    %cst_41 = arith.constant dense<0.000000e+00> : vector<16x4xf32>
    %85 = tpu.matmul %82, %83, %cst_41 {dimension_numbers = #tpu.dot_dimension_numbers<[1], [1], [0], [0], [0, 0, 1, 0], [], []>} : vector<16x16xbf16>, vector<4x16xbf16>, vector<16x4xf32> -> vector<16x4xf32>
    %cst_42 = arith.constant 2.500000e-01 : f32
    %86 = vector.broadcast %cst_42 : f32 to vector<16x4xf32>
    %87 = arith.mulf %85, %86 : vector<16x4xf32>
    %cst_43 = arith.constant dense<0xFF800000> : vector<16xf32>
    %88 = vector.multi_reduction <maximumf>, %87, %cst_43 [1] : vector<16x4xf32> to vector<16xf32>
    %89 = vector.shape_cast %88 : vector<16xf32> to vector<16x1xf32>
    %90 = vector.broadcast %89 : vector<16x1xf32> to vector<16x4xf32>
    %91 = arith.subf %87, %90 : vector<16x4xf32>
    %92 = math.exp %91 : vector<16x4xf32>
    %cst_44 = arith.constant dense<0.000000e+00> : vector<16xf32>
    %93 = vector.multi_reduction <add>, %92, %cst_44 [1] : vector<16x4xf32> to vector<16xf32>
    %94 = vector.shape_cast %93 : vector<16xf32> to vector<16x1xf32>
    %95 = tpu.reciprocal %94 {approx = true} : vector<16x1xf32> -> vector<16x1xf32>
    %96 = vector.broadcast %95 : vector<16x1xf32> to vector<16x4xf32>
    %97 = arith.mulf %92, %96 : vector<16x4xf32>
    %98 = arith.truncf %97 : vector<16x4xf32> to vector<16x4xbf16>
    %cst_45 = arith.constant dense<0.000000e+00> : vector<16x16xf32>
    %99 = tpu.matmul %98, %84, %cst_45 {dimension_numbers = #tpu.dot_dimension_numbers<[1], [0], [0], [1], [0, 0, 1, 1], [], []>} : vector<16x4xbf16>, vector<4x16xbf16>, vector<16x16xf32> -> vector<16x16xf32>
    %100 = vector.extract_strided_slice %29 {offsets = [0, 16], sizes = [16, 16], strides = [1, 1]} : vector<16x32xbf16> to vector<16x16xbf16>
    %101 = vector.extract_strided_slice %81 {offsets = [0, 16], sizes = [4, 16], strides = [1, 1]} : vector<4x64xbf16> to vector<4x16xbf16>
    %102 = vector.extract_strided_slice %81 {offsets = [0, 48], sizes = [4, 16], strides = [1, 1]} : vector<4x64xbf16> to vector<4x16xbf16>
    %cst_46 = arith.constant dense<0.000000e+00> : vector<16x4xf32>
    %103 = tpu.matmul %100, %101, %cst_46 {dimension_numbers = #tpu.dot_dimension_numbers<[1], [1], [0], [0], [0, 0, 1, 0], [], []>} : vector<16x16xbf16>, vector<4x16xbf16>, vector<16x4xf32> -> vector<16x4xf32>
    %cst_47 = arith.constant 2.500000e-01 : f32
    %104 = vector.broadcast %cst_47 : f32 to vector<16x4xf32>
    %105 = arith.mulf %103, %104 : vector<16x4xf32>
    %cst_48 = arith.constant dense<0xFF800000> : vector<16xf32>
    %106 = vector.multi_reduction <maximumf>, %105, %cst_48 [1] : vector<16x4xf32> to vector<16xf32>
    %107 = vector.shape_cast %106 : vector<16xf32> to vector<16x1xf32>
    %108 = vector.broadcast %107 : vector<16x1xf32> to vector<16x4xf32>
    %109 = arith.subf %105, %108 : vector<16x4xf32>
    %110 = math.exp %109 : vector<16x4xf32>
    %cst_49 = arith.constant dense<0.000000e+00> : vector<16xf32>
    %111 = vector.multi_reduction <add>, %110, %cst_49 [1] : vector<16x4xf32> to vector<16xf32>
    %112 = vector.shape_cast %111 : vector<16xf32> to vector<16x1xf32>
    %113 = tpu.reciprocal %112 {approx = true} : vector<16x1xf32> -> vector<16x1xf32>
    %114 = vector.broadcast %113 : vector<16x1xf32> to vector<16x4xf32>
    %115 = arith.mulf %110, %114 : vector<16x4xf32>
    %116 = arith.truncf %115 : vector<16x4xf32> to vector<16x4xbf16>
    %cst_50 = arith.constant dense<0.000000e+00> : vector<16x16xf32>
    %117 = tpu.matmul %116, %102, %cst_50 {dimension_numbers = #tpu.dot_dimension_numbers<[1], [0], [0], [1], [0, 0, 1, 1], [], []>} : vector<16x4xbf16>, vector<4x16xbf16>, vector<16x16xf32> -> vector<16x16xf32>
    %118 = tpu.concatenate %99, %117 in 1 : vector<16x16xf32>, vector<16x16xf32> -> vector<16x32xf32>
    %119 = arith.truncf %118 : vector<16x32xf32> to vector<16x32xbf16>
    %c0_51 = arith.constant 0 : index
    %c0_52 = arith.constant 0 : index
    %120 = vector.load %arg10[%c0_51, %c0_52] : memref<32x32xbf16, #tpu.memory_space<vmem>>, vector<32x32xbf16>
    %cst_53 = arith.constant dense<0.000000e+00> : vector<16x32xf32>
    %121 = tpu.matmul %119, %120, %cst_53 {dimension_numbers = #tpu.dot_dimension_numbers<[1], [0], [0], [1], [0, 0, 1, 1], [], []>} : vector<16x32xbf16>, vector<32x32xbf16>, vector<16x32xf32> -> vector<16x32xf32>
    %122 = arith.addf %1, %121 : vector<16x32xf32>
    %c0_54 = arith.constant 0 : index
    %c0_55 = arith.constant 0 : index
    %123 = vector.load %arg11[%c0_54, %c0_55] : memref<1x32xf32, #tpu.memory_space<vmem>>, vector<1x32xf32>
    %124 = vector.broadcast %123 : vector<1x32xf32> to vector<16x32xf32>
    %125 = arith.addf %122, %124 : vector<16x32xf32>
    %c0_56 = arith.constant 0 : index
    %c0_57 = arith.constant 0 : index
    %c0_58 = arith.constant 0 : index
    %126 = vector.load %arg12[%c0_56, %c0_57, %c0_58] : memref<1x16x32xf32, #tpu.memory_space<vmem>>, vector<1x16x32xf32>
    %127 = vector.shape_cast %126 : vector<1x16x32xf32> to vector<16x32xf32>
    %128 = vector.shape_cast %125 : vector<16x32xf32> to vector<1x16x32xf32>
    tpu.vector_store %arg12[%c0_56, %c0_57, %c0_58], %128 {strides = array<i32>} : memref<1x16x32xf32, #tpu.memory_space<vmem>>, vector<1x16x32xf32>,
    return
  }
  func.func @transform_0(%arg0: i32) -> (i32, i32, i32) {
    %c0_i32 = arith.constant 0 : i32
    %c0_i32_0 = arith.constant 0 : i32
    %c0_i32_1 = arith.constant 0 : i32
    return %arg0, %c0_i32, %c0_i32_0 : i32, i32, i32
  }
  func.func @transform_1(%arg0: i32) -> (i32, i32) {
    %c0_i32 = arith.constant 0 : i32
    %c0_i32_0 = arith.constant 0 : i32
    %c0_i32_1 = arith.constant 0 : i32
    return %c0_i32, %c0_i32_0 : i32, i32
  }
  func.func @transform_2(%arg0: i32) -> (i32, i32) {
    %c0_i32 = arith.constant 0 : i32
    %c0_i32_0 = arith.constant 0 : i32
    %c0_i32_1 = arith.constant 0 : i32
    return %c0_i32, %c0_i32_0 : i32, i32
  }
  func.func @transform_3(%arg0: i32) -> (i32, i32) {
    %c0_i32 = arith.constant 0 : i32
    %c0_i32_0 = arith.constant 0 : i32
    %c0_i32_1 = arith.constant 0 : i32
    return %c0_i32, %c0_i32_0 : i32, i32
  }
  func.func @transform_4(%arg0: i32) -> (i32, i32, i32) {
    %c0_i32 = arith.constant 0 : i32
    %c0_i32_0 = arith.constant 0 : i32
    %c0_i32_1 = arith.constant 0 : i32
    %c0_i32_2 = arith.constant 0 : i32
    return %c0_i32, %c0_i32_0, %c0_i32_1 : i32, i32, i32
  }
  func.func @transform_5(%arg0: i32) -> (i32, i32) {
    %c0_i32 = arith.constant 0 : i32
    %c0_i32_0 = arith.constant 0 : i32
    %c0_i32_1 = arith.constant 0 : i32
    return %c0_i32, %c0_i32_0 : i32, i32
  }
  func.func @transform_6(%arg0: i32) -> (i32, i32) {
    %c0_i32 = arith.constant 0 : i32
    %c0_i32_0 = arith.constant 0 : i32
    %c0_i32_1 = arith.constant 0 : i32
    return %c0_i32, %c0_i32_0 : i32, i32
  }
  func.func @transform_7(%arg0: i32) -> (i32, i32) {
    %c0_i32 = arith.constant 0 : i32
    %c0_i32_0 = arith.constant 0 : i32
    %c0_i32_1 = arith.constant 0 : i32
    return %c0_i32, %c0_i32_0 : i32, i32
  }
  func.func @transform_8(%arg0: i32) -> (i32, i32) {
    %c0_i32 = arith.constant 0 : i32
    %c0_i32_0 = arith.constant 0 : i32
    %c0_i32_1 = arith.constant 0 : i32
    return %c0_i32, %c0_i32_0 : i32, i32
  }
  func.func @transform_9(%arg0: i32) -> (i32, i32) {
    %c0_i32 = arith.constant 0 : i32
    %c0_i32_0 = arith.constant 0 : i32
    %c0_i32_1 = arith.constant 0 : i32
    return %c0_i32, %c0_i32_0 : i32, i32
  }
  func.func @transform_10(%arg0: i32) -> (i32, i32) {
    %c0_i32 = arith.constant 0 : i32
    %c0_i32_0 = arith.constant 0 : i32
    %c0_i32_1 = arith.constant 0 : i32
    return %c0_i32, %c0_i32_0 : i32, i32
  }
  func.func @transform_11(%arg0: i32) -> (i32, i32, i32) {
    %c0_i32 = arith.constant 0 : i32
    %c0_i32_0 = arith.constant 0 : i32
    %c0_i32_1 = arith.constant 0 : i32
    return %arg0, %c0_i32, %c0_i32_0 : i32, i32, i32
  }
}

</mosaic_0001>

<bundles_post_ra>
// kernel: forward.8
= control target key start
LH: loop header
LB: loop body
LE: loop exit
PB: predicated region body
PF: predicated region fallthrough
CT: control target
= control target key end

     0   :  { %v338_v0 = vmov 0   ;;  %vm126_vm0 = vcmask 154624   ;;  %vm133_vm1 = vcmask 1040384   ;;  %vm134_vm2 = vcmask 1041408   ;;  %s445_s1 = inlined_call_operand.vmem [shape: bf16[147,32], index: 1, kind: input, shape index: {}]   ;;  %s446_s0 = inlined_call_operand.vmem [shape: bf16[32,147], index: 0, kind: input, shape index: {}]   ;;  %s447_s2 = inlined_call_operand.vmem [shape: f32[1,32], index: 2, kind: input, shape index: {}]   ;;  %s448_s3 = inlined_call_operand.vmem [shape: f32[1,32], index: 3, kind: input, shape index: {}]   ;;  %s449_s4 = inlined_call_operand.vmem [shape: f32[1,32], index: 4, kind: input, shape index: {}]   ;;  %s450_s5 = inlined_call_operand.vmem [shape: f32[32,32], index: 5, kind: output, shape index: {}]  }
   0x1   :  { %140 = vmatprep.subr.bf16.mxu0 %v338_v0  ;;  %292 = vmatprep.subr.bf16.mxu1 %v338_v0  ;;  %v314_v1 = vld [vmem:[%s445_s1] sm:$0xff]   ;;  %v315_v2 = vld [vmem:[%s445_s1 + $0x8] sm:$0xff]   ;;  %v316_v3 = vld [vmem:[%s445_s1 + $0x10] sm:$0xff]   ;;  %v339_v11 = vmov 65535   ;;  %vm191_vm3 = vcmask 261120  }
   0x2   :  { %141 = vmatpush1.bf16.msra.mxu0 %v314_v1  ;;  %302 = vmatpush1.bf16.msra.mxu1 %v314_v1  ;;  %v317_v4 = vld [vmem:[%s445_s1 + $0x18] sm:$0xff]   ;;  %v326_v5 = vld [vmem:[%s446_s0 + $0x4] ss:$8 sps:$4 sm:$0xff]   ;;  %v320_v9 = vld [vmem:[%s445_s1 + $0x30] sm:$0xff]   ;;  %v135_v12 = vsel %vm133_vm1, 4294967295, %v339_v11 }
   0x3   :  { %142 = vmatprep.subr.bf16.mxu0 %v338_v0  ;;  %293 = vmatprep.subr.bf16.mxu1 %v338_v0  ;;  %v329_v6 = vld [vmem:[%s446_s0 + $0x14] ss:$8 sps:$4 sm:$0xff]   ;;  %v318_v7 = vld [vmem:[%s445_s1 + $0x20] sm:$0xff]   ;;  %v319_v8 = vld [vmem:[%s445_s1 + $0x28] sm:$0xff]   ;;  %v136_v15 = vsel %vm134_vm2, %v135_v12, 0 }
   0x4   :  { %288 = vmatprep.mubr.msk.bf16.mxu0 %vm126_vm0, %v326_v5  ;;  %289 = vmatprep.mubr.msk.bf16.mxu1 %vm126_vm0, %v329_v6  ;;  %v321_v10 = vld [vmem:[%s445_s1 + $0x38] sm:$0xff]   ;;  %v322_v13 = vld [vmem:[%s445_s1 + $0x40] sm:$0xff]   ;;  %v323_v14 = vld [vmem:[%s445_s1 + $0x48] ss:$0 sps:$4 sm:$0x33]  }
   0x5   :  { %v138_v16 = vand.u32 %v323_v14, %v136_v15  ;;  %v324_v17 = vld [vmem:[%s446_s0] ss:$8 sps:$4 sm:$0xff]   ;;  %v327_v18 = vld [vmem:[%s446_s0 + $0x10] ss:$8 sps:$4 sm:$0xff]  }
   0x6   :  { %143 = vmatpush1.bf16.msra.mxu0 %v315_v2  ;;  %303 = vmatpush1.bf16.msra.mxu1 %v315_v2  ;;  %v273_v19 = vld [vmem:[%s447_s2] ss:$0 sm:$0xff] }
   0x7   :  { %144 = vmatprep.subr.bf16.mxu0 %v338_v0  ;;  %294 = vmatprep.subr.bf16.mxu1 %v338_v0  ;;  %v290_v5 = vld [vmem:[%s448_s3] ss:$0 sm:$0xff] }
   0xa   :  { %145 = vmatpush1.bf16.msra.mxu0 %v316_v3  ;;  %304 = vmatpush1.bf16.msra.mxu1 %v316_v3 }
   0xb   :  { %146 = vmatprep.subr.bf16.mxu0 %v338_v0  ;;  %295 = vmatprep.subr.bf16.mxu1 %v338_v0 }
   0xe   :  { %147 = vmatpush1.bf16.msra.mxu0 %v317_v4  ;;  %305 = vmatpush1.bf16.msra.mxu1 %v317_v4 }
   0xf   :  { %148 = vmatprep.subr.bf16.mxu0 %v338_v0  ;;  %296 = vmatprep.subr.bf16.mxu1 %v338_v0 }
  0x12   :  { %149 = vmatpush1.bf16.msra.mxu0 %v318_v7  ;;  %306 = vmatpush1.bf16.msra.mxu1 %v318_v7  ;;  %v291_v7 = vld [vmem:[%s449_s4] ss:$0 sm:$0xff] }
  0x13   :  { %150 = vmatprep.subr.bf16.mxu0 %v338_v0  ;;  %297 = vmatprep.subr.bf16.mxu1 %v338_v0 }
  0x16   :  { %151 = vmatpush1.bf16.msra.mxu0 %v319_v8  ;;  %307 = vmatpush1.bf16.msra.mxu1 %v319_v8 }
  0x17   :  { %152 = vmatprep.subr.bf16.mxu0 %v338_v0  ;;  %298 = vmatprep.subr.bf16.mxu1 %v338_v0 }
  0x1a   :  { %153 = vmatpush1.bf16.msra.mxu0 %v320_v9  ;;  %308 = vmatpush1.bf16.msra.mxu1 %v320_v9 }
  0x1b   :  { %154 = vmatprep.subr.bf16.mxu0 %v338_v0  ;;  %299 = vmatprep.subr.bf16.mxu1 %v338_v0 }
  0x1e   :  { %155 = vmatpush1.bf16.msra.mxu0 %v321_v10  ;;  %309 = vmatpush1.bf16.msra.mxu1 %v321_v10 }
  0x1f   :  { %156 = vmatprep.subr.bf16.mxu0 %v338_v0  ;;  %300 = vmatprep.subr.bf16.mxu1 %v338_v0 }
  0x22   :  { %157 = vmatpush1.bf16.msra.mxu0 %v322_v13  ;;  %310 = vmatpush1.bf16.msra.mxu1 %v322_v13 }
  0x23   :  { %158 = vmatprep.subr.bf16.mxu0 %v338_v0  ;;  %301 = vmatprep.subr.bf16.mxu1 %v338_v0 }
  0x26   :  { %159 = vmatpush1.bf16.msra.mxu0 %v138_v16  ;;  %311 = vmatpush1.bf16.msra.mxu1 %v138_v16 }
  0x29   :  { %173 = vmatmul.mubr.bf16.vlgmr.msra.gmra.mrb[0].mxu0 %v324_v17  ;;  %181 = vmatmul.mubr.bf16.vlgmr.msra.gmra.mrb[0].mxu1 %v327_v18 }
  0xfc   :  { %v174_v20 = vpop.f32.mrb[0].mxu0  ;;  %v182_v21 = vpop.f32.mrb[0].mxu1 }
  0xfd   :  { %v175_v22 = vadd.f32 %v273_v19, %v174_v20  ;;  %v183_v23 = vadd.f32 %v273_v19, %v182_v21  ;;  %v176_v24 = vpop.f32.mrb[1].mxu0  ;;  %v184_v25 = vpop.f32.mrb[1].mxu1 }
  0xfe   :  { %v177_v26 = vpop.f32.mrb[2].mxu0  ;;  %v185_v27 = vpop.f32.mrb[2].mxu1 }
  0xff   :  { %v178_v28 = vadd.f32 %v273_v19, %v177_v26  ;;  %v179_v29 = vpop.f32.mrb[3].mxu0  ;;  %v186_v30 = vadd.f32 %v273_v19, %v185_v27  ;;  %v187_v31 = vpop.f32.mrb[3].mxu1  ;;  %v198_v32 = vsel %vm191_vm3, %v183_v23, 0.0  ;;  %v192_v33 = vsel %vm191_vm3, %v175_v22, 0.0 }
 0x100   :  { %199 = vadd.xlane.f32.xlu1 %v198_v32  ;;  %193 = vadd.xlane.f32.xlu0 %v192_v33 }
 0x101   :  { %v201_v34 = vsel %vm191_vm3, %v186_v30, 0.0  ;;  %v195_v35 = vsel %vm191_vm3, %v178_v28, 0.0 }
 0x104   :  { %202 = vadd.xlane.f32.xlu1 %v201_v34  ;;  %196 = vadd.xlane.f32.xlu0 %v195_v35 }
 0x18d   :  { %v200_v36 = vpop.xlane.xlu1 %199  ;;  %v194_v37 = vpop.xlane.xlu0 %193 }
 0x18e   :  { %v207_v38 = vmul.f32 0.03125, %v200_v36  ;;  %v205_v39 = vmul.f32 0.03125, %v194_v37 }
 0x190   :  { %v211_v40 = vsub.f32 %v183_v23, %v207_v38  ;;  %v209_v41 = vsub.f32 %v175_v22, %v205_v39 }
 0x191   :  { %v203_v42 = vpop.xlane.xlu1 %202  ;;  %v197_v43 = vpop.xlane.xlu0 %196 }
 0x192   :  { %v208_v44 = vmul.f32 0.03125, %v203_v42  ;;  %v206_v45 = vmul.f32 0.03125, %v197_v43  ;;  %v213_v46 = vmul.f32 %v209_v41, %v209_v41  ;;  %v215_v50 = vmul.f32 %v211_v40, %v211_v40 }
 0x194   :  { %v212_v47 = vsub.f32 %v186_v30, %v208_v44  ;;  %v210_v48 = vsub.f32 %v178_v28, %v206_v45  ;;  %v217_v49 = vsel %vm191_vm3, %v213_v46, 0.0  ;;  %v223_v52 = vsel %vm191_vm3, %v215_v50, 0.0 }
 0x195   :  { %218 = vadd.xlane.f32.xlu0 %v217_v49 }
 0x196   :  { %v214_v51 = vmul.f32 %v210_v48, %v210_v48  ;;  %v216_v54 = vmul.f32 %v212_v47, %v212_v47 }
 0x198   :  { %v220_v53 = vsel %vm191_vm3, %v214_v51, 0.0  ;;  %v226_v55 = vsel %vm191_vm3, %v216_v54, 0.0 }
 0x199   :  { %224 = vadd.xlane.f32.xlu0 %v223_v52  ;;  %221 = vadd.xlane.f32.xlu1 %v220_v53 }
 0x19d   :  { %227 = vadd.xlane.f32.xlu1 %v226_v55 }
 0x222   :  { %v219_v56 = vpop.xlane.xlu0 %218 }
 0x223   :  { %v229_v57 = vmul.f32 0.03125, %v219_v56 }
 0x225   :  { %v233_v58 = vadd.f32 1e-05, %v229_v57 }
 0x226   :  { %v222_v59 = vpop.xlane.xlu1 %221  ;;  %v225_v60 = vpop.xlane.xlu0 %224 }
 0x227   :  { %330 = vrsqrt.f32 %v233_v58  ;;  %v230_v61 = vmul.f32 0.03125, %v222_v59  ;;  %v231_v62 = vmul.f32 0.03125, %v225_v60 }
 0x229   :  { %v234_v63 = vadd.f32 1e-05, %v230_v61  ;;  %v235_v0 = vadd.f32 1e-05, %v231_v62 }
 0x22a   :  { %v228_v1 = vpop.xlane.xlu1 %227 }
 0x22b   :  { %332 = vrsqrt.f32 %v234_v63  ;;  %v232_v2 = vmul.f32 0.03125, %v228_v1 }
 0x22c   :  { %334 = vrsqrt.f32 %v235_v0 }
 0x22d   :  { %v236_v3 = vadd.f32 1e-05, %v232_v2 }
 0x22f   :  { %336 = vrsqrt.f32 %v236_v3 }
 0x231   :  { %v331_v4 = vpop.eup %330 }
 0x232   :  { %v241_v6 = vmul.f32 %v331_v4, %v209_v41 }
 0x234   :  { %v251_v8 = vmul.f32 %v290_v5, %v241_v6 }
 0x235   :  { %v333_v9 = vpop.eup %332 }
 0x236   :  { %v335_v10 = vpop.eup %334  ;;  %v261_v11 = vadd.f32 %v291_v7, %v251_v8  ;;  %v242_v12 = vmul.f32 %v333_v9, %v210_v48 }
 0x237   :  { %v243_v13 = vmul.f32 %v335_v10, %v211_v40 }
 0x238   :  { %265 = vst.msk [vmem:[%s450_s5] sm:$0xff] %vm191_vm3, %v261_v11  ;;  %v252_v14 = vmul.f32 %v290_v5, %v242_v12 }
 0x239   :  { %v337_v15 = vpop.eup %336  ;;  %v253_v16 = vmul.f32 %v290_v5, %v243_v13 }
 0x23a   :  { %v262_v17 = vadd.f32 %v291_v7, %v252_v14  ;;  %v244_v18 = vmul.f32 %v337_v15, %v212_v47 }
 0x23b   :  { %v263_v19 = vadd.f32 %v291_v7, %v253_v16 }
 0x23c   :  { %266 = vst.msk [vmem:[%s450_s5 + $0x8] sm:$0xff] %vm191_vm3, %v262_v17  ;;  %v254_v20 = vmul.f32 %v290_v5, %v244_v18 }
 0x23d   :  { %267 = vst.msk [vmem:[%s450_s5 + $0x10] sm:$0xff] %vm191_vm3, %v263_v19 }
 0x23e   :  { %v264_v21 = vadd.f32 %v291_v7, %v254_v20 }
 0x240   :  { %268 = vst.msk [vmem:[%s450_s5 + $0x18] sm:$0xff] %vm191_vm3, %v264_v21 }

// kernel: forward.9
= control target key start
LH: loop header
LB: loop body
LE: loop exit
PB: predicated region body
PF: predicated region fallthrough
CT: control target
= control target key end

     0   :  { %s1712_s21 = smov 0   ;;  %s1927_s0 = inlined_call_operand.vmem [shape: f32[2,16,32], index: 0, kind: input, shape index: {}]   ;;  %s1928_s1 = inlined_call_operand.vmem [shape: f32[1,32], index: 1, kind: input, shape index: {}]   ;;  %s1929_s2 = inlined_call_operand.vmem [shape: f32[1,32], index: 2, kind: input, shape index: {}]   ;;  %s1930_s3 = inlined_call_operand.vmem [shape: bf16[32,96], index: 3, kind: input, shape index: {}]   ;;  %s1931_s4 = inlined_call_operand.vmem [shape: bf16[32,32], index: 4, kind: input, shape index: {}]   ;;  %s1932_s5 = inlined_call_operand.vmem [shape: f32[1,32], index: 5, kind: input, shape index: {}]   ;;  %s1933_s6 = inlined_call_operand.vmem [shape: f32[2,16,32], index: 6, kind: output, shape index: {}]  }
   0x1 LB: > { %s1417_s22 = sadd.s32 4294967295, %s1667_s21   ;;  %p1421_p0 = scmp.ge.s32.totalorder %s1667_s21, 1  ;;  %s1667_s21 = sphi %s1712_s21, %s16_s21  }
   0x2   : > { %p212_p1 = scmp.lt.s32.totalorder %s1667_s21, 3 }
   0x4   : > { %p213_p2 = pnand %p1421_p0, %p212_p1 }
   0x5   : > { %p242_p3 = scmp.lt.s32.totalorder (!%p213_p2), %s1417_s22, 1  ;;  %vm257_vm0 = vcmask (!%p213_p2), 261120   ;;  %v1621_v14 = vld [vmem:[%s1930_s3] sm:$0xff] (!%p213_p2)   ;;  %v1669_v15 = vmov (!%p213_p2), 0.0   ;;  %v1622_v16 = vld [vmem:[%s1930_s3 + $0x8] sm:$0xff] (!%p213_p2)   ;;  %vm1670_vm1 = vmmov (!%p213_p2), 0  }
   0x6   : > { %216 = sbr.rel (%p213_p2) target bundleno = 2404 (0x964), region = 44  ;;  %1493 = vmatprep.subr.bf16.mxu0 (!%p213_p2), %v1669_v15  ;;  %1501 = vmatprep.subr.bf16.mxu1 (!%p213_p2), %v1669_v15  ;;  %v1426_v25 = vld [vmem:[%s1928_s1] ss:$0 sm:$0xff] (!%p213_p2)  ;;  %s1671_s11 = smov (!%p213_p2), 96   ;;  %vm375_vm2 = vcmask (!%p213_p2), 130048   ;;  %vm573_vm3 = vcmask (!%p213_p2), 27648  }
   0x7   : > { %1494 = vmatpush3.bf16.msra.mxu0 (!%p213_p2), %v1621_v14  ;;  %1497 = vmatprep.mubr.msk.bf16.mxu0 (!%p213_p2), %vm1670_vm1, %v1669_v15  ;;  %v1427_v29 = vld [vmem:[%s1929_s2] ss:$0 sm:$0xff] (!%p213_p2)  ;;  %s1672_s12 = smov (!%p213_p2), 64   ;;  %vm628_vm4 = vcmask (!%p213_p2), 1041408   ;;  %s1673_s13 = smov (!%p213_p2), 80   ;;  %vm624_vm5 = vcmask (!%p213_p2), 31744  }
   0x8   : > { %1495 = vmatprep.subr.bf16.mxu0 (!%p213_p2), %v1669_v15  ;;  %1503 = vmatprep.mubr.msk.bf16.mxu1 (!%p213_p2), %vm1670_vm1, %v1669_v15  ;;  %s1674_s14 = smov (!%p213_p2), 112   ;;  %s1675_s15 = smov (!%p213_p2), 48  }
   0x9   : > { %s1676_s18 = smov (!%p213_p2), 16  }
   0xb   : > { %1496 = vmatpush3.bf16.msra.mxu0 (!%p213_p2), %v1622_v16 }
   0xc   : > { %1507 = vmatprep.subr.bf16.mxu0 (!%p213_p2), %v1669_v15 }
   0xd   : > { %s1935_s22 = smov (!%p242_p3, %s1417_s22), 1 }
   0xe   : > { %s1453_s23 = sshll.u32 %s1935_s22, 4 }
   0xf   : > { %s246_s26 = scalar_lea.vmem %s1927_s0, %s1453_s23  ;;  %s251_s28 = scalar_lea.vmem %s1933_s6, %s1453_s23 }
  0x10   : > { %v1728_v0 = vld [vmem:[%s246_s26] sm:$0xff]  ;;  %v1730_v1 = vld [vmem:[%s246_s26 + $0x8] sm:$0xff] }
  0x11   : > { %v258_v2 = vsel %vm257_vm0, %v1728_v0, 0.0  ;;  %v261_v3 = vsel %vm257_vm0, %v1730_v1, 0.0 }
  0x12   : > { %259 = vadd.xlane.f32.xlu0 %v258_v2 }
  0x16   : > { %262 = vadd.xlane.f32.xlu0 %v261_v3 }
  0x9f   : > { %v260_v4 = vpop.xlane.xlu0 %259 }
  0xa0   : > { %v265_v5 = vmul.f32 0.03125, %v260_v4 }
  0xa2   : > { %v267_v6 = vsub.f32 %v1728_v0, %v265_v5 }
  0xa3   : > { %v263_v7 = vpop.xlane.xlu0 %262 }
  0xa4   : > { %v266_v8 = vmul.f32 0.03125, %v263_v7  ;;  %v269_v9 = vmul.f32 %v267_v6, %v267_v6 }
  0xa6   : > { %v268_v10 = vsub.f32 %v1730_v1, %v266_v8  ;;  %v271_v11 = vsel %vm257_vm0, %v269_v9, 0.0 }
  0xa7   : > { %272 = vadd.xlane.f32.xlu1 %v271_v11 }
  0xa8   : > { %v270_v12 = vmul.f32 %v268_v10, %v268_v10 }
  0xaa   : > { %v274_v13 = vsel %vm257_vm0, %v270_v12, 0.0 }
  0xab   : > { %275 = vadd.xlane.f32.xlu1 %v274_v13 }
 0x134   : > { %v273_v17 = vpop.xlane.xlu1 %272 }
 0x135   : > { %v277_v18 = vmul.f32 0.03125, %v273_v17 }
 0x137   : > { %v279_v19 = vadd.f32 1e-06, %v277_v18 }
 0x138   : > { %v276_v20 = vpop.xlane.xlu1 %275 }
 0x139   : > { %1625 = vrsqrt.f32 %v279_v19  ;;  %v278_v21 = vmul.f32 0.03125, %v276_v20 }
 0x13b   : > { %v280_v22 = vadd.f32 1e-06, %v278_v21 }
 0x13d   : > { %1627 = vrsqrt.f32 %v280_v22 }
 0x143   : > { %v1626_v23 = vpop.eup %1625 }
 0x144   : > { %v283_v24 = vmul.f32 %v1626_v23, %v267_v6 }
 0x146   : > { %v291_v28 = vmul.f32 %v1426_v25, %v283_v24 }
 0x147   : > { %v1628_v26 = vpop.eup %1627 }
 0x148   : > { %v284_v27 = vmul.f32 %v1628_v26, %v268_v10  ;;  %v299_v31 = vadd.f32 %v1427_v29, %v291_v28 }
 0x14a   : > { %v292_v30 = vmul.f32 %v1426_v25, %v284_v27 }
 0x14c   : > { %v300_v32 = vadd.f32 %v1427_v29, %v292_v30 }
 0x14e   : > { %v301_v33 = vpack.c.bf16 %v300_v32, %v299_v31 }
 0x150   : > { %1498 = vmatmul.mubr.msk.bf16.vlgmr.msra.gmra.mrb[0].mxu0 %vm257_vm0, %v301_v33 }
 0x151   : > { %1509 = vmatprep.mubr.msk.bf16.mxu0 %vm1670_vm1, %v1669_v15 }
 0x223   : > { %v355_v34 = vpop.f32.mrb[0].mxu0 }
 0x224   : > { %v364_v35 = vcombine.high %v355_v34, %v355_v34  ;;  %v1763_v36 = vpack.c.bf16 %v355_v34, %v355_v34  ;;  %v1499_v37 = vpop.f32.mrb[1].mxu0 }
 0x225   : > { %v358_v38 = vpop.f32.mrb[2].mxu0 }
 0x226   : > { %v1765_v39 = vpack.c.bf16 %v364_v35, %v364_v35  ;;  %373 = vrot.lane.b32.xlu0 %v1763_v36, %s1671_s11  ;;  %v1500_v40 = vpop.f32.mrb[3].mxu0  ;;  %v365_v41 = vcombine.high %v358_v38, %v358_v38  ;;  %v1769_v42 = vpack.c.bf16 %v358_v38, %v358_v38 }
 0x228   : > { %423 = vrot.lane.b32.xlu1 %v1765_v39, %s1671_s11  ;;  %v1772_v43 = vpack.c.bf16 %v365_v41, %v365_v41 }
 0x22c   : > { %472 = vrot.lane.b32.xlu1 %v1769_v42, %s1671_s11 }
 0x230   : > { %521 = vrot.lane.b32.xlu1 %v1772_v43, %s1671_s11 }
 0x298   : > { %v374_v44 = vpop.permute.xlu0 %373 }
 0x299   : > { %v380_v45 = vsel %vm375_vm2, %v374_v44, 0 }
 0x29a   : > { %1502 = vmatpush3.bf16.xpose.msra.mxu1 %v380_v45  ;;  %v424_v46 = vpop.permute.xlu1 %423 }
 0x29b   : > { %v429_v47 = vsel %vm375_vm2, %v424_v46, 0  ;;  %1513 = vmatprep.subr.bf16.mxu1 %v1669_v15 }
 0x29c   : > { %1508 = vmatpush3.bf16.xpose.msra.mxu0 %v429_v47 }
 0x29d   : > { %1519 = vmatprep.subr.bf16.mxu0 %v1669_v15 }
 0x29e   : > { %v473_v48 = vpop.permute.xlu1 %472 }
 0x29f   : > { %v478_v49 = vsel %vm375_vm2, %v473_v48, 0 }
 0x2a1   : > { %1504 = vmatmul.mubr.msk.bf16.vlgmr.msra.gmra.mrb[0].mxu1 %vm375_vm2, %v1763_v36 }
 0x2a2   : > { %1514 = vmatpush3.bf16.xpose.msra.mxu1 %v478_v49  ;;  %v522_v50 = vpop.permute.xlu1 %521  ;;  %1515 = vmatprep.mubr.msk.bf16.mxu1 %vm1670_vm1, %v1669_v15 }
 0x2a3   : > { %v527_v51 = vsel %vm375_vm2, %v522_v50, 0  ;;  %1510 = vmatmul.mubr.msk.bf16.vlgmr.msra.gmra.mrb[4].mxu0 %vm375_vm2, %v1765_v39  ;;  %1525 = vmatprep.subr.bf16.mxu1 %v1669_v15 }
 0x2a4   : > { %1520 = vmatpush3.bf16.xpose.msra.mxu0 %v527_v51  ;;  %1521 = vmatprep.mubr.msk.bf16.mxu0 %vm1670_vm1, %v1669_v15 }
 0x2a5   : > { %1531 = vmatprep.subr.bf16.mxu0 %v1669_v15 }
 0x2a9   : > { %1516 = vmatmul.mubr.msk.bf16.vlgmr.msra.gmra.mrb[4].mxu1 %vm375_vm2, %v1769_v42 }
 0x2aa   : > { %1527 = vmatprep.mubr.msk.bf16.mxu1 %vm1670_vm1, %v1669_v15 }
 0x2ab   : > { %1522 = vmatmul.mubr.msk.bf16.vlgmr.msra.gmra.mrb[8].mxu0 %vm375_vm2, %v1772_v43 }
 0x2ac   : > { %1533 = vmatprep.mubr.msk.bf16.mxu0 %vm1670_vm1, %v1669_v15 }
 0x374   : > { %v416_v52 = vpop.f32.mrb[0].mxu1 }
 0x375   : > { %v569_v53 = vmul.f32 0.25, %v416_v52  ;;  %v1505_v54 = vpop.f32.mrb[1].mxu1 }
 0x376   : > { %v419_v55 = vpop.f32.mrb[2].mxu1  ;;  %v465_v56 = vpop.f32.mrb[4].mxu0 }
 0x377   : > { %v570_v57 = vmul.f32 0.25, %v465_v56  ;;  %v1506_v58 = vpop.f32.mrb[3].mxu1  ;;  %v1511_v59 = vpop.f32.mrb[5].mxu0  ;;  %v574_v60 = vsel %vm573_vm3, %v569_v53, -inf }
 0x378   : > { %575 = vmax.xlane.f32.xlu0 %v574_v60  ;;  %v468_v61 = vpop.f32.mrb[6].mxu0 }
 0x379   : > { %v1512_v62 = vpop.f32.mrb[7].mxu0  ;;  %v577_v63 = vsel %vm573_vm3, %v570_v57, -inf }
 0x37a   : > { %578 = vmax.xlane.f32.xlu1 %v577_v63 }
 0x37c   : > { %v514_v2 = vpop.f32.mrb[4].mxu1 }
 0x37d   : > { %v571_v3 = vmul.f32 0.25, %v514_v2  ;;  %v1517_v4 = vpop.f32.mrb[5].mxu1 }
 0x37e   : > { %v517_v5 = vpop.f32.mrb[6].mxu1  ;;  %v563_v6 = vpop.f32.mrb[8].mxu0 }
 0x37f   : > { %v572_v7 = vmul.f32 0.25, %v563_v6  ;;  %v1518_v8 = vpop.f32.mrb[7].mxu1  ;;  %v1523_v9 = vpop.f32.mrb[9].mxu0  ;;  %v580_v10 = vsel %vm573_vm3, %v571_v3, -inf }
 0x380   : > { %581 = vmax.xlane.f32.xlu0 %v580_v10  ;;  %v566_v11 = vpop.f32.mrb[10].mxu0 }
 0x381   : > { %v1524_v12 = vpop.f32.mrb[11].mxu0  ;;  %v583_v13 = vsel %vm573_vm3, %v572_v7, -inf }
 0x384   : > { %584 = vmax.xlane.f32.xlu0 %v583_v13 }
 0x38b   : > { %672 = vrot.lane.b32.xlu1 %v1765_v39, %s1672_s12 }
 0x38f   : > { %720 = vrot.lane.b32.xlu1 %v1769_v42, %s1672_s12 }
 0x393   : > { %768 = vrot.lane.b32.xlu1 %v1772_v43, %s1672_s12 }
 0x405   : > { %v576_v14 = vpop.xlane.xlu0 %575 }
 0x406   : > { %v586_v16 = vsub.f32 %v569_v53, %v576_v14 }
 0x407   : > { %v579_v17 = vpop.xlane.xlu1 %578 }
 0x408   : > { %v590_v18 = vmul.f32 1.442695, %v586_v16  ;;  %v587_v19 = vsub.f32 %v570_v57, %v579_v17 }
 0x40a   : > { %1629 = vpow2.f32 %v590_v18  ;;  %v592_v20 = vmul.f32 1.442695, %v587_v19 }
 0x40b   : > { %v673_v21 = vpop.permute.xlu1 %672 }
 0x40c   : > { %1631 = vpow2.f32 %v592_v20  ;;  %v678_v22 = vsel %vm628_vm4, %v673_v21, 0 }
 0x40d   : > { %1532 = vmatpush3.bf16.msra.mxu0 %v678_v22  ;;  %v582_v27 = vpop.xlane.xlu0 %581 }
 0x40e   : > { %1543 = vmatprep.subr.bf16.mxu0 %v1669_v15  ;;  %v588_v29 = vsub.f32 %v571_v3, %v582_v27 }
 0x40f   : > { %v721_v38 = vpop.permute.xlu1 %720 }
 0x410   : > { %v594_v31 = vmul.f32 1.442695, %v588_v29  ;;  %v726_v52 = vsel %vm628_vm4, %v721_v38, 0 }
 0x411   : > { %v585_v28 = vpop.xlane.xlu0 %584 }
 0x412   : > { %v589_v30 = vsub.f32 %v572_v7, %v585_v28  ;;  %1633 = vpow2.f32 %v594_v31 }
 0x413   : > { %v769_v40 = vpop.permute.xlu1 %768 }
 0x414   : > { %v1630_v23 = vpop.eup %1629  ;;  %v596_v32 = vmul.f32 1.442695, %v589_v30  ;;  %v774_v54 = vsel %vm628_vm4, %v769_v40, 0 }
 0x415   : > { %v598_v24 = vsel %vm573_vm3, %v1630_v23, 0.0 }
 0x416   : > { %v1632_v25 = vpop.eup %1631  ;;  %599 = vadd.xlane.f32.xlu0 %v598_v24  ;;  %1635 = vpow2.f32 %v596_v32 }
 0x417   : > { %v601_v26 = vsel %vm573_vm3, %v1632_v25, 0.0 }
 0x418   : > { %602 = vadd.xlane.f32.xlu1 %v601_v26 }
 0x41c   : > { %v1634_v33 = vpop.eup %1633 }
 0x41d   : > { %v604_v35 = vsel %vm573_vm3, %v1634_v33, 0.0 }
 0x420   : > { %v1636_v34 = vpop.eup %1635 }
 0x421   : > { %v607_v37 = vsel %vm573_vm3, %v1636_v34, 0.0 }
 0x429   : > { %868 = vrot.lane.b32.xlu1 %v1765_v39, %s1673_s13 }
 0x42c   : > { %622 = vrot.lane.b32.xlu0 %v1763_v36, %s1672_s12 }
 0x44b   : > { %605 = vadd.xlane.f32.xlu0 %v604_v35 }
 0x44d   : > { %608 = vadd.xlane.f32.xlu1 %v607_v37 }
 0x45e   : > { %866 = vrot.lane.b32.xlu1 %v1765_v39, %s1674_s14 }
 0x461   : > { %818 = vrot.lane.b32.xlu0 %v1763_v36, %s1673_s13 }
 0x462   : > { %968 = vrot.lane.b32.xlu1 %v1772_v43, %s1673_s13 }
 0x465   : > { %816 = vrot.lane.b32.xlu0 %v1763_v36, %s1674_s14 }
 0x466   : > { %966 = vrot.lane.b32.xlu1 %v1772_v43, %s1674_s14 }
 0x469   : > { %918 = vrot.lane.b32.xlu0 %v1769_v42, %s1673_s13 }
 0x46d   : > { %916 = vrot.lane.b32.xlu0 %v1769_v42, %s1674_s14 }
 0x4a3   : > { %v600_v41 = vpop.xlane.xlu0 %599 }
 0x4a4   : > { %1637 = vrcp.f32 %v600_v41 }
 0x4a5   : > { %v603_v44 = vpop.xlane.xlu1 %602 }
 0x4a6   : > { %1639 = vrcp.f32 %v603_v44 }
 0x4a7   : > { %v623_v45 = vpop.permute.xlu0 %622 }
 0x4a8   : > { %v630_v46 = vsel %vm628_vm4, %v623_v45, 0 }
 0x4a9   : > { %1526 = vmatpush3.bf16.msra.mxu1 %v630_v46  ;;  %v869_v55 = vpop.permute.xlu1 %868 }
 0x4aa   : > { %1537 = vmatprep.subr.bf16.mxu1 %v1669_v15  ;;  %v874_v6 = vsel %vm375_vm2, %v869_v55, 0 }
 0x4ae   : > { %v1638_v47 = vpop.eup %1637 }
 0x4af   : > { %v614_v48 = vmul.f32 %v1638_v47, %v1630_v23 }
 0x4b0   : > { %v1640_v49 = vpop.eup %1639 }
 0x4b1   : > { %v615_v50 = vmul.f32 %v1640_v49, %v1632_v25  ;;  %v618_v51 = vpack.c.bf16 %v614_v48, %v614_v48 }
 0x4b3   : > { %1528 = vmatmul.mubr.msk.bf16.vlgmr.msra.gmra.mrb[8].mxu1 %vm624_vm5, %v618_v51  ;;  %v619_v53 = vpack.c.bf16 %v615_v50, %v615_v50 }
 0x4b4   : > { %1538 = vmatpush3.bf16.msra.mxu1 %v726_v52  ;;  %1539 = vmatprep.mubr.msk.bf16.mxu1 %vm1670_vm1, %v1669_v15 }
 0x4b5   : > { %1534 = vmatmul.mubr.msk.bf16.vlgmr.msra.gmra.mrb[12].mxu0 %vm624_vm5, %v619_v53  ;;  %1549 = vmatprep.subr.bf16.mxu1 %v1669_v15 }
 0x4b6   : > { %1544 = vmatpush3.bf16.msra.mxu0 %v774_v54  ;;  %1545 = vmatprep.mubr.msk.bf16.mxu0 %vm1670_vm1, %v1669_v15 }
 0x4b7   : > { %1555 = vmatprep.subr.bf16.mxu0 %v1669_v15 }
 0x4d8   : > { %v606_v56 = vpop.xlane.xlu0 %605 }
 0x4d9   : > { %1641 = vrcp.f32 %v606_v56 }
 0x4da   : > { %v609_v57 = vpop.xlane.xlu1 %608 }
 0x4db   : > { %1643 = vrcp.f32 %v609_v57 }
 0x4dc   : > { %v819_v58 = vpop.permute.xlu0 %818 }
 0x4dd   : > { %v824_v3 = vsel %vm375_vm2, %v819_v58, 0 }
 0x4de   : > { %v867_v5 = vpop.permute.xlu1 %866 }
 0x4e0   : > { %v817_v2 = vpop.permute.xlu0 %816 }
 0x4e2   : > { %v969_v8 = vpop.permute.xlu1 %968 }
 0x4e3   : > { %v1642_v59 = vpop.eup %1641  ;;  %v974_v10 = vsel %vm375_vm2, %v969_v8, 0 }
 0x4e4   : > { %v616_v60 = vmul.f32 %v1642_v59, %v1634_v33  ;;  %v919_v7 = vpop.permute.xlu0 %918 }
 0x4e5   : > { %v1644_v61 = vpop.eup %1643  ;;  %v924_v9 = vsel %vm375_vm2, %v919_v7, 0 }
 0x4e6   : > { %v617_v62 = vmul.f32 %v1644_v61, %v1636_v34  ;;  %v620_v63 = vpack.c.bf16 %v616_v60, %v616_v60  ;;  %v967_v12 = vpop.permute.xlu1 %966 }
 0x4e8   : > { %1540 = vmatmul.mubr.msk.bf16.vlgmr.msra.gmra.mrb[12].mxu1 %vm624_vm5, %v620_v63  ;;  %v621_v4 = vpack.c.bf16 %v617_v62, %v617_v62  ;;  %v917_v11 = vpop.permute.xlu0 %916 }
 0x4e9   : > { %1550 = vmatpush3.bf16.xpose.msra.mxu1 %v824_v3  ;;  %1551 = vmatprep.mubr.msk.bf16.mxu1 %vm1670_vm1, %v1669_v15 }
 0x4ea   : > { %1546 = vmatmul.mubr.msk.bf16.vlgmr.msra.gmra.mrb[16].mxu0 %vm624_vm5, %v621_v4  ;;  %1561 = vmatprep.subr.bf16.mxu1 %v1669_v15 }
 0x4eb   : > { %1556 = vmatpush3.bf16.xpose.msra.mxu0 %v874_v6  ;;  %1557 = vmatprep.mubr.msk.bf16.mxu0 %vm1670_vm1, %v1669_v15 }
 0x4ec   : > { %1567 = vmatprep.subr.bf16.mxu0 %v1669_v15 }
 0x4f0   : > { %1552 = vmatmul.mubr.msk.bf16.vlgmr.msra.gmra.mrb[16].mxu1 %vm375_vm2, %v817_v2 }
 0x4f1   : > { %1562 = vmatpush3.bf16.xpose.msra.mxu1 %v924_v9  ;;  %1563 = vmatprep.mubr.msk.bf16.mxu1 %vm1670_vm1, %v1669_v15 }
 0x4f2   : > { %1558 = vmatmul.mubr.msk.bf16.vlgmr.msra.gmra.mrb[20].mxu0 %vm375_vm2, %v867_v5  ;;  %1573 = vmatprep.subr.bf16.mxu1 %v1669_v15 }
 0x4f3   : > { %1568 = vmatpush3.bf16.xpose.msra.mxu0 %v974_v10  ;;  %1569 = vmatprep.mubr.msk.bf16.mxu0 %vm1670_vm1, %v1669_v15 }
 0x4f4   : > { %1579 = vmatprep.subr.bf16.mxu0 %v1669_v15 }
 0x4f8   : > { %1564 = vmatmul.mubr.msk.bf16.vlgmr.msra.gmra.mrb[20].mxu1 %vm375_vm2, %v917_v11 }
 0x4f9   : > { %1575 = vmatprep.mubr.msk.bf16.mxu1 %vm1670_vm1, %v1669_v15 }
 0x4fa   : > { %1570 = vmatmul.mubr.msk.bf16.vlgmr.msra.gmra.mrb[24].mxu0 %vm375_vm2, %v967_v12 }
 0x4fb   : > { %1581 = vmatprep.mubr.msk.bf16.mxu0 %vm1670_vm1, %v1669_v15 }
 0x586   : > { %v1859_v13 = vpop.f32.mrb[8].mxu1 }
 0x587   : > { %v1529_v14 = vpop.f32.mrb[9].mxu1 }
 0x588   : > { %v669_v16 = vpop.f32.mrb[10].mxu1  ;;  %v1861_v17 = vpop.f32.mrb[12].mxu0 }
 0x589   : > { %v1530_v18 = vpop.f32.mrb[11].mxu1  ;;  %v1535_v19 = vpop.f32.mrb[13].mxu0 }
 0x58a   : > { %v717_v20 = vpop.f32.mrb[14].mxu0 }
 0x58b   : > { %v1536_v21 = vpop.f32.mrb[15].mxu0 }
 0x5bb   : > { %v1863_v22 = vpop.f32.mrb[12].mxu1 }
 0x5bc   : > { %v1541_v23 = vpop.f32.mrb[13].mxu1 }
 0x5bd   : > { %v765_v24 = vpop.f32.mrb[14].mxu1  ;;  %v1865_v25 = vpop.f32.mrb[16].mxu0 }
 0x5be   : > { %v1542_v26 = vpop.f32.mrb[15].mxu1  ;;  %v1547_v27 = vpop.f32.mrb[17].mxu0 }
 0x5bf   : > { %v813_v28 = vpop.f32.mrb[18].mxu0 }
 0x5c0   : > { %v1548_v29 = vpop.f32.mrb[19].mxu0 }
 0x5c3   : > { %v860_v30 = vpop.f32.mrb[16].mxu1 }
 0x5c4   : > { %v1016_v31 = vmul.f32 0.25, %v860_v30  ;;  %v1553_v32 = vpop.f32.mrb[17].mxu1 }
 0x5c5   : > { %v863_v33 = vpop.f32.mrb[18].mxu1  ;;  %v910_v34 = vpop.f32.mrb[20].mxu0 }
 0x5c6   : > { %v1017_v35 = vmul.f32 0.25, %v910_v34  ;;  %v1554_v37 = vpop.f32.mrb[19].mxu1  ;;  %v1559_v38 = vpop.f32.mrb[21].mxu0  ;;  %v1020_v40 = vsel %vm573_vm3, %v1016_v31, -inf }
 0x5c7   : > { %1021 = vmax.xlane.f32.xlu0 %v1020_v40  ;;  %v913_v41 = vpop.f32.mrb[22].mxu0 }
 0x5c8   : > { %v1560_v44 = vpop.f32.mrb[23].mxu0  ;;  %v1023_v45 = vsel %vm573_vm3, %v1017_v35, -inf }
 0x5c9   : > { %1024 = vmax.xlane.f32.xlu1 %v1023_v45  ;;  %v1623_v45 = vld [vmem:[%s1931_s4] sm:$0xff]  }
 0x5cb   : > { %v960_v46 = vpop.f32.mrb[20].mxu1 }
 0x5cc   : > { %v1018_v47 = vmul.f32 0.25, %v960_v46  ;;  %v1565_v48 = vpop.f32.mrb[21].mxu1 }
 0x5cd   : > { %v963_v49 = vpop.f32.mrb[22].mxu1  ;;  %v1010_v50 = vpop.f32.mrb[24].mxu0 }
 0x5ce   : > { %v1019_v51 = vmul.f32 0.25, %v1010_v50  ;;  %v1566_v52 = vpop.f32.mrb[23].mxu1  ;;  %v1571_v53 = vpop.f32.mrb[25].mxu0  ;;  %v1026_v54 = vsel %vm573_vm3, %v1018_v47, -inf }
 0x5cf   : > { %1027 = vmax.xlane.f32.xlu0 %v1026_v54  ;;  %v1013_v55 = vpop.f32.mrb[26].mxu0 }
 0x5d0   : > { %v1572_v56 = vpop.f32.mrb[27].mxu0  ;;  %v1029_v57 = vsel %vm573_vm3, %v1019_v51, -inf }
 0x5d3   : > { %1030 = vmax.xlane.f32.xlu0 %v1029_v57 }
 0x654   : > { %v1022_v58 = vpop.xlane.xlu0 %1021 }
 0x655   : > { %v1032_v59 = vsub.f32 %v1016_v31, %v1022_v58 }
 0x656   : > { %v1025_v60 = vpop.xlane.xlu1 %1024 }
 0x657   : > { %v1036_v61 = vmul.f32 1.442695, %v1032_v59  ;;  %v1033_v62 = vsub.f32 %v1017_v35, %v1025_v60 }
 0x659   : > { %1645 = vpow2.f32 %v1036_v61  ;;  %v1038_v63 = vmul.f32 1.442695, %v1033_v62 }
 0x65b   : > { %1647 = vpow2.f32 %v1038_v63 }
 0x65c   : > { %v1028_v2 = vpop.xlane.xlu0 %1027 }
 0x65d   : > { %v1034_v3 = vsub.f32 %v1018_v47, %v1028_v2 }
 0x65f   : > { %v1040_v4 = vmul.f32 1.442695, %v1034_v3 }
 0x660   : > { %v1031_v11 = vpop.xlane.xlu0 %1030 }
 0x661   : > { %1649 = vpow2.f32 %v1040_v4  ;;  %v1035_v12 = vsub.f32 %v1019_v51, %v1031_v11 }
 0x663   : > { %v1646_v5 = vpop.eup %1645  ;;  %v1042_v14 = vmul.f32 1.442695, %v1035_v12 }
 0x664   : > { %v1044_v6 = vsel %vm573_vm3, %v1646_v5, 0.0 }
 0x665   : > { %v1648_v7 = vpop.eup %1647  ;;  %1045 = vadd.xlane.f32.xlu0 %v1044_v6  ;;  %1651 = vpow2.f32 %v1042_v14 }
 0x666   : > { %v1047_v8 = vsel %vm573_vm3, %v1648_v7, 0.0 }
 0x667   : > { %1048 = vadd.xlane.f32.xlu1 %v1047_v8 }
 0x66b   : > { %v1650_v9 = vpop.eup %1649 }
 0x66c   : > { %v1050_v10 = vsel %vm573_vm3, %v1650_v9, 0.0 }
 0x66d   : > { %1051 = vadd.xlane.f32.xlu0 %v1050_v10 }
 0x66f   : > { %v1652_v16 = vpop.eup %1651 }
 0x670   : > { %v1053_v18 = vsel %vm573_vm3, %v1652_v16, 0.0 }
 0x678   : > { %1116 = vrot.lane.b32.xlu1 %v1765_v39, %s1675_s15 }
 0x67c   : > { %1164 = vrot.lane.b32.xlu1 %v1769_v42, %s1675_s15 }
 0x683   : > { %1068 = vrot.lane.b32.xlu0 %v1763_v36, %s1675_s15 }
 0x6a0   : > { %1054 = vadd.xlane.f32.xlu1 %v1053_v18 }
 0x6b1   : > { %1212 = vrot.lane.b32.xlu1 %v1772_v43, %s1675_s15 }
 0x6f2   : > { %v1046_v19 = vpop.xlane.xlu0 %1045 }
 0x6f3   : > { %1653 = vrcp.f32 %v1046_v19 }
 0x6f4   : > { %v1049_v20 = vpop.xlane.xlu1 %1048 }
 0x6f5   : > { %1655 = vrcp.f32 %v1049_v20 }
 0x6f8   : > { %v1117_v21 = vpop.permute.xlu1 %1116 }
 0x6f9   : > { %v1122_v39 = vsel %vm628_vm4, %v1117_v21, 0 }
 0x6fa   : > { %1580 = vmatpush3.bf16.msra.mxu0 %v1122_v39  ;;  %v1052_v42 = vpop.xlane.xlu0 %1051 }
 0x6fb   : > { %1657 = vrcp.f32 %v1052_v42  ;;  %1591 = vmatprep.subr.bf16.mxu0 %v1669_v15 }
 0x6fc   : > { %v1165_v43 = vpop.permute.xlu1 %1164 }
 0x6fd   : > { %v1654_v36 = vpop.eup %1653  ;;  %v1170_v31 = vsel %vm628_vm4, %v1165_v43, 0 }
 0x6fe   : > { %v1060_v23 = vmul.f32 %v1654_v36, %v1646_v5  ;;  %v1069_v24 = vpop.permute.xlu0 %1068 }
 0x6ff   : > { %v1656_v26 = vpop.eup %1655  ;;  %v1074_v27 = vsel %vm628_vm4, %v1069_v24, 0 }
 0x700   : > { %v1061_v28 = vmul.f32 %v1656_v26, %v1648_v7  ;;  %1574 = vmatpush3.bf16.msra.mxu1 %v1074_v27  ;;  %v1064_v29 = vpack.c.bf16 %v1060_v23, %v1060_v23 }
 0x701   : > { %1585 = vmatprep.subr.bf16.mxu1 %v1669_v15 }
 0x702   : > { %v1065_v30 = vpack.c.bf16 %v1061_v28, %v1061_v28 }
 0x703   : > { %1576 = vmatmul.mubr.msk.bf16.vlgmr.msra.gmra.mrb[24].mxu1 %vm624_vm5, %v1064_v29 }
 0x704   : > { %1582 = vmatmul.mubr.msk.bf16.vlgmr.msra.gmra.mrb[28].mxu0 %vm624_vm5, %v1065_v30  ;;  %1586 = vmatpush3.bf16.msra.mxu1 %v1170_v31 }
 0x705   : > { %v1658_v32 = vpop.eup %1657  ;;  %1587 = vmatprep.mubr.msk.bf16.mxu1 %vm1670_vm1, %v1669_v15  ;;  %1593 = vmatprep.mubr.msk.bf16.mxu0 %vm1670_vm1, %v1669_v15 }
 0x706   : > { %v1062_v33 = vmul.f32 %v1658_v32, %v1650_v9  ;;  %1597 = vmatprep.subr.bf16.mxu1 %v1669_v15 }
 0x708   : > { %v1066_v34 = vpack.c.bf16 %v1062_v33, %v1062_v33 }
 0x70b   : > { %1588 = vmatmul.mubr.msk.bf16.vlgmr.msra.gmra.mrb[28].mxu1 %vm624_vm5, %v1066_v34 }
 0x70c   : > { %1601 = vmatprep.mubr.msk.bf16.mxu1 %vm1670_vm1, %v1669_v15  ;;  %1598 = vmatpush3.bf16.msra.mxu1 %v1623_v45 }
 0x70d   : > { %1599 = vmatprep.subr.bf16.mxu1 %v1669_v15  ;;  %v1624_v15 = vld [vmem:[%s1931_s4 + $0x8] sm:$0xff]  }
 0x710   : > { %1600 = vmatpush3.bf16.msra.mxu1 %v1624_v15 }
 0x72d   : > { %v1055_v35 = vpop.xlane.xlu1 %1054 }
 0x72e   : > { %1659 = vrcp.f32 %v1055_v35 }
 0x731   : > { %v1213_v37 = vpop.permute.xlu1 %1212 }
 0x732   : > { %v1218_v38 = vsel %vm628_vm4, %v1213_v37, 0 }
 0x733   : > { %1592 = vmatpush3.bf16.msra.mxu0 %v1218_v38 }
 0x738   : > { %v1660_v40 = vpop.eup %1659 }
 0x739   : > { %v1063_v41 = vmul.f32 %v1660_v40, %v1652_v16 }
 0x73b   : > { %v1067_v44 = vpack.c.bf16 %v1063_v41, %v1063_v41 }
 0x73d   : > { %1594 = vmatmul.mubr.msk.bf16.vlgmr.msra.gmra.mrb[32].mxu0 %vm624_vm5, %v1067_v44 }
 0x7d6   : > { %v1110_v46 = vpop.f32.mrb[24].mxu1 }
 0x7d7   : > { %1264 = vrot.lane.b32.xlu0 %v1110_v46, %s1676_s18  ;;  %v1577_v47 = vpop.f32.mrb[25].mxu1  ;;  %v1158_v48 = vpop.f32.mrb[28].mxu0 }
 0x7d8   : > { %v1113_v49 = vpop.f32.mrb[26].mxu1  ;;  %1266 = vrot.lane.b32.xlu1 %v1158_v48, %s1676_s18  ;;  %v1583_v50 = vpop.f32.mrb[29].mxu0 }
 0x7d9   : > { %v1578_v51 = vpop.f32.mrb[27].mxu1  ;;  %v1161_v52 = vpop.f32.mrb[30].mxu0 }
 0x7da   : > { %v1584_v53 = vpop.f32.mrb[31].mxu0 }
 0x7de   : > { %v1206_v54 = vpop.f32.mrb[28].mxu1 }
 0x7df   : > { %1268 = vrot.lane.b32.xlu0 %v1206_v54, %s1676_s18  ;;  %v1589_v55 = vpop.f32.mrb[29].mxu1 }
 0x7e0   : > { %v1209_v56 = vpop.f32.mrb[30].mxu1 }
 0x7e1   : > { %v1590_v57 = vpop.f32.mrb[31].mxu1 }
 0x810   : > { %v1254_v58 = vpop.f32.mrb[32].mxu0 }
 0x811   : > { %1270 = vrot.lane.b32.xlu1 %v1254_v58, %s1676_s18  ;;  %v1595_v59 = vpop.f32.mrb[33].mxu0 }
 0x812   : > { %v1257_v60 = vpop.f32.mrb[34].mxu0 }
 0x813   : > { %v1596_v61 = vpop.f32.mrb[35].mxu0 }
 0x849   : > { %v1265_v62 = vpop.permute.xlu0 %1264 }
 0x84a   : > { %v1276_v63 = vsel %vm375_vm2, %v1859_v13, %v1265_v62  ;;  %v1267_v2 = vpop.permute.xlu1 %1266  ;;  %v1450_v13 = vld [vmem:[%s1932_s5] ss:$0 sm:$0xff] }
 0x84b   : > { %v1277_v3 = vsel %vm375_vm2, %v1861_v17, %v1267_v2 }
 0x84c   : > { %v1284_v4 = vcombine.low %v1276_v63, %v1277_v3 }
 0x851   : > { %v1269_v5 = vpop.permute.xlu0 %1268 }
 0x852   : > { %v1278_v7 = vsel %vm375_vm2, %v1863_v22, %v1269_v5 }
 0x883   : > { %v1271_v6 = vpop.permute.xlu1 %1270 }
 0x884   : > { %v1279_v8 = vsel %vm375_vm2, %v1865_v25, %v1271_v6 }
 0x885   : > { %v1285_v9 = vcombine.low %v1278_v7, %v1279_v8 }
 0x887   : > { %v1288_v10 = vpack.c.bf16 %v1285_v9, %v1284_v4 }
 0x889   : > { %1602 = vmatmul.mubr.msk.bf16.vlgmr.msra.gmra.mrb[32].mxu1 %vm257_vm0, %v1288_v10 }
 0x95c   : > { %v1342_v11 = vpop.f32.mrb[32].mxu1 }
 0x95d   : > { %v1349_v17 = vadd.f32 %v1342_v11, %v1728_v0  ;;  %v1603_v12 = vpop.f32.mrb[33].mxu1 }
 0x95e   : > { %v1345_v22 = vpop.f32.mrb[34].mxu1 }
 0x95f   : > { %v1358_v14 = vadd.f32 %v1450_v13, %v1349_v17  ;;  %v1350_v25 = vadd.f32 %v1345_v22, %v1730_v1  ;;  %v1604_v16 = vpop.f32.mrb[35].mxu1 }
 0x961   : > { %1360 = vst.msk [vmem:[%s251_s28] sm:$0xff] %vm257_vm0, %v1358_v14  ;;  %v1359_v18 = vadd.f32 %v1450_v13, %v1350_v25 }
 0x963   : > { %1361 = vst.msk [vmem:[%s251_s28 + $0x8] sm:$0xff] %vm257_vm0, %v1359_v18 }
 0x964 PF: > { %s16_s21 = sadd.s32 1, %s1667_s21  }
 0x965   : > { %p13_p4 = scmp.ge.s32.totalorder %s16_s21, 4  }
 0x967   :  { %15 = sbr.rel (!%p13_p4) target bundleno = 1 (0x1), region = 74 }

// kernel: forward.10
= control target key start
LH: loop header
LB: loop body
LE: loop exit
PB: predicated region body
PF: predicated region fallthrough
CT: control target
= control target key end

     0   :  { %s734_s24 = smov 0   ;;  %s817_s0 = inlined_call_operand.vmem [shape: f32[2,16,32], index: 0, kind: input, shape index: {}]   ;;  %s818_s1 = inlined_call_operand.vmem [shape: f32[1,32], index: 1, kind: input, shape index: {}]   ;;  %s819_s2 = inlined_call_operand.vmem [shape: f32[1,32], index: 2, kind: input, shape index: {}]   ;;  %s820_s3 = inlined_call_operand.vmem [shape: bf16[32,128], index: 3, kind: input, shape index: {}]   ;;  %s821_s4 = inlined_call_operand.vmem [shape: f32[1,128], index: 4, kind: input, shape index: {}]   ;;  %s822_s5 = inlined_call_operand.vmem [shape: bf16[128,32], index: 5, kind: input, shape index: {}]   ;;  %s823_s6 = inlined_call_operand.vmem [shape: f32[1,32], index: 6, kind: input, shape index: {}]   ;;  %s824_s7 = inlined_call_operand.vmem [shape: f32[2,16,32], index: 7, kind: output, shape index: {}]  }
   0x1 LB: > { %s588_s25 = sadd.s32 4294967295, %s690_s24   ;;  %p592_p0 = scmp.ge.s32.totalorder %s690_s24, 1  ;;  %s690_s24 = sphi %s734_s24, %s17_s24  }
   0x2   : > { %p237_p1 = scmp.lt.s32.totalorder %s690_s24, 3 }
   0x4   : > { %p238_p2 = pnand %p592_p0, %p237_p1 }
   0x5   : > { %p269_p3 = scmp.lt.s32.totalorder (!%p238_p2), %s588_s25, 1  ;;  %vm284_vm0 = vcmask (!%p238_p2), 261120   ;;  %v666_v14 = vld [vmem:[%s820_s3] sm:$0xff] (!%p238_p2)   ;;  %v692_v15 = vmov (!%p238_p2), 0.0   ;;  %v667_v16 = vld [vmem:[%s820_s3 + $0x8] sm:$0xff] (!%p238_p2)   ;;  %vm693_vm1 = vmmov (!%p238_p2), 0  }
   0x6   : > { %241 = sbr.rel (%p238_p2) target bundleno = 798 (0x31e), region = 48  ;;  %628 = vmatprep.subr.bf16.mxu0 (!%p238_p2), %v692_v15  ;;  %636 = vmatprep.subr.bf16.mxu1 (!%p238_p2), %v692_v15  ;;  %v597_v25 = vld [vmem:[%s818_s1] ss:$0 sm:$0xff] (!%p238_p2)  ;;  %v669_v35 = vld [vmem:[%s822_s5 + $0x8] sm:$0xff] (!%p238_p2)   ;;  %v670_v36 = vld [vmem:[%s822_s5 + $0x10] sm:$0xff] (!%p238_p2)  }
   0x7   : > { %629 = vmatpush3.bf16.msra.mxu0 (!%p238_p2), %v666_v14  ;;  %632 = vmatprep.mubr.msk.bf16.mxu0 (!%p238_p2), %vm693_vm1, %v692_v15  ;;  %v598_v29 = vld [vmem:[%s819_s2] ss:$0 sm:$0xff] (!%p238_p2)  ;;  %v671_v37 = vld [vmem:[%s822_s5 + $0x18] sm:$0xff] (!%p238_p2)   ;;  %v673_v39 = vld [vmem:[%s822_s5 + $0x28] sm:$0xff] (!%p238_p2)  }
   0x8   : > { %630 = vmatprep.subr.bf16.mxu0 (!%p238_p2), %v692_v15  ;;  %652 = vmatprep.mubr.msk.bf16.mxu1 (!%p238_p2), %vm693_vm1, %v692_v15  ;;  %v668_v34 = vld [vmem:[%s822_s5] sm:$0xff] (!%p238_p2)   ;;  %v674_v40 = vld [vmem:[%s822_s5 + $0x30] sm:$0xff] (!%p238_p2)   ;;  %v675_v41 = vld [vmem:[%s822_s5 + $0x38] sm:$0xff] (!%p238_p2)  }
   0x9   : > { %637 = vmatpush3.bf16.msra.mxu1 (!%p238_p2), %v668_v34  ;;  %v672_v38 = vld [vmem:[%s822_s5 + $0x20] sm:$0xff] (!%p238_p2)  }
   0xa   : > { %638 = vmatprep.subr.bf16.mxu1 (!%p238_p2), %v692_v15  ;;  %v599_v42 = vld [vmem:[%s821_s4] ss:$0 sm:$0xff] (!%p238_p2) }
   0xb   : > { %631 = vmatpush3.bf16.msra.mxu0 (!%p238_p2), %v667_v16 }
   0xd   : > { %s826_s25 = smov (!%p269_p3, %s588_s25), 1  ;;  %639 = vmatpush3.bf16.msra.mxu1 %v669_v35 }
   0xe   : > { %s614_s26 = sshll.u32 %s826_s25, 4  ;;  %640 = vmatprep.subr.bf16.mxu1 %v692_v15 }
   0xf   : > { %s273_s29 = scalar_lea.vmem %s817_s0, %s614_s26  ;;  %s278_s17 = scalar_lea.vmem %s824_s7, %s614_s26 }
  0x10   : > { %v750_v0 = vld [vmem:[%s273_s29] sm:$0xff]  ;;  %v752_v1 = vld [vmem:[%s273_s29 + $0x8] sm:$0xff] }
  0x11   : > { %v285_v2 = vsel %vm284_vm0, %v750_v0, 0.0  ;;  %v288_v3 = vsel %vm284_vm0, %v752_v1, 0.0  ;;  %641 = vmatpush3.bf16.msra.mxu1 %v670_v36 }
  0x12   : > { %286 = vadd.xlane.f32.xlu0 %v285_v2  ;;  %642 = vmatprep.subr.bf16.mxu1 %v692_v15 }
  0x15   : > { %643 = vmatpush3.bf16.msra.mxu1 %v671_v37 }
  0x16   : > { %289 = vadd.xlane.f32.xlu0 %v288_v3  ;;  %644 = vmatprep.subr.bf16.mxu1 %v692_v15 }
  0x19   : > { %645 = vmatpush3.bf16.msra.mxu1 %v672_v38 }
  0x1a   : > { %646 = vmatprep.subr.bf16.mxu1 %v692_v15 }
  0x1d   : > { %647 = vmatpush3.bf16.msra.mxu1 %v673_v39 }
  0x1e   : > { %648 = vmatprep.subr.bf16.mxu1 %v692_v15 }
  0x21   : > { %649 = vmatpush3.bf16.msra.mxu1 %v674_v40 }
  0x22   : > { %650 = vmatprep.subr.bf16.mxu1 %v692_v15 }
  0x25   : > { %651 = vmatpush3.bf16.msra.mxu1 %v675_v41 }
  0x9f   : > { %v287_v4 = vpop.xlane.xlu0 %286 }
  0xa0   : > { %v292_v5 = vmul.f32 0.03125, %v287_v4 }
  0xa2   : > { %v294_v6 = vsub.f32 %v750_v0, %v292_v5 }
  0xa3   : > { %v290_v7 = vpop.xlane.xlu0 %289 }
  0xa4   : > { %v293_v8 = vmul.f32 0.03125, %v290_v7  ;;  %v296_v9 = vmul.f32 %v294_v6, %v294_v6  ;;  %v611_v7 = vld [vmem:[%s823_s6] ss:$0 sm:$0xff] }
  0xa6   : > { %v295_v10 = vsub.f32 %v752_v1, %v293_v8  ;;  %v298_v11 = vsel %vm284_vm0, %v296_v9, 0.0 }
  0xa7   : > { %299 = vadd.xlane.f32.xlu1 %v298_v11 }
  0xa8   : > { %v297_v12 = vmul.f32 %v295_v10, %v295_v10 }
  0xaa   : > { %v301_v13 = vsel %vm284_vm0, %v297_v12, 0.0 }
  0xab   : > { %302 = vadd.xlane.f32.xlu1 %v301_v13 }
 0x134   : > { %v300_v17 = vpop.xlane.xlu1 %299 }
 0x135   : > { %v304_v18 = vmul.f32 0.03125, %v300_v17 }
 0x137   : > { %v306_v19 = vadd.f32 1e-06, %v304_v18 }
 0x138   : > { %v303_v20 = vpop.xlane.xlu1 %302 }
 0x139   : > { %676 = vrsqrt.f32 %v306_v19  ;;  %v305_v21 = vmul.f32 0.03125, %v303_v20 }
 0x13b   : > { %v307_v22 = vadd.f32 1e-06, %v305_v21 }
 0x13d   : > { %678 = vrsqrt.f32 %v307_v22 }
 0x143   : > { %v677_v23 = vpop.eup %676 }
 0x144   : > { %v310_v24 = vmul.f32 %v677_v23, %v294_v6 }
 0x146   : > { %v318_v28 = vmul.f32 %v597_v25, %v310_v24 }
 0x147   : > { %v679_v26 = vpop.eup %678 }
 0x148   : > { %v311_v27 = vmul.f32 %v679_v26, %v295_v10  ;;  %v326_v31 = vadd.f32 %v598_v29, %v318_v28 }
 0x14a   : > { %v319_v30 = vmul.f32 %v597_v25, %v311_v27 }
 0x14c   : > { %v327_v32 = vadd.f32 %v598_v29, %v319_v30 }
 0x14e   : > { %v328_v33 = vpack.c.bf16 %v327_v32, %v326_v31 }
 0x150   : > { %633 = vmatmul.mubr.msk.bf16.vlgmr.msra.gmra.mrb[0].mxu0 %vm284_vm0, %v328_v33 }
 0x223   : > { %v389_v43 = vpop.f32.mrb[0].mxu0 }
 0x224   : > { %v390_v44 = vadd.f32 %v599_v42, %v389_v43  ;;  %v634_v45 = vpop.f32.mrb[1].mxu0 }
 0x225   : > { %v392_v46 = vpop.f32.mrb[2].mxu0 }
 0x226   : > { %v398_v47 = vmul.f32 0.044715, %v390_v44  ;;  %v393_v48 = vadd.f32 %v599_v42, %v392_v46  ;;  %v635_v49 = vpop.f32.mrb[3].mxu0  ;;  %v396_v62 = vmul.f32 0.5, %v390_v44 }
 0x228   : > { %v400_v50 = vmul.f32 %v398_v47, %v390_v44  ;;  %v399_v51 = vmul.f32 0.044715, %v393_v48  ;;  %v397_v63 = vmul.f32 0.5, %v393_v48 }
 0x22a   : > { %v402_v52 = vmul.f32 %v400_v50, %v390_v44  ;;  %v401_v53 = vmul.f32 %v399_v51, %v393_v48 }
 0x22c   : > { %v403_v54 = vmul.f32 %v401_v53, %v393_v48  ;;  %v404_v55 = vadd.f32 %v402_v52, %v390_v44 }
 0x22e   : > { %v405_v56 = vadd.f32 %v403_v54, %v393_v48  ;;  %v406_v57 = vmul.f32 0.7978846, %v404_v55 }
 0x230   : > { %v407_v58 = vmul.f32 0.7978846, %v405_v56  ;;  %680 = vtanh.f32 %v406_v57 }
 0x232   : > { %682 = vtanh.f32 %v407_v58 }
 0x23a   : > { %v681_v59 = vpop.eup %680 }
 0x23b   : > { %v410_v60 = vadd.f32 1.0, %v681_v59 }
 0x23c   : > { %v683_v61 = vpop.eup %682 }
 0x23d   : > { %v411_v2 = vadd.f32 1.0, %v683_v61  ;;  %v412_v3 = vmul.f32 %v410_v60, %v396_v62 }
 0x23f   : > { %v413_v4 = vmul.f32 %v411_v2, %v397_v63 }
 0x241   : > { %v414_v5 = vpack.c.bf16 %v413_v4, %v412_v3 }
 0x243   : > { %653 = vmatmul.mubr.bf16.vlgmr.msra.gmra.mrb[0].mxu1 %v414_v5 }
 0x316   : > { %v513_v6 = vpop.f32.mrb[0].mxu1 }
 0x317   : > { %v520_v8 = vadd.f32 %v513_v6, %v750_v0  ;;  %v654_v9 = vpop.f32.mrb[1].mxu1 }
 0x318   : > { %v516_v10 = vpop.f32.mrb[2].mxu1 }
 0x319   : > { %v529_v11 = vadd.f32 %v611_v7, %v520_v8  ;;  %v521_v12 = vadd.f32 %v516_v10, %v752_v1  ;;  %v655_v13 = vpop.f32.mrb[3].mxu1 }
 0x31b   : > { %531 = vst.msk [vmem:[%s278_s17] sm:$0xff] %vm284_vm0, %v529_v11  ;;  %v530_v14 = vadd.f32 %v611_v7, %v521_v12 }
 0x31d   : > { %532 = vst.msk [vmem:[%s278_s17 + $0x8] sm:$0xff] %vm284_vm0, %v530_v14 }
 0x31e PF: > { %s17_s24 = sadd.s32 1, %s690_s24  }
 0x31f   : > { %p14_p4 = scmp.ge.s32.totalorder %s17_s24, 4  }
 0x321   :  { %16 = sbr.rel (!%p14_p4) target bundleno = 1 (0x1), region = 78 }

// kernel: forward.11
= control target key start
LH: loop header
LB: loop body
LE: loop exit
PB: predicated region body
PF: predicated region fallthrough
CT: control target
= control target key end

     0   :  { %s516_s12 = smov 0   ;;  %s600_s0 = inlined_call_operand.vmem [shape: f32[2,6,6,32], index: 0, kind: input, shape index: {}]   ;;  %s601_s1 = inlined_call_operand.vmem [shape: f32[9,32], index: 1, kind: input, shape index: {}]   ;;  %s602_s2 = inlined_call_operand.vmem [shape: f32[1,32], index: 2, kind: input, shape index: {}]   ;;  %s603_s3 = inlined_call_operand.vmem [shape: f32[2,4,4,32], index: 3, kind: output, shape index: {}]  }
   0x1 LB: > { %s454_s13 = sadd.s32 4294967295, %s494_s12   ;;  %p458_p0 = scmp.ge.s32.totalorder %s494_s12, 1  ;;  %s494_s12 = sphi %s516_s12, %s13_s12  }
   0x2   : > { %p137_p1 = scmp.lt.s32.totalorder %s494_s12, 3 }
   0x4   : > { %p138_p2 = pnand %p458_p0, %p137_p1 }
   0x5   : > { %p161_p3 = scmp.lt.s32.totalorder (!%p138_p2), %s454_s13, 1  ;;  %v179_v0 = vlaneseq (!%p138_p2)  ;;  %v177_v2 = vld [vmem:[%s601_s1] sm:$0xff] (!%p138_p2)  ;;  %v552_v24 = vld [vmem:[%s601_s1 + $0x8] ss:$0 sm:$0xff] (!%p138_p2)  ;;  %vm394_vm1 = vcmask (!%p138_p2), 257024  }
   0x6   : > { %141 = sbr.rel (%p138_p2) target bundleno = 71 (0x47), region = 32 }
   0x7   : > { %v180_v1 = vshrl.u32 (!%p138_p2), %v179_v0, 7 }
   0x9   : > { %v181_v3 = vsub.s32 (!%p138_p2), 0, %v180_v1  ;;  %v193_v4 = vsub.s32 (!%p138_p2), 1, %v180_v1  ;;  %v217_v5 = vsub.s32 (!%p138_p2), 2, %v180_v1  ;;  %v241_v6 = vsub.s32 (!%p138_p2), 3, %v180_v1 }
   0xa   : > { %v253_v7 = vsub.s32 (!%p138_p2), 4, %v180_v1  ;;  %v277_v8 = vsub.s32 (!%p138_p2), 5, %v180_v1  ;;  %v301_v9 = vsub.s32 (!%p138_p2), 6, %v180_v1  ;;  %v313_v10 = vsub.s32 (!%p138_p2), 7, %v180_v1 }
   0xb   : > { %v182_v11 = vrot.slane (!%p138_p2), %v177_v2, %v181_v3  ;;  %v194_v12 = vrot.slane (!%p138_p2), %v177_v2, %v193_v4  ;;  %v535_v13 = vrot.slane (!%p138_p2), %v177_v2, %v217_v5  ;;  %v546_v22 = vrot.slane (!%p138_p2), %v177_v2, %v241_v6 }
   0xc   : > { %v538_v15 = vrot.slane (!%p138_p2), %v177_v2, %v253_v7  ;;  %v540_v16 = vrot.slane (!%p138_p2), %v177_v2, %v277_v8  ;;  %v542_v17 = vrot.slane (!%p138_p2), %v177_v2, %v313_v10  ;;  %v555_v26 = vrot.slane (!%p138_p2), %v177_v2, %v301_v9 }
   0xd   : > { %s605_s13 = smov (!%p161_p3, %s454_s13), 1 }
   0xe   : > { %s471_s16 = smul.u32 48, %s605_s13  ;;  %s470_s24 = sshll.u32 %s605_s13, 4 }
   0xf   : > { %s170_s27 = scalar_lea.vmem %s603_s3, %s470_s24 }
  0x10   : > { %s533_s19 = scalar_lea.vmem %s600_s0, %s471_s16 }
  0x11   : > { %v171_v14 = vld [vmem:[%s533_s19] sm:$0x3f]  ;;  %v172_v18 = vld [vmem:[%s533_s19 + $0x8] sm:$0x3f]  ;;  %v173_v23 = vld [vmem:[%s533_s19 + $0x10] sm:$0x3f] }
  0x12   : > { %v183_v19 = vmul.f32 %v182_v11, %v171_v14  ;;  %v195_v20 = vmul.f32 %v194_v12, %v171_v14  ;;  %v219_v21 = vmul.f32 %v535_v13, %v171_v14  ;;  %v255_v25 = vmul.f32 %v538_v15, %v172_v18  ;;  %v174_v41 = vld [vmem:[%s533_s19 + $0x18] sm:$0x3f]  ;;  %v175_v2 = vld [vmem:[%s533_s19 + $0x20] sm:$0x3f] }
  0x13   : > { %v279_v29 = vmul.f32 %v540_v16, %v172_v18  ;;  %v315_v30 = vmul.f32 %v542_v17, %v173_v23  ;;  %v184_v31 = vmul.f32 %v182_v11, %v172_v18  ;;  %v196_v32 = vmul.f32 %v194_v12, %v172_v18 }
  0x14   : > { %v203_v27 = vrot.slane %v195_v20, 1  ;;  %v227_v28 = vrot.slane %v219_v21, 2  ;;  %v243_v34 = vmul.f32 %v546_v22, %v172_v18  ;;  %v339_v35 = vmul.f32 %v552_v24, %v173_v23 }
  0x15   : > { %v220_v36 = vmul.f32 %v535_v13, %v172_v18  ;;  %v263_v37 = vrot.slane %v255_v25, 1  ;;  %v303_v38 = vmul.f32 %v555_v26, %v173_v23  ;;  %v204_v39 = vrot.slane %v196_v32, 1 }
  0x16   : > { %v211_v33 = vadd.f32 %v203_v27, %v183_v19  ;;  %v256_v40 = vmul.f32 %v538_v15, %v173_v23  ;;  %v287_v43 = vrot.slane %v279_v29, 2  ;;  %v323_v44 = vrot.slane %v315_v30, 1 }
  0x17   : > { %v228_v45 = vrot.slane %v220_v36, 2  ;;  %v212_v46 = vadd.f32 %v204_v39, %v184_v31  ;;  %v244_v47 = vmul.f32 %v546_v22, %v173_v23  ;;  %v280_v48 = vmul.f32 %v540_v16, %v173_v23 }
  0x18   : > { %v235_v42 = vadd.f32 %v227_v28, %v211_v33  ;;  %v316_v49 = vmul.f32 %v542_v17, %v174_v41  ;;  %v347_v51 = vrot.slane %v339_v35, 2  ;;  %v185_v52 = vmul.f32 %v182_v11, %v173_v23 }
  0x19   : > { %v197_v53 = vmul.f32 %v194_v12, %v173_v23  ;;  %v236_v54 = vadd.f32 %v228_v45, %v212_v46  ;;  %v264_v55 = vrot.slane %v256_v40, 1  ;;  %v340_v56 = vmul.f32 %v552_v24, %v174_v41 }
  0x1a   : > { %v247_v50 = vadd.f32 %v243_v34, %v235_v42  ;;  %v221_v57 = vmul.f32 %v535_v13, %v173_v23  ;;  %v304_v59 = vmul.f32 %v555_v26, %v174_v41  ;;  %v257_v61 = vmul.f32 %v538_v15, %v174_v41 }
  0x1b   : > { %v205_v60 = vrot.slane %v197_v53, 1  ;;  %v248_v62 = vadd.f32 %v244_v47, %v236_v54  ;;  %v288_v63 = vrot.slane %v280_v48, 2  ;;  %v324_v0 = vrot.slane %v316_v49, 1 }
  0x1c   : > { %v271_v58 = vadd.f32 %v263_v37, %v247_v50  ;;  %v229_v1 = vrot.slane %v221_v57, 2  ;;  %v245_v5 = vmul.f32 %v546_v22, %v174_v41  ;;  %v281_v6 = vmul.f32 %v540_v16, %v174_v41  ;;  %v176_v37 = vld [vmem:[%s533_s19 + $0x28] sm:$0x3f] }
  0x1d   : > { %v213_v4 = vadd.f32 %v205_v60, %v185_v52  ;;  %v272_v7 = vadd.f32 %v264_v55, %v248_v62  ;;  %v348_v8 = vrot.slane %v340_v56, 2  ;;  %v186_v9 = vmul.f32 %v182_v11, %v174_v41  ;;  %v463_v11 = vld [vmem:[%s602_s2] ss:$0 sm:$0xff] }
  0x1e   : > { %v295_v3 = vadd.f32 %v287_v43, %v271_v58  ;;  %v198_v10 = vmul.f32 %v194_v12, %v174_v41  ;;  %v265_v19 = vrot.slane %v257_v61, 1  ;;  %v222_v20 = vmul.f32 %v535_v13, %v174_v41 }
  0x1f   : > { %v237_v18 = vadd.f32 %v229_v1, %v213_v4  ;;  %v296_v21 = vadd.f32 %v288_v63, %v272_v7  ;;  %v317_v23 = vmul.f32 %v542_v17, %v175_v2  ;;  %v258_v27 = vmul.f32 %v538_v15, %v175_v2 }
  0x20   : > { %v307_v14 = vadd.f32 %v303_v38, %v295_v3  ;;  %v206_v25 = vrot.slane %v198_v10, 1  ;;  %v289_v30 = vrot.slane %v281_v6, 2  ;;  %v230_v31 = vrot.slane %v222_v20, 2 }
  0x21   : > { %v249_v29 = vadd.f32 %v245_v5, %v237_v18  ;;  %v308_v12 = vadd.f32 %v304_v59, %v296_v21  ;;  %v246_v33 = vmul.f32 %v546_v22, %v175_v2  ;;  %v282_v13 = vmul.f32 %v540_v16, %v175_v2 }
  0x22   : > { %v331_v28 = vadd.f32 %v323_v44, %v307_v14  ;;  %v214_v32 = vadd.f32 %v206_v25, %v186_v9  ;;  %v305_v36 = vmul.f32 %v555_v26, %v175_v2  ;;  %v341_v15 = vmul.f32 %v552_v24, %v175_v2 }
  0x23   : > { %v273_v35 = vadd.f32 %v265_v19, %v249_v29  ;;  %v332_v38 = vadd.f32 %v324_v0, %v308_v12  ;;  %v266_v40 = vrot.slane %v258_v27, 1  ;;  %v325_v43 = vrot.slane %v317_v23, 1 }
  0x24   : > { %v355_v34 = vadd.f32 %v347_v51, %v331_v28  ;;  %v238_v39 = vadd.f32 %v230_v31, %v214_v32  ;;  %v290_v46 = vrot.slane %v282_v13, 2  ;;  %v318_v22 = vmul.f32 %v542_v17, %v176_v37 }
  0x25   : > { %v297_v42 = vadd.f32 %v289_v30, %v273_v35  ;;  %v356_v44 = vadd.f32 %v348_v8, %v332_v38  ;;  %v349_v48 = vrot.slane %v341_v15, 2  ;;  %v306_v51 = vmul.f32 %v555_v26, %v176_v37 }
  0x26   : > { %v366_v41 = vadd.f32 %v463_v11, %v355_v34  ;;  %v250_v45 = vadd.f32 %v246_v33, %v238_v39  ;;  %v342_v52 = vmul.f32 %v552_v24, %v176_v37  ;;  %v326_v57 = vrot.slane %v318_v22, 1 }
  0x27   : > { %v309_v16 = vadd.f32 %v305_v36, %v297_v42  ;;  %v367_v49 = vadd.f32 %v463_v11, %v356_v44 }
  0x28   : > { %v370_v47 = vmul.f32 0.999995, %v366_v41  ;;  %v274_v50 = vadd.f32 %v266_v40, %v250_v45  ;;  %v350_v17 = vrot.slane %v342_v52, 2 }
  0x29   : > { %v333_v54 = vadd.f32 %v325_v43, %v309_v16  ;;  %v371_v55 = vmul.f32 0.999995, %v367_v49 }
  0x2a   : > { %v378_v53 = vmul.f32 1.442695, %v370_v47  ;;  %v298_v56 = vadd.f32 %v290_v46, %v274_v50  ;;  %vm374_vm0 = vcmp.gt.f32.partialorder %v370_v47, 0.0 }
  0x2b   : > { %v357_v58 = vadd.f32 %v349_v48, %v333_v54  ;;  %v380_v59 = vmul.f32 1.442695, %v371_v55  ;;  %vm375_vm2 = vcmp.gt.f32.partialorder %v371_v55, 0.0 }
  0x2c   : > { %480 = vpow2.f32 %v378_v53  ;;  %v310_v60 = vadd.f32 %v306_v51, %v298_v56 }
  0x2d   : > { %v368_v61 = vadd.f32 %v463_v11, %v357_v58  ;;  %482 = vpow2.f32 %v380_v59 }
  0x2e   : > { %v334_v62 = vadd.f32 %v326_v57, %v310_v60 }
  0x2f   : > { %v372_v63 = vmul.f32 0.999995, %v368_v61 }
  0x30   : > { %v358_v0 = vadd.f32 %v350_v17, %v334_v62 }
  0x31   : > { %v382_v1 = vmul.f32 1.442695, %v372_v63  ;;  %vm376_vm3 = vcmp.gt.f32.partialorder %v372_v63, 0.0 }
  0x32   : > { %v369_v26 = vadd.f32 %v463_v11, %v358_v0 }
  0x33   : > { %484 = vpow2.f32 %v382_v1 }
  0x34   : > { %v373_v24 = vmul.f32 0.999995, %v369_v26 }
  0x36   : > { %v481_v2 = vpop.eup %480  ;;  %v384_v4 = vmul.f32 1.442695, %v373_v24  ;;  %vm377_vm4 = vcmp.gt.f32.partialorder %v373_v24, 0.0 }
  0x37   : > { %v464_v3 = vadd.f32 -1.0, %v481_v2  ;;  %v483_v5 = vpop.eup %482 }
  0x38   : > { %486 = vpow2.f32 %v384_v4  ;;  %v465_v7 = vadd.f32 -1.0, %v483_v5 }
  0x39   : > { %v390_v6 = vsel %vm374_vm0, %v370_v47, %v464_v3 }
  0x3a   : > { %395 = vst.msk [vmem:[%s170_s27] sm:$0xf] %vm394_vm1, %v390_v6  ;;  %v391_v8 = vsel %vm375_vm2, %v371_v55, %v465_v7 }
  0x3b   : > { %396 = vst.msk [vmem:[%s170_s27 + $0x4] sm:$0xf] %vm394_vm1, %v391_v8 }
  0x3d   : > { %v485_v9 = vpop.eup %484 }
  0x3e   : > { %v466_v10 = vadd.f32 -1.0, %v485_v9 }
  0x40   : > { %v392_v14 = vsel %vm376_vm3, %v372_v63, %v466_v10 }
  0x41   : > { %397 = vst.msk [vmem:[%s170_s27 + $0x8] sm:$0xf] %vm394_vm1, %v392_v14 }
  0x42   : > { %v487_v18 = vpop.eup %486 }
  0x43   : > { %v467_v19 = vadd.f32 -1.0, %v487_v18 }
  0x45   : > { %v393_v20 = vsel %vm377_vm4, %v373_v24, %v467_v19 }
  0x46   : > { %398 = vst.msk [vmem:[%s170_s27 + $0xc] sm:$0xf] %vm394_vm1, %v393_v20 }
  0x47 PF: > { %s13_s12 = sadd.s32 1, %s494_s12  }
  0x48   : > { %p10_p4 = scmp.ge.s32.totalorder %s13_s12, 4  }
  0x4a   :  { %12 = sbr.rel (!%p10_p4) target bundleno = 1 (0x1), region = 62 }

// kernel: forward.15
= control target key start
LH: loop header
LB: loop body
LE: loop exit
PB: predicated region body
PF: predicated region fallthrough
CT: control target
= control target key end

     0   :  { %10 = vsyncpa [#allocation3], 0  ;;  %s742_s0 = inlined_call_operand.vmem [shape: f32[2,16,32], index: 0, kind: input, shape index: {}]   ;;  %s743_s1 = inlined_call_operand.vmem [shape: f32[16,32], index: 1, kind: input, shape index: {}]   ;;  %s744_s2 = inlined_call_operand.vmem [shape: f32[16,32], index: 2, kind: input, shape index: {}]   ;;  %s745_s3 = inlined_call_operand.vmem [shape: f32[32,10], index: 3, kind: input, shape index: {}]   ;;  %s746_s4 = inlined_call_operand.vmem [shape: f32[1,10], index: 4, kind: input, shape index: {}]   ;;  %s747_s5 = inlined_call_operand.hbm [shape: f32[2,1,10], index: 5, kind: output, shape index: {}]  }
   0x1   :  { %12 = vsyncpa [#allocation3 + $0x1], 0  ;;  %s608_s18 = smov 0   ;;  %s610_s19 = smov 0  }
   0x2   :  { %s612_s20 = smov 0   ;;  %s614_s21 = smov 0  }
   0x3 LB: > { %s629_s22 = sadd.s32 4294967295, %s572_s21   ;;  %s433_s23 = sadd.s32 4294967294, %s572_s21   ;;  %s572_s21 = sphi %s614_s21, %s753_s21   ;;  %s568_s20 = sphi %s612_s20, %s752_s20   ;;  %s564_s19 = sphi %s610_s19, %s751_s19   ;;  %s560_s18 = sphi %s608_s18, %s750_s18  }
   0x4   : > { %s633_s24 = sadd.s32 1, %s572_s21   ;;  %s135_s25 = sadd.s32 1, %s568_s20 }
   0x5   : > { %s132_s26 = ssub.s32 %s572_s21, %s633_s24  ;;  %p145_p0 = scmp.ne.s32.totalorder %s568_s20, %s564_s19 }
   0x6   : > { %p133_p1 = scmp.eq.s32.totalorder %s132_s26, 0  ;;  %p146_p2 = scmp.eq.s32.totalorder %s629_s22, 1 }
   0x7   : > { %p151_p3 = scmp.ne.s32.totalorder %s564_s19, %s560_s18  ;;  %p152_p4 = scmp.eq.s32.totalorder %s433_s23, 1 }
   0x8   : > { %s644_s27 = scalar_select %p133_p1, %s568_s20, %s135_s25  }
   0x9   : > { %p646_p5 = por %p146_p2, %p145_p0  ;;  %p650_p6 = por %p152_p4, %p151_p3 }
   0xa   : > { %p436_p7 = scmp.ge.s32.totalorder %s572_s21, 1  ;;  %p190_p8 = scmp.lt.s32.totalorder %s572_s21, 3 }
   0xc   : > { %p191_p9 = pnand %p436_p7, %p190_p8 }
   0xd   : > { %p217_p10 = scmp.lt.s32.totalorder (!%p191_p9), %s629_s22, 1  ;;  %vm224_vm0 = vcmask (!%p191_p9), 261120   ;;  %v285_v22 = vld [vmem:[%s745_s3] sm:$0xff] (!%p191_p9)  ;;  %v286_v23 = vld [vmem:[%s745_s3 + $0x8] sm:$0xff] (!%p191_p9)  ;;  %v287_v24 = vld [vmem:[%s745_s3 + $0x10] sm:$0xff] (!%p191_p9)  ;;  %v574_v25 = vmov (!%p191_p9), 0.0|0.0  }
   0xe   : > { %194 = sbr.rel (%p191_p9) target bundleno = 624 (0x270), region = 40  ;;  %460 = vmatprep.subr.bf16.mxu0 (!%p191_p9), %v574_v25  ;;  %v461_v26 = vpack.c.bf16 (!%p191_p9), %v286_v23, %v285_v22  ;;  %v288_v27 = vld [vmem:[%s745_s3 + $0x18] sm:$0xff] (!%p191_p9)  ;;  %vm575_vm1 = vmmov (!%p191_p9), 0   ;;  %v576_v28 = vmov (!%p191_p9), 0.0   ;;  %v267_v44 = vld [vmem:[%s743_s1] sm:$0xff] (!%p191_p9)  ;;  %v268_v45 = vld [vmem:[%s743_s1 + $0x8] sm:$0xff] (!%p191_p9) }
   0xf   : > { %457 = vmatprep.mubr.msk.f32.mxu0 (!%p191_p9), %vm575_vm1, %v576_v28  ;;  %v464_v29 = vpack.c.bf16 (!%p191_p9), %v288_v27, %v287_v24  ;;  %v271_v48 = vld [vmem:[%s744_s2] sm:$0xff] (!%p191_p9)  ;;  %v272_v49 = vld [vmem:[%s744_s2 + $0x8] sm:$0xff] (!%p191_p9)  ;;  %s215_s10 = sand.u32 (!%p191_p9), 1, %s564_s19   ;;  %s440_s13 = sshll.u32 (!%p191_p9), %s629_s22, 4  ;;  %vm363_vm2 = vcmask (!%p191_p9), 73728  }
  0x10   : > { %462 = vmatpush3.bf16.msra.mxu0 (!%p191_p9), %v461_v26  ;;  %s216_s14 = scalar_lea.vmem (!%p191_p9), [#allocation2], %s215_s10  ;;  %s700_s23 = scalar_lea.hbm (!%p191_p9), %s747_s5, %s440_s13 }
  0x11   : > { %463 = vmatprep.subr.bf16.mxu0 (!%p191_p9), %v574_v25  ;;  %s378_s15 = sshll.u32 (!%p191_p9), %s216_s14, 4  ;;  %s366_s25 = scalar_lea.sflag (!%p191_p9), [#allocation3], %s215_s10  ;;  %s702_s15 = int_to_ptr.vmem [resolvable:$true] %s378_s15 }
  0x12   : > { %s510_s26 = scalar_lea.vmem (!%p191_p9), %s702_s15, 16 }
  0x13   : > { %p511_p11 = scmp.ne.s32.totalorder (!%p191_p9), %s702_s15, %s510_s26 }
  0x14   : > { %465 = vmatpush3.bf16.msra.mxu0 (!%p191_p9), %v464_v29 }
  0x15   : > { %s218_s30 = scalar_select %p217_p10, %s629_s22, 1 }
  0x16   : > { %p512_p12 = pnand %p511_p11, %p646_p5  ;;  %s577_s22 = smov [#allocation2]  }
  0x17   : > { %s443_s6 = sshll.u32 %s218_s30, 4  ;;  %s514_s30 = sshll.u32 %s577_s22, 4  ;;  %s515_s30 = int_to_ptr.vmem [resolvable:$false] %s514_s30 }
  0x18   : > { %s221_s9 = scalar_lea.vmem %s742_s0, %s443_s6  ;;  %p513_p13 = pneg %p512_p12 }
  0x19   : > { %v222_v0 = vld [vmem:[%s221_s9] sm:$0xff]  ;;  %v223_v1 = vld [vmem:[%s221_s9 + $0x8] sm:$0xff]  ;;  %s516_s6 = scalar_lea.vmem %s515_s30, 32  ;;  %p517_p0 = scmp.lt.s32.totalorder %s702_s15, %s515_s30 }
  0x1a   : > { %v225_v2 = vsel %vm224_vm0, %v222_v0, 0.0  ;;  %v228_v3 = vsel %vm224_vm0, %v223_v1, 0.0  ;;  %p518_p1 = scmp.lt.s32.totalorder %s516_s6, %s510_s26 }
  0x1b   : > { %226 = vadd.xlane.f32.xlu0 %v225_v2 }
  0x1c   : > { %p519_p2 = por %p518_p1, %p517_p0 }
  0x1e   : > { %p520_p3 = pnand %p519_p2, %p513_p13 }
  0x1f   : > { %229 = vadd.xlane.f32.xlu0 %v228_v3 }
  0xa8   : > { %v227_v4 = vpop.xlane.xlu0 %226 }
  0xa9   : > { %v232_v6 = vmul.f32 0.03125, %v227_v4 }
  0xac   : > { %v230_v5 = vpop.xlane.xlu0 %229 }
  0xad   : > { %v233_v7 = vmul.f32 0.03125, %v230_v5 }
  0xaf   : > { %v234_v8 = vadd.f32 %v233_v7, %v232_v6 }
  0xb1   : > { %v235_v9 = vrot.slane %v234_v8, 4 }
  0xb3   : > { %v236_v10 = vadd.f32 %v235_v9, %v234_v8 }
  0xb5   : > { %v237_v11 = vrot.slane %v236_v10, 2 }
  0xb7   : > { %v238_v12 = vadd.f32 %v237_v11, %v236_v10 }
  0xb9   : > { %v239_v13 = vrot.slane %v238_v12, 1 }
  0xbb   : > { %v240_v14 = vadd.f32 %v239_v13, %v238_v12 }
  0xbd   : > { %v242_v15 = vmul.f32 0.0625, %v240_v14 }
  0xbf   : > { %v243_v16 = vsub.f32 %v222_v0, %v242_v15  ;;  %v244_v17 = vsub.f32 %v223_v1, %v242_v15  ;;  %v289_v0 = vld [vmem:[%s746_s4] sm:$0x1] }
  0xc1   : > { %v245_v18 = vmul.f32 %v243_v16, %v243_v16  ;;  %v246_v20 = vmul.f32 %v244_v17, %v244_v17 }
  0xc3   : > { %v247_v19 = vsel %vm224_vm0, %v245_v18, 0.0  ;;  %v250_v21 = vsel %vm224_vm0, %v246_v20, 0.0 }
  0xc4   : > { %248 = vadd.xlane.f32.xlu1 %v247_v19 }
  0xc8   : > { %251 = vadd.xlane.f32.xlu1 %v250_v21 }
 0x151   : > { %v249_v30 = vpop.xlane.xlu1 %248 }
 0x152   : > { %v253_v32 = vmul.f32 0.03125, %v249_v30 }
 0x155   : > { %v252_v31 = vpop.xlane.xlu1 %251 }
 0x156   : > { %v254_v33 = vmul.f32 0.03125, %v252_v31 }
 0x158   : > { %v255_v34 = vadd.f32 %v254_v33, %v253_v32 }
 0x15a   : > { %v256_v35 = vrot.slane %v255_v34, 4 }
 0x15c   : > { %v257_v36 = vadd.f32 %v256_v35, %v255_v34 }
 0x15e   : > { %v258_v37 = vrot.slane %v257_v36, 2 }
 0x160   : > { %v259_v38 = vadd.f32 %v258_v37, %v257_v36 }
 0x162   : > { %v260_v39 = vrot.slane %v259_v38, 1 }
 0x164   : > { %v261_v40 = vadd.f32 %v260_v39, %v259_v38 }
 0x166   : > { %v262_v41 = vmul.f32 0.0625, %v261_v40 }
 0x168   : > { %v263_v42 = vadd.f32 1e-06, %v262_v41 }
 0x16a   : > { %508 = vrsqrt.f32 %v263_v42 }
 0x174   : > { %v509_v43 = vpop.eup %508 }
 0x175   : > { %v265_v46 = vmul.f32 %v509_v43, %v243_v16  ;;  %v266_v47 = vmul.f32 %v509_v43, %v244_v17 }
 0x177   : > { %v269_v50 = vmul.f32 %v267_v44, %v265_v46  ;;  %v270_v51 = vmul.f32 %v268_v45, %v266_v47 }
 0x179   : > { %v273_v52 = vadd.f32 %v271_v48, %v269_v50  ;;  %v274_v53 = vadd.f32 %v272_v49, %v270_v51 }
 0x17b   : > { %v275_v54 = vsel %vm224_vm0, %v273_v52, 0.0  ;;  %v276_v55 = vsel %vm224_vm0, %v274_v53, 0.0 }
 0x17c   : > { %v277_v56 = vadd.f32 %v276_v55, %v275_v54 }
 0x17e   : > { %v278_v57 = vrot.slane %v277_v56, 4 }
 0x180   : > { %v279_v58 = vadd.f32 %v278_v57, %v277_v56 }
 0x182   : > { %v280_v59 = vrot.slane %v279_v58, 2 }
 0x184   : > { %v281_v60 = vadd.f32 %v280_v59, %v279_v58 }
 0x186   : > { %v282_v61 = vrot.slane %v281_v60, 1 }
 0x188   : > { %v283_v62 = vadd.f32 %v282_v61, %v281_v60 }
 0x18a   : > { %v284_v63 = vmul.f32 0.0625, %v283_v62 }
 0x18c   : > { %458 = vmatmul.mubr.msk.f32.vlgmr.msra.gmra.mrb[0].mxu0 %vm224_vm0, %v284_v63 }
 0x25f   : > { %v359_v1 = vpop.f32.mrb[0].mxu0 }
 0x260   : > { %v360_v2 = vadd.f32 %v359_v1, %v289_v0  ;;  %v459_v3 = vpop.f32.mrb[1].mxu0 }
 0x262   : > { %364 = vst.msk [vmem:[%s216_s14] sm:$0x1] %vm363_vm2, %v360_v2 }
 0x263   : > { %523 = shalt.err (!%p520_p3)
}
 0x264   : > { %s524_s7 = scalar_lea.hbm %s700_s23, 16  ;;  %s528_s10 = scalar_lea.hbm %s747_s5, 32 }
 0x265   : > { %p525_p4 = scmp.ne.s32.totalorder %s700_s23, %s524_s7  ;;  %p529_p9 = scmp.lt.u32.totalorder %s700_s23, %s747_s5 }
 0x266   : > { %p530_p10 = scmp.lt.u32.totalorder %s528_s10, %s524_s7  ;;  %p532_p12 = scmp.lt.u32.totalorder %s524_s7, %s700_s23 }
 0x267   : > { %p526_p7 = pnand %p525_p4, %p646_p5 }
 0x268   : > { %p531_p11 = por %p530_p10, %p529_p9 }
 0x269   : > { %p527_p8 = pneg %p526_p7 }
 0x26a   : > { %p533_p13 = por %p532_p12, %p531_p11 }
 0x26c   : > { %p534_p0 = pnand %p533_p13, %p527_p8 }
 0x26e   : > { %537 = shalt.err (!%p534_p0)
}
 0x26f   : > { %466 = dma.vmem_to_hbm [thread:$0]  (%p646_p5), %s702_s15, 16, %s700_s23, %s366_s25  }
 0x270 PF: > { %p472_p1 = scmp.ge.s32.totalorder %s572_s21, 2  ;;  %s390_s13 = sand.u32 1, %s560_s18  }
 0x271   : > { %s391_s14 = scalar_lea.sflag [#allocation3], %s390_s13 }
 0x272   : > { %p469_p2 = pnand %p472_p1, %p650_p6 }
 0x274   : > { %555 = dma.done.wait (!%p469_p2), %s391_s14, 16  }
 0x275   : > { %557 = vsyncadd (!%p469_p2), %s391_s14, 4294967280  ;;  %p15_p3 = scmp.ge.s32.totalorder %s633_s24, 4   ;;  %s750_s18 = smov %s564_s19 }
 0x276   : > { %s751_s19 = smov %s568_s20  ;;  %s752_s20 = smov %s644_s27 }
 0x277   : > { %s753_s21 = smov %s633_s24  ;;  %17 = sbr.rel (!%p15_p3) target bundleno = 3 (0x3), region = 75 }
 0x27e   :  { %395 = vsyncpa [#allocation3], 1 }
 0x27f   :  { %397 = vsyncpa [#allocation3 + $0x1], 1 }

// kernel: forward.13
= control target key start
LH: loop header
LB: loop body
LE: loop exit
PB: predicated region body
PF: predicated region fallthrough
CT: control target
= control target key end

     0   :  { %s1523_s17 = smov 0   ;;  %s1692_s0 = inlined_call_operand.vmem [shape: f32[2,16,32], index: 0, kind: input, shape index: {}]   ;;  %s1693_s1 = inlined_call_operand.vmem [shape: f32[1,32], index: 1, kind: input, shape index: {}]   ;;  %s1694_s2 = inlined_call_operand.vmem [shape: f32[1,32], index: 2, kind: input, shape index: {}]   ;;  %s1695_s3 = inlined_call_operand.vmem [shape: bf16[32,32], index: 3, kind: input, shape index: {}]   ;;  %s1696_s4 = inlined_call_operand.vmem [shape: bf16[4,32,32], index: 4, kind: input, shape index: {}]   ;;  %s1697_s5 = inlined_call_operand.vmem [shape: f32[1,32], index: 5, kind: input, shape index: {}]   ;;  %s1698_s6 = inlined_call_operand.vmem [shape: f32[1,32], index: 6, kind: input, shape index: {}]   ;;  %s1699_s7 = inlined_call_operand.vmem [shape: f32[1,32], index: 7, kind: input, shape index: {}]   ;;  %s1700_s8 = inlined_call_operand.vmem [shape: bf16[32,64], index: 8, kind: input, shape index: {}]   ;;  %s1701_s9 = inlined_call_operand.vmem [shape: bf16[32,32], index: 9, kind: input, shape index: {}]   ;;  %s1702_s10 = inlined_call_operand.vmem [shape: f32[1,32], index: 10, kind: input, shape index: {}]   ;;  %s1703_s11 = inlined_call_operand.vmem [shape: f32[2,16,32], index: 11, kind: output, shape index: {}]  }
   0x1 LB: > { %s1229_s18 = sadd.s32 4294967295, %s1455_s17   ;;  %p1233_p0 = scmp.ge.s32.totalorder %s1455_s17, 1  ;;  %s1455_s17 = sphi %s1523_s17, %s21_s17  }
   0x2   : > { %p337_p1 = scmp.lt.s32.totalorder %s1455_s17, 3 }
   0x4   : > { %p338_p2 = pnand %p1233_p0, %p337_p1 }
   0x5   : > { %p377_p3 = scmp.lt.s32.totalorder (!%p338_p2), %s1229_s18, 1  ;;  %vm392_vm0 = vcmask (!%p338_p2), 261120   ;;  %v1413_v14 = vld [vmem:[%s1695_s3] sm:$0xff] (!%p338_p2)   ;;  %v1457_v15 = vmov (!%p338_p2), 0.0   ;;  %v1414_v16 = vld [vmem:[%s1696_s4 + $0x10] sm:$0xff] (!%p338_p2)   ;;  %v1415_v17 = vld [vmem:[%s1695_s3 + $0x8] sm:$0xff] (!%p338_p2)  }
   0x6   : > { %341 = sbr.rel (%p338_p2) target bundleno = 2307 (0x903), region = 64  ;;  %1314 = vmatprep.subr.bf16.mxu0 (!%p338_p2), %v1457_v15  ;;  %1322 = vmatprep.subr.bf16.mxu1 (!%p338_p2), %v1457_v15  ;;  %vm1458_vm1 = vmmov (!%p338_p2), 0   ;;  %v1416_v18 = vld [vmem:[%s1696_s4 + $0x18] sm:$0xff] (!%p338_p2)   ;;  %v1238_v27 = vld [vmem:[%s1693_s1] ss:$0 sm:$0xff] (!%p338_p2)  ;;  %v1419_v39 = vld [vmem:[%s1696_s4 + $0x8] sm:$0xff] (!%p338_p2)  }
   0x7   : > { %1315 = vmatpush3.bf16.msra.mxu0 (!%p338_p2), %v1413_v14  ;;  %1323 = vmatpush3.bf16.msra.mxu1 (!%p338_p2), %v1414_v16  ;;  %v1239_v31 = vld [vmem:[%s1694_s2] ss:$0 sm:$0xff] (!%p338_p2)  ;;  %v1420_v40 = vld [vmem:[%s1696_s4 + $0x28] sm:$0xff] (!%p338_p2)   ;;  %v1421_v41 = vld [vmem:[%s1696_s4 + $0x30] sm:$0xff] (!%p338_p2)   ;;  %vm750_vm2 = vcmask (!%p338_p2), 257024   ;;  %s1459_s14 = smov (!%p338_p2), 112  }
   0x8   : > { %1316 = vmatprep.subr.bf16.mxu0 (!%p338_p2), %v1457_v15  ;;  %1318 = vmatprep.mubr.msk.bf16.mxu0 (!%p338_p2), %vm1458_vm1, %v1457_v15  ;;  %v1417_v35 = vld [vmem:[%s1696_s4] sm:$0xff] (!%p338_p2)   ;;  %v1422_v43 = vld [vmem:[%s1696_s4 + $0x38] sm:$0xff] (!%p338_p2)   ;;  %vm839_vm3 = vcmask (!%p338_p2), 130048   ;;  %vm889_vm4 = vcmask (!%p338_p2), 31744   ;;  %s1460_s26 = smov (!%p338_p2), 80   ;;  %s1461_s27 = smov (!%p338_p2), 96  }
   0x9   : > { %1324 = vmatprep.subr.bf16.mxu1 (!%p338_p2), %v1457_v15  ;;  %1326 = vmatprep.mubr.msk.bf16.mxu1 (!%p338_p2), %vm1458_vm1, %v1457_v15  ;;  %v1418_v37 = vld [vmem:[%s1696_s4 + $0x20] sm:$0xff] (!%p338_p2)   ;;  %vm919_vm5 = vcmask (!%p338_p2), 1041408   ;;  %s1462_s13 = smov (!%p338_p2), 16  }
   0xa   : > { %v1423_v16 = vld [vmem:[%s1700_s8] sm:$0xff] (!%p338_p2)  }
   0xb   : > { %1317 = vmatpush3.bf16.msra.mxu0 (!%p338_p2), %v1415_v17  ;;  %1325 = vmatpush3.bf16.msra.mxu1 (!%p338_p2), %v1416_v18  ;;  %v1424_v17 = vld [vmem:[%s1700_s8 + $0x8] sm:$0xff] (!%p338_p2)  }
   0xc   : > { %1330 = vmatprep.subr.bf16.mxu0 (!%p338_p2), %v1457_v15  ;;  %1338 = vmatprep.subr.bf16.mxu1 (!%p338_p2), %v1457_v15 }
   0xd   : > { %s1705_s18 = smov (!%p377_p3, %s1229_s18), 1 }
   0xe   : > { %s1283_s19 = sshll.u32 %s1705_s18, 4 }
   0xf   : > { %s381_s22 = scalar_lea.vmem %s1692_s0, %s1283_s19  ;;  %s386_s21 = scalar_lea.vmem %s1703_s11, %s1283_s19 }
  0x10   : > { %v1539_v0 = vld [vmem:[%s381_s22] sm:$0xff]  ;;  %v1541_v1 = vld [vmem:[%s381_s22 + $0x8] sm:$0xff] }
  0x11   : > { %v393_v2 = vsel %vm392_vm0, %v1539_v0, 0.0  ;;  %v396_v3 = vsel %vm392_vm0, %v1541_v1, 0.0 }
  0x12   : > { %394 = vadd.xlane.f32.xlu0 %v393_v2 }
  0x16   : > { %397 = vadd.xlane.f32.xlu0 %v396_v3  ;;  %v1267_v3 = vld [vmem:[%s1697_s5] ss:$0 sm:$0xff] }
  0x9f   : > { %v395_v4 = vpop.xlane.xlu0 %394 }
  0xa0   : > { %v400_v5 = vmul.f32 0.03125, %v395_v4 }
  0xa2   : > { %v402_v6 = vsub.f32 %v1539_v0, %v400_v5 }
  0xa3   : > { %v398_v7 = vpop.xlane.xlu0 %397 }
  0xa4   : > { %v401_v8 = vmul.f32 0.03125, %v398_v7  ;;  %v404_v9 = vmul.f32 %v402_v6, %v402_v6 }
  0xa6   : > { %v403_v10 = vsub.f32 %v1541_v1, %v401_v8  ;;  %v406_v11 = vsel %vm392_vm0, %v404_v9, 0.0 }
  0xa7   : > { %407 = vadd.xlane.f32.xlu1 %v406_v11 }
  0xa8   : > { %v405_v12 = vmul.f32 %v403_v10, %v403_v10 }
  0xaa   : > { %v409_v13 = vsel %vm392_vm0, %v405_v12, 0.0 }
  0xab   : > { %410 = vadd.xlane.f32.xlu1 %v409_v13 }
 0x134   : > { %v408_v19 = vpop.xlane.xlu1 %407 }
 0x135   : > { %v412_v20 = vmul.f32 0.03125, %v408_v19 }
 0x137   : > { %v414_v21 = vadd.f32 1e-06, %v412_v20 }
 0x138   : > { %v411_v22 = vpop.xlane.xlu1 %410 }
 0x139   : > { %1427 = vrsqrt.f32 %v414_v21  ;;  %v413_v23 = vmul.f32 0.03125, %v411_v22  ;;  %v1268_v22 = vld [vmem:[%s1698_s6] ss:$0 sm:$0xff] }
 0x13b   : > { %v415_v24 = vadd.f32 1e-06, %v413_v23 }
 0x13d   : > { %1429 = vrsqrt.f32 %v415_v24  ;;  %v1269_v24 = vld [vmem:[%s1699_s7] ss:$0 sm:$0xff] }
 0x143   : > { %v1428_v25 = vpop.eup %1427 }
 0x144   : > { %v418_v26 = vmul.f32 %v1428_v25, %v402_v6 }
 0x146   : > { %v426_v29 = vmul.f32 %v1238_v27, %v418_v26 }
 0x147   : > { %v1430_v28 = vpop.eup %1429 }
 0x148   : > { %v419_v30 = vmul.f32 %v1430_v28, %v403_v10  ;;  %v434_v33 = vadd.f32 %v1239_v31, %v426_v29 }
 0x14a   : > { %v427_v32 = vmul.f32 %v1238_v27, %v419_v30 }
 0x14c   : > { %v435_v34 = vadd.f32 %v1239_v31, %v427_v32 }
 0x14e   : > { %v436_v36 = vpack.c.bf16 %v435_v34, %v434_v33 }
 0x150   : > { %1319 = vmatmul.mubr.msk.bf16.vlgmr.msra.gmra.mrb[0].mxu0 %vm392_vm0, %v436_v36  ;;  %v508_v38 = vrot.slane %v436_v36, 2  ;;  %v621_v42 = vrot.slane %v436_v36, 4  ;;  %v683_v44 = vrot.slane %v436_v36, 6 }
 0x151   : > { %1331 = vmatpush3.bf16.msra.mxu0 %v1417_v35  ;;  %1334 = vmatprep.mubr.msk.bf16.mxu0 %vm1458_vm1, %v1457_v15 }
 0x152   : > { %1327 = vmatmul.mubr.msk.bf16.vlgmr.msra.gmra.mrb[0].mxu1 %vm392_vm0, %v508_v38  ;;  %1332 = vmatprep.subr.bf16.mxu0 %v1457_v15 }
 0x153   : > { %1339 = vmatpush3.bf16.msra.mxu1 %v1418_v37  ;;  %1342 = vmatprep.mubr.msk.bf16.mxu1 %vm1458_vm1, %v1457_v15 }
 0x154   : > { %1340 = vmatprep.subr.bf16.mxu1 %v1457_v15 }
 0x155   : > { %1333 = vmatpush3.bf16.msra.mxu0 %v1419_v39 }
 0x156   : > { %1346 = vmatprep.subr.bf16.mxu0 %v1457_v15 }
 0x157   : > { %1341 = vmatpush3.bf16.msra.mxu1 %v1420_v40 }
 0x158   : > { %1335 = vmatmul.mubr.msk.bf16.vlgmr.msra.gmra.mrb[4].mxu0 %vm392_vm0, %v436_v36  ;;  %1354 = vmatprep.subr.bf16.mxu1 %v1457_v15 }
 0x159   : > { %1347 = vmatpush3.bf16.msra.mxu0 %v1421_v41  ;;  %1350 = vmatprep.mubr.msk.bf16.mxu0 %vm1458_vm1, %v1457_v15 }
 0x15a   : > { %1343 = vmatmul.mubr.msk.bf16.vlgmr.msra.gmra.mrb[4].mxu1 %vm392_vm0, %v621_v42  ;;  %1348 = vmatprep.subr.bf16.mxu0 %v1457_v15 }
 0x15b   : > { %1358 = vmatprep.mubr.msk.bf16.mxu1 %vm1458_vm1, %v1457_v15  ;;  %1355 = vmatpush3.bf16.msra.mxu1 %v1423_v16 }
 0x15c   : > { %1356 = vmatprep.subr.bf16.mxu1 %v1457_v15 }
 0x15d   : > { %1349 = vmatpush3.bf16.msra.mxu0 %v1422_v43 }
 0x15e   : > { %1362 = vmatprep.subr.bf16.mxu0 %v1457_v15 }
 0x15f   : > { %1357 = vmatpush3.bf16.msra.mxu1 %v1424_v17 }
 0x160   : > { %1351 = vmatmul.mubr.msk.bf16.vlgmr.msra.gmra.mrb[8].mxu0 %vm392_vm0, %v683_v44  ;;  %1368 = vmatprep.subr.bf16.mxu1 %v1457_v15 }
 0x161   : > { %1364 = vmatprep.mubr.msk.bf16.mxu0 %vm1458_vm1, %v1457_v15 }
 0x223   : > { %v490_v45 = vpop.f32.mrb[0].mxu0 }
 0x224   : > { %v1320_v46 = vpop.f32.mrb[1].mxu0 }
 0x225   : > { %v493_v47 = vpop.f32.mrb[2].mxu0  ;;  %v558_v48 = vpop.f32.mrb[0].mxu1 }
 0x226   : > { %v497_v49 = vpack.c.bf16 %v493_v47, %v490_v45  ;;  %v1321_v50 = vpop.f32.mrb[3].mxu0  ;;  %v1328_v51 = vpop.f32.mrb[1].mxu1 }
 0x227   : > { %v561_v52 = vpop.f32.mrb[2].mxu1 }
 0x228   : > { %v1329_v53 = vpop.f32.mrb[3].mxu1 }
 0x22b   : > { %v610_v54 = vpop.f32.mrb[4].mxu0 }
 0x22c   : > { %v611_v55 = vadd.f32 %v610_v54, %v558_v48  ;;  %v1336_v56 = vpop.f32.mrb[5].mxu0 }
 0x22d   : > { %v613_v57 = vpop.f32.mrb[6].mxu0  ;;  %v671_v58 = vpop.f32.mrb[4].mxu1 }
 0x22e   : > { %v677_v59 = vadd.f32 %v671_v58, %v611_v55  ;;  %v1337_v60 = vpop.f32.mrb[7].mxu0  ;;  %v1344_v61 = vpop.f32.mrb[5].mxu1 }
 0x22f   : > { %v674_v62 = vpop.f32.mrb[6].mxu1 }
 0x230   : > { %v1345_v63 = vpop.f32.mrb[7].mxu1 }
 0x233   : > { %v733_v2 = vpop.f32.mrb[8].mxu0 }
 0x234   : > { %v739_v4 = vadd.f32 %v733_v2, %v677_v59  ;;  %v1352_v5 = vpop.f32.mrb[9].mxu0 }
 0x235   : > { %v736_v6 = vpop.f32.mrb[10].mxu0 }
 0x236   : > { %v1353_v7 = vpop.f32.mrb[11].mxu0  ;;  %v747_v8 = vadd.f32 %v1267_v3, %v739_v4 }
 0x238   : > { %v751_v9 = vsel %vm750_vm2, %v747_v8, 0.0 }
 0x239   : > { %752 = vadd.xlane.f32.xlu0 %v751_v9 }
 0x2c6   : > { %v753_v10 = vpop.xlane.xlu0 %752 }
 0x2c7   : > { %v754_v11 = vmul.f32 0.03125, %v753_v10 }
 0x2c9   : > { %v755_v12 = vsub.f32 %v747_v8, %v754_v11 }
 0x2cb   : > { %v756_v13 = vmul.f32 %v755_v12, %v755_v12 }
 0x2cd   : > { %v757_v14 = vsel %vm750_vm2, %v756_v13, 0.0 }
 0x2ce   : > { %758 = vadd.xlane.f32.xlu1 %v757_v14 }
 0x2df   : > { %965 = vrot.lane.b32.xlu1 %v497_v49, %s1459_s14 }
 0x35b   : > { %v759_v18 = vpop.xlane.xlu1 %758 }
 0x35c   : > { %v760_v19 = vmul.f32 0.03125, %v759_v18 }
 0x35e   : > { %v761_v20 = vadd.f32 1e-05, %v760_v19 }
 0x35f   : > { %v966_v36 = vpop.permute.xlu1 %965 }
 0x360   : > { %1431 = vrsqrt.f32 %v761_v20 }
 0x36a   : > { %v1432_v21 = vpop.eup %1431 }
 0x36b   : > { %v763_v23 = vmul.f32 %v1432_v21, %v755_v12 }
 0x36d   : > { %v770_v25 = vmul.f32 %v1268_v22, %v763_v23 }
 0x36f   : > { %v777_v26 = vadd.f32 %v1269_v24, %v770_v25 }
 0x371   : > { %v778_v27 = vpack.c.bf16 %v777_v26, %v777_v26 }
 0x373   : > { %1359 = vmatmul.mubr.msk.bf16.vlgmr.msra.gmra.mrb[8].mxu1 %vm392_vm0, %v778_v27 }
 0x374   : > { %1370 = vmatprep.mubr.msk.bf16.mxu1 %vm1458_vm1, %v1457_v15 }
 0x446   : > { %v832_v28 = vpop.f32.mrb[8].mxu1 }
 0x447   : > { %v1638_v29 = vpack.c.bf16 %v832_v28, %v832_v28  ;;  %v1360_v30 = vpop.f32.mrb[9].mxu1 }
 0x448   : > { %v835_v31 = vpop.f32.mrb[10].mxu1  ;;  %v1425_v30 = vld [vmem:[%s1701_s9] sm:$0xff]  }
 0x449   : > { %967 = vrot.lane.b32.xlu0 %v1638_v29, %s1459_s14  ;;  %v1361_v32 = vpop.f32.mrb[11].mxu1  ;;  %v844_v33 = vsel %vm839_vm3, %v1638_v29, 0 }
 0x44a   : > { %1363 = vmatpush3.bf16.xpose.msra.mxu0 %v844_v33  ;;  %v1426_v33 = vld [vmem:[%s1701_s9 + $0x8] sm:$0xff]  }
 0x44b   : > { %1374 = vmatprep.subr.bf16.mxu0 %v1457_v15 }
 0x451   : > { %1365 = vmatmul.mubr.msk.bf16.vlgmr.msra.gmra.mrb[12].mxu0 %vm839_vm3, %v497_v49 }
 0x452   : > { %1376 = vmatprep.mubr.msk.bf16.mxu0 %vm1458_vm1, %v1457_v15 }
 0x4bb   : > { %v968_v34 = vpop.permute.xlu0 %967 }
 0x4bc   : > { %v973_v35 = vsel %vm839_vm3, %v968_v34, 0 }
 0x4bd   : > { %1375 = vmatpush3.bf16.xpose.msra.mxu0 %v973_v35 }
 0x4be   : > { %1386 = vmatprep.subr.bf16.mxu0 %v1457_v15 }
 0x4c4   : > { %1377 = vmatmul.mubr.msk.bf16.vlgmr.msra.gmra.mrb[16].mxu0 %vm839_vm3, %v966_v36 }
 0x4c5   : > { %1390 = vmatprep.mubr.msk.bf16.mxu0 %vm1458_vm1, %v1457_v15  ;;  %1387 = vmatpush3.bf16.msra.mxu0 %v1425_v30 }
 0x4c6   : > { %1388 = vmatprep.subr.bf16.mxu0 %v1457_v15 }
 0x4c9   : > { %1389 = vmatpush3.bf16.msra.mxu0 %v1426_v33 }
 0x524   : > { %v880_v37 = vpop.f32.mrb[12].mxu0 }
 0x525   : > { %v887_v38 = vmul.f32 0.25, %v880_v37  ;;  %v1366_v39 = vpop.f32.mrb[13].mxu0 }
 0x526   : > { %v883_v40 = vpop.f32.mrb[14].mxu0 }
 0x527   : > { %v888_v41 = vmul.f32 0.25, %v883_v40  ;;  %v1367_v42 = vpop.f32.mrb[15].mxu0  ;;  %v890_v43 = vsel %vm889_vm4, %v887_v38, -inf }
 0x528   : > { %891 = vmax.xlane.f32.xlu1 %v890_v43 }
 0x529   : > { %v893_v44 = vsel %vm889_vm4, %v888_v41, -inf }
 0x52a   : > { %894 = vmax.xlane.f32.xlu0 %v893_v44 }
 0x597   : > { %v1009_v45 = vpop.f32.mrb[16].mxu0 }
 0x598   : > { %v1016_v46 = vmul.f32 0.25, %v1009_v45  ;;  %v1378_v47 = vpop.f32.mrb[17].mxu0 }
 0x599   : > { %v1012_v48 = vpop.f32.mrb[18].mxu0  ;;  %v1280_v47 = vld [vmem:[%s1702_s10] ss:$0 sm:$0xff] }
 0x59a   : > { %v1017_v49 = vmul.f32 0.25, %v1012_v48  ;;  %v1379_v50 = vpop.f32.mrb[19].mxu0  ;;  %v1018_v51 = vsel %vm889_vm4, %v1016_v46, -inf }
 0x59b   : > { %1019 = vmax.xlane.f32.xlu0 %v1018_v51 }
 0x59c   : > { %v1021_v52 = vsel %vm889_vm4, %v1017_v49, -inf }
 0x59d   : > { %1022 = vmax.xlane.f32.xlu1 %v1021_v52 }
 0x5b5   : > { %v892_v53 = vpop.xlane.xlu1 %891 }
 0x5b6   : > { %v896_v54 = vsub.f32 %v887_v38, %v892_v53 }
 0x5b7   : > { %v895_v55 = vpop.xlane.xlu0 %894 }
 0x5b8   : > { %v898_v56 = vmul.f32 1.442695, %v896_v54  ;;  %v897_v57 = vsub.f32 %v888_v41, %v895_v55 }
 0x5ba   : > { %1433 = vpow2.f32 %v898_v56  ;;  %v900_v58 = vmul.f32 1.442695, %v897_v57 }
 0x5bc   : > { %1435 = vpow2.f32 %v900_v58 }
 0x5c4   : > { %v1434_v59 = vpop.eup %1433 }
 0x5c5   : > { %v902_v60 = vsel %vm889_vm4, %v1434_v59, 0.0 }
 0x5c6   : > { %v1436_v61 = vpop.eup %1435  ;;  %903 = vadd.xlane.f32.xlu0 %v902_v60 }
 0x5c7   : > { %v905_v62 = vsel %vm889_vm4, %v1436_v61, 0.0 }
 0x5c8   : > { %906 = vadd.xlane.f32.xlu1 %v905_v62 }
 0x628   : > { %v1020_v63 = vpop.xlane.xlu0 %1019 }
 0x629   : > { %v1024_v2 = vsub.f32 %v1016_v46, %v1020_v63 }
 0x62a   : > { %v1023_v3 = vpop.xlane.xlu1 %1022 }
 0x62b   : > { %v1026_v4 = vmul.f32 1.442695, %v1024_v2  ;;  %v1025_v5 = vsub.f32 %v1017_v49, %v1023_v3 }
 0x62d   : > { %1437 = vpow2.f32 %v1026_v4  ;;  %v1028_v6 = vmul.f32 1.442695, %v1025_v5 }
 0x62f   : > { %1439 = vpow2.f32 %v1028_v6 }
 0x637   : > { %v1438_v7 = vpop.eup %1437 }
 0x638   : > { %v1030_v8 = vsel %vm889_vm4, %v1438_v7, 0.0 }
 0x639   : > { %v1440_v9 = vpop.eup %1439  ;;  %1031 = vadd.xlane.f32.xlu0 %v1030_v8 }
 0x63a   : > { %v1033_v10 = vsel %vm889_vm4, %v1440_v9, 0.0 }
 0x63b   : > { %1034 = vadd.xlane.f32.xlu1 %v1033_v10 }
 0x64c   : > { %1041 = vrot.lane.b32.xlu1 %v1638_v29, %s1460_s26 }
 0x64f   : > { %914 = vrot.lane.b32.xlu0 %v1638_v29, %s1461_s27 }
 0x653   : > { %v904_v12 = vpop.xlane.xlu0 %903 }
 0x655   : > { %v907_v11 = vpop.xlane.xlu1 %906 }
 0x656   : > { %1441 = vrcp.f32 %v907_v11 }
 0x657   : > { %1443 = vrcp.f32 %v904_v12 }
 0x660   : > { %v1442_v13 = vpop.eup %1441 }
 0x661   : > { %v1444_v16 = vpop.eup %1443  ;;  %v911_v18 = vmul.f32 %v1442_v13, %v1436_v61 }
 0x662   : > { %v910_v20 = vmul.f32 %v1444_v16, %v1434_v59 }
 0x664   : > { %v912_v23 = vpack.c.bf16 %v911_v18, %v910_v20 }
 0x6c6   : > { %v1032_v14 = vpop.xlane.xlu0 %1031 }
 0x6c7   : > { %1445 = vrcp.f32 %v1032_v14 }
 0x6c8   : > { %v1035_v17 = vpop.xlane.xlu1 %1034 }
 0x6c9   : > { %1447 = vrcp.f32 %v1035_v17 }
 0x6ca   : > { %v915_v19 = vpop.permute.xlu0 %914 }
 0x6cb   : > { %v921_v21 = vsel %vm919_vm5, %v915_v19, 0 }
 0x6cc   : > { %1369 = vmatpush3.bf16.msra.mxu1 %v921_v21  ;;  %v1042_v22 = vpop.permute.xlu1 %1041 }
 0x6cd   : > { %1380 = vmatprep.subr.bf16.mxu1 %v1457_v15  ;;  %v1047_v24 = vsel %vm919_vm5, %v1042_v22, 0 }
 0x6cf   : > { %1371 = vmatmul.mubr.msk.bf16.vlgmr.msra.gmra.mrb[12].mxu1 %vm889_vm4, %v912_v23 }
 0x6d0   : > { %1381 = vmatpush3.bf16.msra.mxu1 %v1047_v24  ;;  %1382 = vmatprep.mubr.msk.bf16.mxu1 %vm1458_vm1, %v1457_v15 }
 0x6d1   : > { %v1446_v25 = vpop.eup %1445 }
 0x6d2   : > { %v1038_v27 = vmul.f32 %v1446_v25, %v1438_v7 }
 0x6d3   : > { %v1448_v26 = vpop.eup %1447 }
 0x6d4   : > { %v1039_v28 = vmul.f32 %v1448_v26, %v1440_v9 }
 0x6d6   : > { %v1040_v29 = vpack.c.bf16 %v1039_v28, %v1038_v27 }
 0x6d8   : > { %1383 = vmatmul.mubr.msk.bf16.vlgmr.msra.gmra.mrb[16].mxu1 %vm889_vm4, %v1040_v29 }
 0x7a2   : > { %v957_v31 = vpop.f32.mrb[12].mxu1 }
 0x7a3   : > { %v1372_v32 = vpop.f32.mrb[13].mxu1 }
 0x7a4   : > { %v960_v34 = vpop.f32.mrb[14].mxu1 }
 0x7a5   : > { %v1373_v35 = vpop.f32.mrb[15].mxu1 }
 0x7ab   : > { %v1083_v36 = vpop.f32.mrb[16].mxu1 }
 0x7ac   : > { %v1384_v37 = vpop.f32.mrb[17].mxu1 }
 0x7ad   : > { %v1086_v38 = vpop.f32.mrb[18].mxu1 }
 0x7ae   : > { %v1408_v39 = vpack.i.bf16 %v1086_v38, %v1083_v36  ;;  %v1385_v40 = vpop.f32.mrb[19].mxu1 }
 0x7b0   : > { %1409 = vrot.lane.b32.xlu1 %v1408_v39, %s1462_s13 }
 0x822   : > { %v1410_v41 = vpop.permute.xlu1 %1409 }
 0x823   : > { %v1412_v42 = vunpack.i.h.bf16 %v1410_v41  ;;  %v1411_v15 = vunpack.i.l.bf16 %v1410_v41 }
 0x825   : > { %v1099_v43 = vsel %vm839_vm3, %v960_v34, %v1412_v42  ;;  %v1098_v44 = vsel %vm839_vm3, %v957_v31, %v1411_v15 }
 0x826   : > { %v1100_v45 = vpack.c.bf16 %v1099_v43, %v1098_v44 }
 0x828   : > { %1391 = vmatmul.mubr.msk.bf16.vlgmr.msra.gmra.mrb[20].mxu0 %vm392_vm0, %v1100_v45 }
 0x8fb   : > { %v1154_v46 = vpop.f32.mrb[20].mxu0 }
 0x8fc   : > { %v1161_v48 = vadd.f32 %v1154_v46, %v1539_v0  ;;  %v1392_v49 = vpop.f32.mrb[21].mxu0 }
 0x8fd   : > { %v1157_v50 = vpop.f32.mrb[22].mxu0 }
 0x8fe   : > { %v1170_v51 = vadd.f32 %v1280_v47, %v1161_v48  ;;  %v1162_v52 = vadd.f32 %v1157_v50, %v1541_v1  ;;  %v1393_v53 = vpop.f32.mrb[23].mxu0 }
 0x900   : > { %1172 = vst.msk [vmem:[%s386_s21] sm:$0xff] %vm392_vm0, %v1170_v51  ;;  %v1171_v54 = vadd.f32 %v1280_v47, %v1162_v52 }
 0x902   : > { %1173 = vst.msk [vmem:[%s386_s21 + $0x8] sm:$0xff] %vm392_vm0, %v1171_v54 }
 0x903 PF: > { %s21_s17 = sadd.s32 1, %s1455_s17  }
 0x904   : > { %p18_p4 = scmp.ge.s32.totalorder %s21_s17, 4  }
 0x906   :  { %20 = sbr.rel (!%p18_p4) target bundleno = 1 (0x1), region = 97 }

// kernel: forward.12
= control target key start
LH: loop header
LB: loop body
LE: loop exit
PB: predicated region body
PF: predicated region fallthrough
CT: control target
= control target key end

     0   :  { %s2035_s18 = smov 0   ;;  %s3042_s0 = inlined_call_operand.vmem [shape: f32[2,4,4,32], index: 0, kind: input, shape index: {}]   ;;  %s3043_s1 = inlined_call_operand.vmem [shape: f32[2,10,10,2], index: 1, kind: input, shape index: {}]   ;;  %s3044_s2 = inlined_call_operand.vmem [shape: f32[49,2], index: 2, kind: input, shape index: {}]   ;;  %s3045_s3 = inlined_call_operand.vmem [shape: f32[32,2], index: 3, kind: input, shape index: {}]   ;;  %s3046_s4 = inlined_call_operand.vmem [shape: f32[2,32], index: 4, kind: input, shape index: {}]   ;;  %s3047_s5 = inlined_call_operand.vmem [shape: f32[2,16,32], index: 5, kind: output, shape index: {}]  }
   0x1 LB: > { %s1905_s19 = sadd.s32 4294967295, %s2000_s18   ;;  %p1909_p0 = scmp.ge.s32.totalorder %s2000_s18, 1  ;;  %s2000_s18 = sphi %s2035_s18, %s15_s18  }
   0x2   : > { %p197_p1 = scmp.lt.s32.totalorder %s2000_s18, 3 }
   0x4   : > { %p198_p2 = pnand %p1909_p0, %p197_p1 }
   0x6   : > { %201 = sbr.rel (%p198_p2) target bundleno = 889 (0x379), region = 40 }
   0xd   : > { %p230_p3 = scmp.lt.s32.totalorder %s1905_s19, 1  ;;  %v276_v0 = vlaneseq  ;;  %v269_v2 = vld [vmem:[%s3044_s2] sm:$0xff]  ;;  %vm404_vm0 = vcmask 1042432   ;;  %vm445_vm1 = vcmask 1041408   ;;  %v2145_v58 = vld [vmem:[%s3044_s2 + $0x8] sm:$0xff]  ;;  %vm1594_vm2 = vcmask 11264  }
   0xe   : > { %vm2003_vm3 = vmmov 0   ;;  %vm1643_vm4 = vcmask 261120   ;;  %vm1734_vm5 = vcmask 15360  }
   0xf   : > { %s3269_s19 = smov (!%p230_p3, %s1905_s19), 1  ;;  %v277_v1 = vshrl.u32 %v276_v0, 7 }
  0x10   : > { %s1952_s22 = smul.u32 160, %s3269_s19  ;;  %s1921_s23 = sshll.u32 %s3269_s19, 4 }
  0x11   : > { %v2049_v3 = vsub.s32 0, %v277_v1  ;;  %v2051_v4 = vsub.s32 1, %v277_v1  ;;  %v2053_v5 = vsub.s32 2, %v277_v1  ;;  %v2055_v6 = vsub.s32 3, %v277_v1  ;;  %s234_s26 = scalar_lea.vmem %s3042_s0, %s1921_s23  ;;  %s244_s6 = scalar_lea.vmem %s3047_s5, %s1921_s23 }
  0x12   : > { %v2057_v7 = vsub.s32 4, %v277_v1  ;;  %v2059_v8 = vsub.s32 5, %v277_v1  ;;  %v2061_v9 = vsub.s32 6, %v277_v1  ;;  %v2063_v10 = vsub.s32 7, %v277_v1  ;;  %s2068_s25 = scalar_lea.vmem %s3043_s1, %s1952_s22 }
  0x13   : > { %3142 = vst [vmem:[#allocation2_spill] sm:$0xff] %v2049_v3  ;;  %v2071_v11 = vrot.slane %v269_v2, %v2049_v3  ;;  %v2074_v12 = vrot.slane %v269_v2, %v2051_v4  ;;  %v2077_v13 = vrot.slane %v269_v2, %v2053_v5  ;;  %v2080_v14 = vrot.slane %v269_v2, %v2055_v6  ;;  %v2083_v15 = vld [vmem:[%s2068_s25 + $0x20] sm:$0xff]  ;;  %v2086_v16 = vld [vmem:[%s2068_s25 + $0x30] sm:$0xff]  ;;  %v2101_v21 = vld [vmem:[%s2068_s25 + $0x28] sm:$0x3] }
  0x14   : > { %v2089_v17 = vrot.slane %v269_v2, %v2057_v7  ;;  %v2092_v18 = vrot.slane %v269_v2, %v2059_v8  ;;  %v2095_v19 = vrot.slane %v269_v2, %v2061_v9  ;;  %v2098_v20 = vrot.slane %v269_v2, %v2063_v10  ;;  %3143 = vst [vmem:[#allocation3_spill] sm:$0xff] %v2101_v21  ;;  %v2120_v30 = vld [vmem:[%s2068_s25 + $0x38] sm:$0x3]  ;;  %v2149_v63 = vld [vmem:[%s2068_s25 + $0x40] sm:$0xff] }
  0x15   : > { %v282_v22 = vmul.f32 %v2071_v11, %v2083_v15  ;;  %v283_v23 = vmul.f32 %v2071_v11, %v2086_v16  ;;  %v294_v24 = vmul.f32 %v2074_v12, %v2083_v15  ;;  %v295_v25 = vmul.f32 %v2074_v12, %v2086_v16  ;;  %3144 = vst [vmem:[#allocation4_spill] sm:$0xff] %v2120_v30 }
  0x16   : > { %v318_v26 = vmul.f32 %v2077_v13, %v2083_v15  ;;  %v319_v27 = vmul.f32 %v2077_v13, %v2086_v16  ;;  %v342_v28 = vmul.f32 %v2080_v14, %v2083_v15  ;;  %v343_v29 = vmul.f32 %v2080_v14, %v2086_v16  ;;  %3145 = vst [vmem:[#allocation5_spill] sm:$0xff] %v2149_v63 }
  0x17   : > { %v302_v31 = vrot.slane %v294_v24, 1  ;;  %v366_v32 = vmul.f32 %v2089_v17, %v2083_v15  ;;  %v367_v33 = vmul.f32 %v2089_v17, %v2086_v16  ;;  %v392_v34 = vmul.f32 %v2092_v18, %v2083_v15 }
  0x18   : > { %v303_v35 = vrot.slane %v295_v25, 1  ;;  %v326_v36 = vrot.slane %v318_v26, 2  ;;  %v327_v37 = vrot.slane %v319_v27, 2  ;;  %v393_v38 = vmul.f32 %v2092_v18, %v2101_v21 }
  0x19   : > { %v310_v39 = vadd.f32 %v302_v31, %v282_v22  ;;  %v350_v40 = vrot.slane %v342_v28, 3  ;;  %v351_v41 = vrot.slane %v343_v29, 3  ;;  %v374_v42 = vrot.slane %v366_v32, 4 }
  0x1a   : > { %v311_v43 = vadd.f32 %v303_v35, %v283_v23  ;;  %v375_v44 = vrot.slane %v367_v33, 4  ;;  %v394_v45 = vmul.f32 %v2092_v18, %v2086_v16  ;;  %v395_v46 = vmul.f32 %v2092_v18, %v2120_v30 }
  0x1b   : > { %v334_v47 = vadd.f32 %v326_v36, %v310_v39  ;;  %v411_v48 = vrot.slane %v392_v34, 5  ;;  %v412_v49 = vrot.slane %v393_v38, 5  ;;  %v433_v50 = vmul.f32 %v2095_v19, %v2083_v15 }
  0x1c   : > { %v335_v51 = vadd.f32 %v327_v37, %v311_v43  ;;  %v414_v52 = vrot.slane %v394_v45, 5  ;;  %v415_v53 = vrot.slane %v395_v46, 5  ;;  %v434_v54 = vmul.f32 %v2095_v19, %v2101_v21 }
  0x1d   : > { %v358_v55 = vadd.f32 %v350_v40, %v334_v47  ;;  %v435_v56 = vmul.f32 %v2095_v19, %v2086_v16  ;;  %v436_v57 = vmul.f32 %v2095_v19, %v2120_v30  ;;  %v413_v60 = vsel %vm404_vm0, %v411_v48, %v412_v49 }
  0x1e   : > { %v359_v59 = vadd.f32 %v351_v41, %v335_v51  ;;  %v452_v61 = vrot.slane %v433_v50, 6  ;;  %v453_v62 = vrot.slane %v434_v54, 6  ;;  %v416_v1 = vsel %vm404_vm0, %v414_v52, %v415_v53  ;;  %v2195_v54 = vld [vmem:[%s2068_s25 + $0x48] sm:$0x3] }
  0x1f   : > { %v382_v0 = vadd.f32 %v374_v42, %v358_v55  ;;  %v455_v2 = vrot.slane %v435_v56, 6  ;;  %v456_v22 = vrot.slane %v436_v57, 6  ;;  %v472_v25 = vmul.f32 %v2098_v20, %v2086_v16  ;;  %3146 = vst [vmem:[#allocation6_spill] sm:$0xff] %v2195_v54 }
  0x20   : > { %v383_v23 = vadd.f32 %v375_v44, %v359_v59  ;;  %v454_v24 = vsel %vm445_vm1, %v452_v61, %v453_v62  ;;  %v2158_v28 = vrot.slane %v2145_v58, %v2049_v3  ;;  %v2162_v29 = vrot.slane %v2145_v58, %v2051_v4 }
  0x21   : > { %v423_v26 = vadd.f32 %v413_v60, %v382_v0  ;;  %v457_v27 = vsel %vm445_vm1, %v455_v2, %v456_v22  ;;  %v473_v32 = vmul.f32 %v2098_v20, %v2149_v63  ;;  %v2172_v36 = vrot.slane %v2145_v58, %v2053_v5 }
  0x22   : > { %v424_v31 = vadd.f32 %v416_v1, %v383_v23  ;;  %v484_v34 = vmul.f32 %v2158_v28, %v2086_v16  ;;  %v485_v35 = vmul.f32 %v2158_v28, %v2149_v63  ;;  %v508_v38 = vmul.f32 %v2162_v29, %v2086_v16 }
  0x23   : > { %v464_v33 = vadd.f32 %v454_v24, %v423_v26  ;;  %v509_v39 = vmul.f32 %v2162_v29, %v2149_v63  ;;  %v2180_v40 = vrot.slane %v2145_v58, %v2055_v6  ;;  %v532_v48 = vmul.f32 %v2172_v36, %v2086_v16 }
  0x24   : > { %v465_v37 = vadd.f32 %v457_v27, %v424_v31  ;;  %v492_v42 = vrot.slane %v484_v34, 1  ;;  %v493_v43 = vrot.slane %v485_v35, 1  ;;  %v516_v45 = vrot.slane %v508_v38, 2  ;;  %v2212_v34 = vld [vmem:[%s3044_s2 + $0x10] sm:$0xff] }
  0x25   : > { %v476_v41 = vadd.f32 %v472_v25, %v464_v33  ;;  %v517_v46 = vrot.slane %v509_v39, 2  ;;  %v533_v49 = vmul.f32 %v2172_v36, %v2149_v63  ;;  %v2188_v50 = vrot.slane %v2145_v58, %v2057_v7 }
  0x26   : > { %v477_v44 = vadd.f32 %v473_v32, %v465_v37  ;;  %v556_v52 = vmul.f32 %v2180_v40, %v2086_v16  ;;  %v557_v53 = vmul.f32 %v2180_v40, %v2149_v63  ;;  %v540_v56 = vrot.slane %v532_v48, 3 }
  0x27   : > { %v500_v47 = vadd.f32 %v492_v42, %v476_v41  ;;  %v541_v57 = vrot.slane %v533_v49, 3  ;;  %v582_v0 = vmul.f32 %v2188_v50, %v2086_v16  ;;  %v583_v2 = vmul.f32 %v2188_v50, %v2120_v30  ;;  %v2225_v41 = vld [vmem:[%s2068_s25 + $0x50] sm:$0xff] }
  0x28   : > { %v501_v51 = vadd.f32 %v493_v43, %v477_v44  ;;  %v564_v61 = vrot.slane %v556_v52, 4  ;;  %v565_v62 = vrot.slane %v557_v53, 4  ;;  %v584_v22 = vmul.f32 %v2188_v50, %v2149_v63  ;;  %3147 = vst [vmem:[#allocation7_spill] sm:$0xff] %v2225_v41 }
  0x29   : > { %v524_v55 = vadd.f32 %v516_v45, %v500_v47  ;;  %v585_v23 = vmul.f32 %v2188_v50, %v2195_v54  ;;  %v600_v24 = vrot.slane %v582_v0, 5  ;;  %v601_v25 = vrot.slane %v583_v2, 5 }
  0x2a   : > { %v525_v59 = vadd.f32 %v517_v46, %v501_v51  ;;  %v603_v26 = vrot.slane %v584_v22, 5  ;;  %v2207_v33 = vrot.slane %v2145_v58, %v2059_v8  ;;  %v2218_v38 = vrot.slane %v2145_v58, %v2061_v9 }
  0x2b   : > { %v548_v60 = vadd.f32 %v540_v56, %v524_v55  ;;  %v604_v27 = vrot.slane %v585_v23, 5  ;;  %v602_v35 = vsel %vm404_vm0, %v600_v24, %v601_v25  ;;  %v2222_v39 = vrot.slane %v2145_v58, %v2063_v10 }
  0x2c   : > { %v549_v1 = vadd.f32 %v541_v57, %v525_v59  ;;  %v622_v42 = vmul.f32 %v2207_v33, %v2086_v16  ;;  %v623_v43 = vmul.f32 %v2207_v33, %v2120_v30  ;;  %v624_v44 = vmul.f32 %v2207_v33, %v2149_v63  ;;  %v2378_v30 = vld [vmem:[%s2068_s25 + $0x60] sm:$0xff] }
  0x2d   : > { %v572_v31 = vadd.f32 %v564_v61, %v548_v60  ;;  %v605_v37 = vsel %vm404_vm0, %v603_v26, %v604_v27  ;;  %v625_v45 = vmul.f32 %v2207_v33, %v2195_v54  ;;  %v2237_v46 = vmul.f32 %v2158_v28, %v2083_v15  ;;  %3165 = vst [vmem:[#allocation25_spill] sm:$0xff] %v2378_v30 }
  0x2e   : > { %v573_v32 = vadd.f32 %v565_v62, %v549_v1  ;;  %v2241_v48 = vrot.slane %v2212_v34, %v2049_v3  ;;  %v640_v49 = vrot.slane %v622_v42, 6  ;;  %v641_v51 = vrot.slane %v623_v43, 6 }
  0x2f   : > { %v612_v58 = vadd.f32 %v602_v35, %v572_v31  ;;  %v643_v52 = vrot.slane %v624_v44, 6  ;;  %v644_v53 = vrot.slane %v625_v45, 6  ;;  %v2245_v55 = vmul.f32 %v2162_v29, %v2083_v15 }
  0x30   : > { %v613_v47 = vadd.f32 %v605_v37, %v573_v32  ;;  %v660_v56 = vmul.f32 %v2218_v38, %v2149_v63  ;;  %v661_v57 = vmul.f32 %v2218_v38, %v2225_v41  ;;  %v642_v59 = vsel %vm445_vm1, %v640_v49, %v641_v51 }
  0x31   : > { %v645_v60 = vsel %vm445_vm1, %v643_v52, %v644_v53  ;;  %v672_v61 = vmul.f32 %v2222_v39, %v2149_v63  ;;  %v2257_v62 = vrot.slane %v2212_v34, %v2051_v4  ;;  %v652_v0 = vadd.f32 %v642_v59, %v612_v58 }
  0x32   : > { %v653_v1 = vadd.f32 %v645_v60, %v613_v47  ;;  %v673_v2 = vmul.f32 %v2222_v39, %v2225_v41  ;;  %v2263_v22 = vmul.f32 %v2098_v20, %v2083_v15  ;;  %v696_v25 = vmul.f32 %v2241_v48, %v2149_v63 }
  0x33   : > { %3148 = vst [vmem:[#allocation8_spill] sm:$0xff] %v2257_v62  ;;  %v680_v24 = vrot.slane %v672_v61, 1  ;;  %v664_v26 = vadd.f32 %v660_v56, %v652_v0  ;;  %v697_v32 = vmul.f32 %v2241_v48, %v2225_v41  ;;  %v720_v42 = vmul.f32 %v2257_v62, %v2149_v63  ;;  %v272_v56 = vld [vmem:[%s3044_s2 + $0x18] sm:$0xff] }
  0x34   : > { %v665_v27 = vadd.f32 %v661_v57, %v653_v1  ;;  %v681_v31 = vrot.slane %v673_v2, 1  ;;  %v704_v37 = vrot.slane %v696_v25, 2  ;;  %v2275_v43 = vrot.slane %v2212_v34, %v2053_v5 }
  0x35   : > { %v688_v44 = vadd.f32 %v680_v24, %v664_v26  ;;  %v705_v58 = vrot.slane %v697_v32, 2  ;;  %v2279_v47 = vrot.slane %v2212_v34, %v2055_v6  ;;  %v2283_v49 = vmul.f32 %v2172_v36, %v2083_v15 }
  0x36   : > { %3149 = vst [vmem:[#allocation9_spill] sm:$0xff] %v2275_v43  ;;  %v689_v45 = vadd.f32 %v681_v31, %v665_v27  ;;  %v728_v51 = vrot.slane %v720_v42, 3  ;;  %v744_v52 = vmul.f32 %v2275_v43, %v2149_v63  ;;  %v2289_v53 = vrot.slane %v2212_v34, %v2057_v7 }
  0x37   : > { %3150 = vst [vmem:[#allocation10_spill] sm:$0xff] %v2279_v47  ;;  %v712_v57 = vadd.f32 %v704_v37, %v688_v44  ;;  %v770_v60 = vmul.f32 %v2279_v47, %v2149_v63  ;;  %v771_v61 = vmul.f32 %v2279_v47, %v2195_v54  ;;  %v2306_v24 = vrot.slane %v2212_v34, %v2059_v8 }
  0x38   : > { %3151 = vst [vmem:[#allocation11_spill] sm:$0xff] %v2289_v53  ;;  %v2294_v59 = vadd.f32 %v705_v58, %v689_v45  ;;  %v752_v0 = vrot.slane %v744_v52, 4  ;;  %v810_v1 = vmul.f32 %v2289_v53, %v2149_v63  ;;  %v811_v2 = vmul.f32 %v2289_v53, %v2195_v54 }
  0x39   : > { %3153 = vst [vmem:[#allocation13_spill] sm:$0xff] %v2306_v24  ;;  %v736_v25 = vadd.f32 %v728_v51, %v712_v57  ;;  %v788_v26 = vrot.slane %v770_v60, 5  ;;  %v789_v27 = vrot.slane %v771_v61, 5  ;;  %v2310_v31 = vrot.slane %v2212_v34, %v2061_v9 }
  0x3a   : > { %3152 = vst [vmem:[#allocation12_spill] sm:$0xff] %v2294_v59  ;;  %v828_v32 = vrot.slane %v810_v1, 6  ;;  %v829_v37 = vrot.slane %v811_v2, 6  ;;  %v2314_v42 = vrot.slane %v2212_v34, %v2063_v10  ;;  %v2317_v44 = vrot.slane %v272_v56, %v2049_v3 }
  0x3b   : > { %3154 = vst [vmem:[#allocation14_spill] sm:$0xff] %v2310_v31  ;;  %v580_v45 = vmul.f32 %v2188_v50, %v2083_v15  ;;  %v760_v58 = vadd.f32 %v752_v0, %v736_v25  ;;  %v790_v51 = vsel %vm404_vm0, %v788_v26, %v789_v27  ;;  %v860_v52 = vmul.f32 %v2310_v31, %v2225_v41  ;;  %v2341_v26 = vld [vmem:[%s2068_s25 + $0x58] sm:$0x3] }
  0x3c   : > { %3155 = vst [vmem:[#allocation15_spill] sm:$0xff] %v2314_v42  ;;  %3156 = vst [vmem:[#allocation16_spill] sm:$0xff] %v2317_v44  ;;  %v581_v57 = vmul.f32 %v2188_v50, %v2101_v21  ;;  %v830_v60 = vsel %vm445_vm1, %v828_v32, %v829_v37  ;;  %v848_v34 = vmul.f32 %v2306_v24, %v2225_v41 }
  0x3d   : > { %v2330_v61 = vrot.slane %v272_v56, %v2053_v5  ;;  %v800_v1 = vadd.f32 %v790_v51, %v760_v58  ;;  %v884_v0 = vmul.f32 %v2314_v42, %v2225_v41  ;;  %v2335_v2 = vrot.slane %v272_v56, %v2051_v4  ;;  %3160 = vst [vmem:[#allocation20_spill] sm:$0xff] %v2341_v26 }
  0x3e   : > { %v2338_v25 = vrot.slane %v272_v56, %v2055_v6  ;;  %v2346_v32 = vmul.f32 %v2180_v40, %v2083_v15  ;;  %v908_v37 = vmul.f32 %v2317_v44, %v2225_v41  ;;  %v868_v35 = vrot.slane %v860_v52, 1 }
  0x3f   : > { %3157 = vst [vmem:[#allocation17_spill] sm:$0xff] %v2330_v61  ;;  %3158 = vst [vmem:[#allocation18_spill] sm:$0xff] %v2335_v2  ;;  %v958_v58 = vmul.f32 %v2330_v61, %v2225_v41  ;;  %v840_v51 = vadd.f32 %v830_v60, %v800_v1  ;;  %v959_v23 = vmul.f32 %v2330_v61, %v2341_v26  ;;  %v597_v27 = vrot.slane %v580_v45, 5  ;;  %v273_v60 = vld [vmem:[%s3044_s2 + $0x20] sm:$0xff] }
  0x40   : > { %3159 = vst [vmem:[#allocation19_spill] sm:$0xff] %v2338_v25  ;;  %v998_v59 = vmul.f32 %v2338_v25, %v2225_v41  ;;  %v598_v54 = vrot.slane %v581_v57, 5  ;;  %v999_v63 = vmul.f32 %v2338_v25, %v2341_v26  ;;  %v2359_v24 = vrot.slane %v272_v56, %v2059_v8 }
  0x41   : > { %v852_v52 = vadd.f32 %v848_v34, %v840_v51  ;;  %v892_v1 = vrot.slane %v884_v0, 2  ;;  %v932_v44 = vmul.f32 %v2335_v2, %v2225_v41  ;;  %v2367_v42 = vrot.slane %v272_v56, %v2061_v9 }
  0x42   : > { %3161 = vst [vmem:[#allocation21_spill] sm:$0xff] %v2359_v24  ;;  %v2371_v45 = vmul.f32 %v2207_v33, %v2083_v15  ;;  %v2375_v57 = vmul.f32 %v2207_v33, %v2101_v21  ;;  %v916_v26 = vrot.slane %v908_v37, 3  ;;  %v976_v25 = vrot.slane %v958_v58, 5 }
  0x43   : > { %3162 = vst [vmem:[#allocation22_spill] sm:$0xff] %v2367_v42  ;;  %v876_v34 = vadd.f32 %v868_v35, %v852_v52  ;;  %v977_v0 = vrot.slane %v959_v23, 5  ;;  %v1016_v51 = vrot.slane %v998_v59, 6  ;;  %v2381_v41 = vrot.slane %v272_v56, %v2057_v7 }
  0x44   : > { %3163 = vst [vmem:[#allocation23_spill] sm:$0xff] %v2371_v45  ;;  %3164 = vst [vmem:[#allocation24_spill] sm:$0xff] %v2375_v57  ;;  %v1017_v2 = vrot.slane %v999_v63, 6  ;;  %v1048_v61 = vmul.f32 %v2359_v24, %v2378_v30  ;;  %v2386_v31 = vrot.slane %v272_v56, %v2063_v10  ;;  %v2389_v53 = vrot.slane %v273_v60, %v2049_v3 }
  0x45   : > { %3166 = vst [vmem:[#allocation26_spill] sm:$0xff] %v2381_v41  ;;  %v900_v37 = vadd.f32 %v892_v1, %v876_v34  ;;  %v940_v58 = vrot.slane %v932_v44, 4  ;;  %v1072_v23 = vmul.f32 %v2367_v42, %v2378_v30  ;;  %v2394_v35 = vrot.slane %v273_v60, %v2051_v4  ;;  %v2407_v44 = vld [vmem:[%s3044_s2 + $0x28] sm:$0xff] }
  0x46   : > { %3167 = vst [vmem:[#allocation27_spill] sm:$0xff] %v2386_v31  ;;  %3168 = vst [vmem:[#allocation28_spill] sm:$0xff] %v2389_v53  ;;  %v2398_v59 = vsel %vm404_vm0, %v597_v27, %v598_v54  ;;  %v2402_v56 = vrot.slane %v273_v60, %v2053_v5  ;;  %v978_v42 = vsel %vm404_vm0, %v976_v25, %v977_v0  ;;  %v2414_v27 = vld [vmem:[%s2068_s25 + $0x68] sm:$0x3]  ;;  %v1056_v63 = vrot.slane %v1048_v61, 1 }
  0x47   : > { %3169 = vst [vmem:[#allocation29_spill] sm:$0xff] %v2394_v35  ;;  %3170 = vst [vmem:[#allocation30_spill] sm:$0xff] %v2398_v59  ;;  %v924_v34 = vadd.f32 %v916_v26, %v900_v37  ;;  %v1036_v54 = vmul.f32 %v2381_v41, %v2378_v30  ;;  %v1018_v52 = vsel %vm445_vm1, %v1016_v51, %v1017_v2  ;;  %v1080_v37 = vrot.slane %v1072_v23, 2 }
  0x48   : > { %3171 = vst [vmem:[#allocation31_spill] sm:$0xff] %v2402_v56  ;;  %3172 = vst [vmem:[#allocation32_spill] sm:$0xff] %v2414_v27  ;;  %v1096_v24 = vmul.f32 %v2386_v31, %v2378_v30  ;;  %v2421_v43 = vmul.f32 %v2389_v53, %v2378_v30  ;;  %v1146_v25 = vmul.f32 %v2394_v35, %v2378_v30 }
  0x49   : > { %v948_v26 = vadd.f32 %v940_v58, %v924_v34  ;;  %v1147_v0 = vmul.f32 %v2394_v35, %v2414_v27  ;;  %v1186_v2 = vmul.f32 %v2402_v56, %v2378_v30  ;;  %v1187_v61 = vmul.f32 %v2402_v56, %v2414_v27  ;;  %v2439_v58 = vld [vmem:[%s2068_s25 + $0x70] sm:$0xff]  ;;  %v2451_v27 = vld [vmem:[%s2068_s25 + $0x78] sm:$0x3] }
  0x4a   : > { %v2432_v51 = vrot.slane %v273_v60, %v2057_v7  ;;  %v2436_v1 = vrot.slane %v2407_v44, %v2049_v3  ;;  %3175 = vst [vmem:[#allocation35_spill] sm:$0xff] %v2439_v58  ;;  %v2442_v34 = vrot.slane %v273_v60, %v2055_v6  ;;  %v2445_v41 = vrot.slane %v273_v60, %v2059_v8 }
  0x4b   : > { %v988_v23 = vadd.f32 %v978_v42, %v948_v26  ;;  %v2448_v30 = vrot.slane %v273_v60, %v2061_v9  ;;  %3179 = vst [vmem:[#allocation39_spill] sm:$0xff] %v2451_v27  ;;  %v1104_v56 = vrot.slane %v1096_v24, 3  ;;  %v1128_v53 = vrot.slane %v2421_v43, 4 }
  0x4c   : > { %3173 = vst [vmem:[#allocation33_spill] sm:$0xff] %v2432_v51  ;;  %3174 = vst [vmem:[#allocation34_spill] sm:$0xff] %v2436_v1  ;;  %v2455_v3 = vrot.slane %v273_v60, %v2063_v10  ;;  %v1334_v42 = vmul.f32 %v2436_v1, %v2439_v58  ;;  %v1164_v31 = vrot.slane %v1146_v25, 5  ;;  %v1165_v35 = vrot.slane %v1147_v0, 5 }
  0x4d   : > { %3176 = vst [vmem:[#allocation36_spill] sm:$0xff] %v2442_v34  ;;  %3177 = vst [vmem:[#allocation37_spill] sm:$0xff] %v2445_v41  ;;  %v1028_v26 = vadd.f32 %v1018_v52, %v988_v23  ;;  %v1335_v21 = vmul.f32 %v2436_v1, %v2451_v27  ;;  %v1204_v47 = vrot.slane %v1186_v2, 6  ;;  %v1205_v62 = vrot.slane %v1187_v61, 6  ;;  %v2490_v23 = vld [vmem:[%s2068_s25 + $0x80] sm:$0xff] }
  0x4e   : > { %3178 = vst [vmem:[#allocation38_spill] sm:$0xff] %v2448_v30  ;;  %3180 = vst [vmem:[#allocation40_spill] sm:$0xff] %v2455_v3  ;;  %v2463_v24 = vmul.f32 %v2432_v51, %v2439_v58  ;;  %v2467_v43 = vrot.slane %v2407_v44, %v2051_v4  ;;  %v2471_v52 = vmul.f32 %v2445_v41, %v2439_v58  ;;  %v1352_v61 = vrot.slane %v1334_v42, 5 }
  0x4f   : > { %v1040_v60 = vadd.f32 %v1036_v54, %v1028_v26  ;;  %v2475_v25 = vmul.f32 %v2448_v30, %v2439_v58  ;;  %v2479_v0 = vrot.slane %v2407_v44, %v2055_v6  ;;  %v2483_v2 = vmul.f32 %v2455_v3, %v2439_v58 }
  0x50   : > { %3181 = vst [vmem:[#allocation41_spill] sm:$0xff] %v2467_v43  ;;  %v1374_v4 = vmul.f32 %v2467_v43, %v2439_v58  ;;  %v1375_v54 = vmul.f32 %v2467_v43, %v2451_v27  ;;  %v1353_v30 = vrot.slane %v1335_v21, 5  ;;  %v2494_v41 = vrot.slane %v2407_v44, %v2053_v5 }
  0x51   : > { %3182 = vst [vmem:[#allocation42_spill] sm:$0xff] %v2479_v0  ;;  %v1064_v26 = vadd.f32 %v1056_v63, %v1040_v60  ;;  %v2498_v6 = vrot.slane %v2407_v44, %v2057_v7  ;;  %v2502_v51 = vmul.f32 %v2479_v0, %v2490_v23  ;;  %v2506_v27 = vrot.slane %v2407_v44, %v2059_v8  ;;  %v2518_v60 = vld [vmem:[%s3044_s2 + $0x30] ss:$0 sm:$0xff] }
  0x52   : > { %3183 = vst [vmem:[#allocation43_spill] sm:$0xff] %v2494_v41  ;;  %v1392_v3 = vrot.slane %v1374_v4, 6  ;;  %v1393_v42 = vrot.slane %v1375_v54, 6  ;;  %v1166_v63 = vsel %vm404_vm0, %v1164_v31, %v1165_v35  ;;  %v1224_v5 = vmul.f32 %v2442_v34, %v2439_v58  ;;  %3186 = vst [vmem:[#allocation46_spill] sm:$0xff] %v2518_v60 }
  0x53   : > { %3184 = vst [vmem:[#allocation44_spill] sm:$0xff] %v2498_v6  ;;  %3185 = vst [vmem:[#allocation45_spill] sm:$0xff] %v2506_v27  ;;  %v1088_v21 = vadd.f32 %v1080_v37, %v1064_v26  ;;  %v2513_v7 = vmul.f32 %v2498_v6, %v2490_v23  ;;  %v1206_v8 = vsel %vm445_vm1, %v1204_v47, %v1205_v62  ;;  %v1244_v37 = vrot.slane %v2463_v24, 1  ;;  %v249_v6 = vld [vmem:[%s2068_s25] sm:$0xff]  ;;  %v2549_v24 = vld [vmem:[%s2068_s25 + $0x88] sm:$0x3] }
  0x54   : > { %v1268_v31 = vrot.slane %v2471_v52, 2  ;;  %v2525_v35 = vrot.slane %v2407_v44, %v2061_v9  ;;  %v1292_v54 = vrot.slane %v2475_v25, 3  ;;  %v2530_v58 = vsel %vm404_vm0, %v1352_v61, %v1353_v30  ;;  %v252_v47 = vld [vmem:[%s2068_s25 + $0x18] sm:$0x3] }
  0x55   : > { %v1112_v4 = vadd.f32 %v1104_v56, %v1088_v21  ;;  %v2534_v0 = vsel %vm445_vm1, %v1392_v3, %v1393_v42  ;;  %v2538_v62 = vmul.f32 %v2494_v41, %v2490_v23  ;;  %v2543_v9 = vmul.f32 %v2506_v27, %v2490_v23  ;;  %v2546_v56 = vld [vmem:[%s2068_s25 + $0x10] sm:$0xff]  ;;  %v250_v41 = vld [vmem:[%s2068_s25 + $0x8] sm:$0x3] }
  0x56   : > { %3187 = vst [vmem:[#allocation47_spill] sm:$0xff] %v2525_v35  ;;  %v2554_v3 = vrot.slane %v2407_v44, %v2063_v10  ;;  %v2558_v25 = vmul.f32 %v2518_v60, %v2490_v23  ;;  %v2562_v61 = vmul.f32 %v2525_v35, %v2490_v23  ;;  %v2566_v42 = vmul.f32 %v2518_v60, %v2549_v24 }
  0x57   : > { %v1136_v30 = vadd.f32 %v1128_v53, %v1112_v4  ;;  %v280_v53 = vmul.f32 %v2071_v11, %v249_v6  ;;  %v292_v21 = vmul.f32 %v2074_v12, %v249_v6  ;;  %v281_v10 = vmul.f32 %v2071_v11, %v2546_v56 }
  0x58   : > { %3188 = vst [vmem:[#allocation48_spill] sm:$0xff] %v2554_v3  ;;  %v293_v44 = vmul.f32 %v2074_v12, %v2546_v56  ;;  %v316_v52 = vmul.f32 %v2077_v13, %v249_v6  ;;  %v317_v35 = vmul.f32 %v2077_v13, %v2546_v56  ;;  %v340_v27 = vmul.f32 %v2080_v14, %v249_v6 }
  0x59   : > { %v1176_v4 = vadd.f32 %v1166_v63, %v1136_v30  ;;  %v300_v26 = vrot.slane %v292_v21, 1  ;;  %v341_v11 = vmul.f32 %v2080_v14, %v2546_v56  ;;  %v364_v1 = vmul.f32 %v2089_v17, %v249_v6 }
  0x5a   : > { %v301_v63 = vrot.slane %v293_v44, 1  ;;  %v324_v30 = vrot.slane %v316_v52, 2  ;;  %v325_v12 = vrot.slane %v317_v35, 2  ;;  %v348_v43 = vrot.slane %v340_v27, 3 }
  0x5b   : > { %v1216_v60 = vadd.f32 %v1206_v8, %v1176_v4  ;;  %v308_v34 = vadd.f32 %v300_v26, %v280_v53  ;;  %v349_v45 = vrot.slane %v341_v11, 3  ;;  %v365_v13 = vmul.f32 %v2089_v17, %v2546_v56 }
  0x5c   : > { %v309_v21 = vadd.f32 %v301_v63, %v281_v10  ;;  %v372_v8 = vrot.slane %v364_v1, 4  ;;  %v388_v4 = vmul.f32 %v2092_v18, %v249_v6  ;;  %v389_v52 = vmul.f32 %v2092_v18, %v250_v41 }
  0x5d   : > { %v1228_v59 = vadd.f32 %v1224_v5, %v1216_v60  ;;  %v332_v57 = vadd.f32 %v324_v30, %v308_v34  ;;  %v373_v26 = vrot.slane %v365_v13, 4  ;;  %v390_v27 = vmul.f32 %v2092_v18, %v2546_v56 }
  0x5e   : > { %v333_v14 = vadd.f32 %v325_v12, %v309_v21  ;;  %v391_v5 = vmul.f32 %v2092_v18, %v252_v47  ;;  %v405_v60 = vrot.slane %v388_v4, 5  ;;  %v406_v53 = vrot.slane %v389_v52, 5 }
  0x5f   : > { %v1252_v44 = vadd.f32 %v1244_v37, %v1228_v59  ;;  %v356_v35 = vadd.f32 %v348_v43, %v332_v57  ;;  %v408_v17 = vrot.slane %v390_v27, 5  ;;  %v429_v1 = vmul.f32 %v2095_v19, %v249_v6 }
  0x60   : > { %v357_v63 = vadd.f32 %v349_v45, %v333_v14  ;;  %v407_v30 = vsel %vm404_vm0, %v405_v60, %v406_v53  ;;  %v409_v11 = vrot.slane %v391_v5, 5  ;;  %v430_v59 = vmul.f32 %v2095_v19, %v250_v41 }
  0x61   : > { %v1276_v10 = vadd.f32 %v1268_v31, %v1252_v44  ;;  %v380_v34 = vadd.f32 %v372_v8, %v356_v35  ;;  %v431_v57 = vmul.f32 %v2095_v19, %v2546_v56  ;;  %v432_v18 = vmul.f32 %v2095_v19, %v252_v47 }
  0x62   : > { %v381_v12 = vadd.f32 %v373_v26, %v357_v63  ;;  %v410_v43 = vsel %vm404_vm0, %v408_v17, %v409_v11  ;;  %v446_v45 = vrot.slane %v429_v1, 6  ;;  %v447_v21 = vrot.slane %v430_v59, 6 }
  0x63   : > { %v1300_v37 = vadd.f32 %v1292_v54, %v1276_v10  ;;  %v421_v31 = vadd.f32 %v407_v30, %v380_v34  ;;  %v3189_v6 = vrot.slane %v2483_v2, 4  ;;  %v449_v4 = vrot.slane %v431_v57, 6 }
  0x64   : > { %v422_v8 = vadd.f32 %v410_v43, %v381_v12  ;;  %v450_v52 = vrot.slane %v432_v18, 6  ;;  %v448_v41 = vsel %vm445_vm1, %v446_v45, %v447_v21  ;;  %v470_v54 = vmul.f32 %v2098_v20, %v2546_v56 }
  0x65   : > { %v1324_v13 = vadd.f32 %v3189_v6, %v1300_v37  ;;  %v482_v44 = vmul.f32 %v2158_v28, %v2546_v56  ;;  %v506_v19 = vmul.f32 %v2162_v29, %v2546_v56  ;;  %v462_v2 = vadd.f32 %v448_v41, %v421_v31 }
  0x66   : > { %v451_v26 = vsel %vm445_vm1, %v449_v4, %v450_v52  ;;  %v530_v27 = vmul.f32 %v2172_v36, %v2546_v56  ;;  %v1522_v35 = vmul.f32 %v2554_v3, %v2490_v23  ;;  %v554_v29 = vmul.f32 %v2180_v40, %v2546_v56 }
  0x67   : > { %v1364_v14 = vadd.f32 %v2530_v58, %v1324_v13  ;;  %v463_v5 = vadd.f32 %v451_v26, %v422_v8  ;;  %v490_v60 = vrot.slane %v482_v44, 1  ;;  %v514_v20 = vrot.slane %v506_v19, 2  ;;  %v3197_v26 = vld [vmem:[#allocation24_spill] sm:$0xff] }
  0x68   : > { %v474_v28 = vadd.f32 %v470_v54, %v462_v2  ;;  %v578_v58 = vmul.f32 %v2188_v50, %v2546_v56  ;;  %v1523_v10 = vmul.f32 %v2554_v3, %v2549_v24  ;;  %v579_v63 = vmul.f32 %v2188_v50, %v252_v47 }
  0x69   : > { %v1404_v53 = vadd.f32 %v2534_v0, %v1364_v14  ;;  %v475_v36 = vadd.f32 %v2263_v22, %v463_v5  ;;  %v618_v17 = vmul.f32 %v2207_v33, %v2546_v56  ;;  %v538_v34 = vrot.slane %v530_v27, 3  ;;  %v3199_v27 = vld [vmem:[#allocation23_spill] sm:$0xff] }
  0x6a   : > { %v498_v0 = vadd.f32 %v490_v60, %v474_v28  ;;  %v619_v30 = vmul.f32 %v2207_v33, %v252_v47  ;;  %v3190_v40 = vrot.slane %v2237_v46, 1  ;;  %v594_v59 = vrot.slane %v578_v58, 5 }
  0x6b   : > { %v1416_v1 = vadd.f32 %v2538_v62, %v1404_v53  ;;  %v595_v37 = vrot.slane %v579_v63, 5  ;;  %v634_v12 = vrot.slane %v618_v17, 6  ;;  %v3191_v57 = vrot.slane %v2502_v51, 1  ;;  %v3201_v53 = vld [vmem:[#allocation30_spill] sm:$0xff]  ;;  %v3204_v17 = vld [vmem:[#allocation3_spill] sm:$0xff] }
  0x6c   : > { %v499_v11 = vadd.f32 %v3190_v40, %v475_v36  ;;  %v522_v18 = vadd.f32 %v514_v20, %v498_v0  ;;  %v562_v50 = vrot.slane %v554_v29, 4  ;;  %v635_v43 = vrot.slane %v619_v30, 6  ;;  %v3202_v29 = vld [vmem:[#allocation8_spill] sm:$0xff]  ;;  %v3203_v36 = vld [vmem:[#allocation10_spill] sm:$0xff] }
  0x6d   : > { %v1440_v22 = vadd.f32 %v3191_v57, %v1416_v1  ;;  %v670_v56 = vmul.f32 %v2222_v39, %v2083_v15  ;;  %v1540_v62 = vrot.slane %v1522_v35, 5  ;;  %v1541_v31 = vrot.slane %v1523_v10, 5 }
  0x6e   : > { %v3192_v45 = vrot.slane %v2245_v55, 2  ;;  %v3193_v46 = vrot.slane %v2513_v7, 2  ;;  %v1504_v21 = vrot.slane %v2562_v61, 4  ;;  %v546_v6 = vadd.f32 %v538_v34, %v522_v18 }
  0x6f   : > { %v636_v51 = vsel %vm445_vm1, %v634_v12, %v635_v43  ;;  %v1580_v13 = vrot.slane %v2558_v25, 6  ;;  %v1581_v8 = vrot.slane %v2566_v42, 6  ;;  %v3194_v4 = vrot.slane %v2283_v49, 3 }
  0x70   : > { %v523_v33 = vadd.f32 %v3192_v45, %v499_v11  ;;  %v1464_v47 = vadd.f32 %v3193_v46, %v1440_v22  ;;  %v596_v41 = vsel %vm404_vm0, %v594_v59, %v595_v37  ;;  %v658_v55 = vmul.f32 %v2218_v38, %v2083_v15  ;;  %v3205_v59 = vld [vmem:[#allocation9_spill] sm:$0xff]  ;;  %v3206_v22 = vld [vmem:[#allocation11_spill] sm:$0xff] }
  0x71   : > { %v659_v7 = vmul.f32 %v2218_v38, %v2086_v16  ;;  %v3195_v61 = vrot.slane %v2543_v9, 3  ;;  %v570_v44 = vadd.f32 %v562_v50, %v546_v6  ;;  %v671_v25 = vmul.f32 %v2222_v39, %v2086_v16 }
  0x72   : > { %v547_v52 = vadd.f32 %v3194_v4, %v523_v33  ;;  %v695_v42 = vmul.f32 %v2241_v48, %v2086_v16  ;;  %v1542_v49 = vsel %vm404_vm0, %v1540_v62, %v1541_v31  ;;  %v3196_v19 = vrot.slane %v2346_v32, 4 }
  0x73   : > { %v1488_v54 = vadd.f32 %v3195_v61, %v1464_v47  ;;  %v3198_v2 = vrot.slane %v3197_v26, 6  ;;  %v3200_v35 = vrot.slane %v3199_v27, 6  ;;  %v610_v5 = vadd.f32 %v596_v41, %v570_v44  ;;  %v3207_v47 = vld [vmem:[#allocation34_spill] sm:$0xff]  ;;  %v3215_v26 = vld [vmem:[#allocation15_spill] sm:$0xff]  ;;  %v3216_v27 = vld [vmem:[#allocation16_spill] sm:$0xff] }
  0x74   : > { %v571_v14 = vadd.f32 %v3196_v19, %v547_v52  ;;  %v694_v60 = vmul.f32 %v2241_v48, %v2083_v15  ;;  %v678_v39 = vrot.slane %v670_v56, 1  ;;  %v1582_v20 = vsel %vm445_vm1, %v1580_v13, %v1581_v8  ;;  %v3209_v13 = vld [vmem:[#allocation41_spill] sm:$0xff]  ;;  %v3211_v41 = vld [vmem:[#allocation14_spill] sm:$0xff] }
  0x75   : > { %v639_v38 = vsel %vm445_vm1, %v3200_v35, %v3198_v2  ;;  %v1512_v9 = vadd.f32 %v1504_v21, %v1488_v54  ;;  %v718_v32 = vmul.f32 %v3202_v29, %v2083_v15  ;;  %v650_v10 = vadd.f32 %v636_v51, %v610_v5  ;;  %v3213_v54 = vld [vmem:[#allocation4_spill] sm:$0xff]  ;;  %v3217_v5 = vld [vmem:[#allocation13_spill] sm:$0xff] }
  0x76   : > { %v611_v28 = vadd.f32 %v3201_v53, %v571_v14  ;;  %v766_v63 = vmul.f32 %v3203_v36, %v2083_v15  ;;  %v767_v1 = vmul.f32 %v3203_v36, %v3204_v17  ;;  %v679_v0 = vrot.slane %v671_v25, 1  ;;  %v3214_v25 = vld [vmem:[#allocation19_spill] sm:$0xff] }
  0x77   : > { %v1552_v58 = vadd.f32 %v1542_v49, %v1512_v9  ;;  %v703_v34 = vrot.slane %v695_v42, 2  ;;  %v662_v40 = vadd.f32 %v658_v55, %v650_v10  ;;  %v702_v11 = vrot.slane %v694_v60, 2 }
  0x78   : > { %v651_v48 = vadd.f32 %v639_v38, %v611_v28  ;;  %v742_v37 = vmul.f32 %v3205_v59, %v2083_v15  ;;  %v726_v57 = vrot.slane %v718_v32, 3  ;;  %v806_v18 = vmul.f32 %v3206_v22, %v2083_v15  ;;  %v3235_v38 = vld [vmem:[#allocation12_spill] sm:$0xff] }
  0x79   : > { %v1592_v30 = vadd.f32 %v1582_v20, %v1552_v58  ;;  %v807_v50 = vmul.f32 %v3206_v22, %v3204_v17  ;;  %v686_v56 = vadd.f32 %v678_v39, %v662_v40  ;;  %v782_v62 = vrot.slane %v766_v63, 5  ;;  %v3218_v39 = vld [vmem:[#allocation18_spill] sm:$0xff]  ;;  %v3219_v17 = vld [vmem:[#allocation5_spill] sm:$0xff] }
  0x7a   : > { %v663_v12 = vadd.f32 %v659_v7, %v651_v48  ;;  %v783_v31 = vrot.slane %v767_v1, 5  ;;  %v750_v46 = vrot.slane %v742_v37, 4  ;;  %v2680_v21 = vmul.f32 %v3207_v47, %v2549_v24  ;;  %v3212_v7 = vld [vmem:[#allocation17_spill] sm:$0xff] }
  0x7b   : > { %v1601_v43 = vsel %vm1594_vm2, %v1592_v30, 0.0  ;;  %v710_v33 = vadd.f32 %v702_v11, %v686_v56  ;;  %v822_v51 = vrot.slane %v806_v18, 6  ;;  %v823_v15 = vrot.slane %v807_v50, 6  ;;  %v3220_v1 = vld [vmem:[#allocation29_spill] sm:$0xff]  ;;  %v3224_v50 = vld [vmem:[#allocation27_spill] sm:$0xff]  ;;  %v3225_v56 = vld [vmem:[#allocation28_spill] sm:$0xff] }
  0x7c   : > { %1602 = vadd.xlane.f32.xlu1 %v1601_v43  ;;  %v687_v45 = vadd.f32 %v679_v0, %v663_v12  ;;  %3208 = vst [vmem:[#allocation24_spill] sm:$0xff] %v2680_v21  ;;  %v2686_v8 = vmul.f32 %v3209_v13, %v2549_v24  ;;  %v784_v52 = vsel %vm404_vm0, %v782_v62, %v783_v31  ;;  %v3222_v11 = vld [vmem:[#allocation21_spill] sm:$0xff] }
  0x7d   : > { %v734_v4 = vadd.f32 %v726_v57, %v710_v33  ;;  %v858_v55 = vmul.f32 %v3211_v41, %v2086_v16  ;;  %v954_v61 = vmul.f32 %v3212_v7, %v2086_v16  ;;  %v955_v44 = vmul.f32 %v3212_v7, %v3213_v54 }
  0x7e   : > { %v2682_v6 = vadd.f32 %v703_v34, %v687_v45  ;;  %3210 = vst [vmem:[#allocation23_spill] sm:$0xff] %v2686_v8  ;;  %v994_v42 = vmul.f32 %v3214_v25, %v2086_v16  ;;  %v995_v24 = vmul.f32 %v3214_v25, %v3213_v54  ;;  %v824_v14 = vsel %vm445_vm1, %v822_v51, %v823_v15  ;;  %v3221_v34 = vld [vmem:[#allocation6_spill] sm:$0xff] }
  0x7f   : > { %v758_v49 = vadd.f32 %v750_v46, %v734_v4  ;;  %v882_v2 = vmul.f32 %v3215_v26, %v2086_v16  ;;  %v906_v35 = vmul.f32 %v3216_v27, %v2086_v16  ;;  %v846_v60 = vmul.f32 %v3217_v5, %v2086_v16  ;;  %v3226_v45 = vld [vmem:[#allocation26_spill] sm:$0xff]  ;;  %v3227_v46 = vld [vmem:[#allocation31_spill] sm:$0xff] }
  0x80   : > { %v930_v20 = vmul.f32 %v3218_v39, %v2086_v16  ;;  %v866_v53 = vrot.slane %v858_v55, 1  ;;  %v970_v28 = vrot.slane %v954_v61, 5  ;;  %v971_v32 = vrot.slane %v955_v44, 5  ;;  %v3223_v16 = vld [vmem:[#allocation22_spill] sm:$0xff] }
  0x81   : > { %v798_v9 = vadd.f32 %v784_v52, %v758_v49  ;;  %v1010_v58 = vrot.slane %v994_v42, 6  ;;  %v1011_v63 = vrot.slane %v995_v24, 6  ;;  %v1142_v0 = vmul.f32 %v3220_v1, %v3219_v17  ;;  %v3228_v42 = vld [vmem:[#allocation7_spill] sm:$0xff]  ;;  %v3229_v49 = vld [vmem:[#allocation33_spill] sm:$0xff]  ;;  %v3238_v8 = vld [vmem:[#allocation42_spill] sm:$0xff] }
  0x82   : > { %v1143_v48 = vmul.f32 %v3220_v1, %v3221_v34  ;;  %v890_v30 = vrot.slane %v882_v2, 2  ;;  %v914_v40 = vrot.slane %v906_v35, 3  ;;  %v2716_v37 = vmul.f32 %v3222_v11, %v3219_v17 }
  0x83   : > { %v838_v10 = vadd.f32 %v824_v14, %v798_v9  ;;  %v2720_v12 = vmul.f32 %v3223_v16, %v3219_v17  ;;  %v938_v18 = vrot.slane %v930_v20, 4  ;;  %v2724_v43 = vmul.f32 %v3224_v50, %v3219_v17  ;;  %v3230_v14 = vld [vmem:[#allocation37_spill] sm:$0xff]  ;;  %v3231_v20 = vld [vmem:[#allocation36_spill] sm:$0xff] }
  0x84   : > { %v2728_v62 = vmul.f32 %v3225_v56, %v3219_v17  ;;  %v972_v31 = vsel %vm404_vm0, %v970_v28, %v971_v32  ;;  %v1034_v33 = vmul.f32 %v3226_v45, %v3219_v17  ;;  %v1182_v51 = vmul.f32 %v3227_v46, %v3219_v17 }
  0x85   : > { %v850_v57 = vadd.f32 %v846_v60, %v838_v10  ;;  %v1183_v15 = vmul.f32 %v3227_v46, %v3221_v34  ;;  %v1012_v52 = vsel %vm445_vm1, %v1010_v58, %v1011_v63  ;;  %v1158_v55 = vrot.slane %v1142_v0, 5  ;;  %v3232_v58 = vld [vmem:[#allocation38_spill] sm:$0xff] }
  0x86   : > { %v1159_v61 = vrot.slane %v1143_v48, 5  ;;  %v1054_v54 = vrot.slane %v2716_v37, 1  ;;  %v1078_v44 = vrot.slane %v2720_v12, 2  ;;  %v2742_v24 = vmul.f32 %v3229_v49, %v3228_v42 }
  0x87   : > { %v874_v4 = vadd.f32 %v866_v53, %v850_v57  ;;  %v2746_v2 = vmul.f32 %v3230_v14, %v3228_v42  ;;  %v2752_v53 = vmul.f32 %v3231_v20, %v3228_v42  ;;  %v1198_v28 = vrot.slane %v1182_v51, 6  ;;  %v3233_v57 = vld [vmem:[#allocation20_spill] sm:$0xff] }
  0x88   : > { %v1199_v32 = vrot.slane %v1183_v15, 6  ;;  %v2756_v10 = vmul.f32 %v3232_v58, %v3228_v42  ;;  %v721_v63 = vmul.f32 %v3202_v29, %v3228_v42  ;;  %v2761_v0 = vsel %vm404_vm0, %v1158_v55, %v1159_v61 }
  0x89   : > { %v898_v35 = vadd.f32 %v890_v30, %v874_v4  ;;  %v745_v34 = vmul.f32 %v3205_v59, %v3228_v42  ;;  %v772_v48 = vmul.f32 %v3203_v36, %v3228_v42  ;;  %v773_v51 = vmul.f32 %v3203_v36, %v3233_v57 }
  0x8a   : > { %v729_v12 = vrot.slane %v721_v63, 3  ;;  %v812_v37 = vmul.f32 %v3206_v22, %v3228_v42  ;;  %v1370_v30 = vmul.f32 %v3209_v13, %v3228_v42 }
  0x8b   : > { %v922_v17 = vadd.f32 %v914_v40, %v898_v35  ;;  %v3234_v40 = vld [vmem:[#allocation40_spill] sm:$0xff]  ;;  %v753_v55 = vrot.slane %v745_v34, 4  ;;  %v791_v61 = vrot.slane %v772_v48, 5  ;;  %v2776_v35 = vsel %vm445_vm1, %v1198_v28, %v1199_v32  ;;  %v3236_v32 = vld [vmem:[#allocation25_spill] sm:$0xff] }
  0x8c   : > { %v2773_v4 = vmul.f32 %v3234_v40, %v3228_v42  ;;  %v737_v19 = vadd.f32 %v729_v12, %v3235_v38  ;;  %v792_v60 = vrot.slane %v773_v51, 5  ;;  %v831_v28 = vrot.slane %v812_v37, 6 }
  0x8d   : > { %v946_v15 = vadd.f32 %v938_v18, %v922_v17  ;;  %v1330_v18 = vmul.f32 %v3207_v47, %v3228_v42  ;;  %v813_v17 = vmul.f32 %v3206_v22, %v3233_v57  ;;  %v861_v38 = vmul.f32 %v3211_v41, %v3236_v32 }
  0x8e   : > { %v761_v34 = vadd.f32 %v753_v55, %v737_v19  ;;  %v793_v48 = vsel %vm404_vm0, %v791_v61, %v792_v60  ;;  %v849_v19 = vmul.f32 %v3217_v5, %v3236_v32  ;;  %v885_v60 = vmul.f32 %v3215_v26, %v3236_v32 }
  0x8f   : > { %v986_v63 = vadd.f32 %v972_v31, %v946_v15  ;;  %v1331_v31 = vmul.f32 %v3207_v47, %v3233_v57  ;;  %v832_v15 = vrot.slane %v813_v17, 6  ;;  %v1346_v55 = vrot.slane %v1330_v18, 5 }
  0x90   : > { %v801_v9 = vadd.f32 %v793_v48, %v761_v34  ;;  %v869_v42 = vrot.slane %v861_v38, 1  ;;  %v909_v34 = vmul.f32 %v3216_v27, %v3236_v32  ;;  %v2809_v21 = vmul.f32 %v3238_v8, %v3236_v32  ;;  %v3240_v8 = vld [vmem:[#allocation44_spill] sm:$0xff] }
  0x91   : > { %v1026_v12 = vadd.f32 %v1012_v52, %v986_v63  ;;  %v1371_v52 = vmul.f32 %v3209_v13, %v3233_v57  ;;  %v833_v61 = vsel %vm445_vm1, %v831_v28, %v832_v15  ;;  %v3237_v63 = vld [vmem:[#allocation43_spill] sm:$0xff]  ;;  %v3239_v57 = vld [vmem:[#allocation32_spill] sm:$0xff]  ;;  %v1347_v28 = vrot.slane %v1331_v31, 5 }
  0x92   : > { %v2803_v17 = vmul.f32 %v3237_v63, %v3236_v32  ;;  %v841_v51 = vadd.f32 %v833_v61, %v801_v9  ;;  %v961_v18 = vmul.f32 %v3212_v7, %v3239_v57  ;;  %v893_v15 = vrot.slane %v885_v60, 2 }
  0x93   : > { %v1038_v37 = vadd.f32 %v1034_v33, %v1026_v12  ;;  %v960_v33 = vmul.f32 %v3212_v7, %v3236_v32  ;;  %v933_v9 = vmul.f32 %v3218_v39, %v3236_v32  ;;  %v1386_v61 = vrot.slane %v1370_v30, 6 }
  0x94   : > { %v853_v12 = vadd.f32 %v849_v19, %v841_v51  ;;  %v1387_v63 = vrot.slane %v1371_v52, 6  ;;  %v2823_v13 = vmul.f32 %v3240_v8, %v3236_v32  ;;  %v917_v31 = vrot.slane %v909_v34, 3 }
  0x95   : > { %v1062_v48 = vadd.f32 %v1054_v54, %v1038_v37  ;;  %v1000_v54 = vmul.f32 %v3214_v25, %v3236_v32  ;;  %v1001_v37 = vmul.f32 %v3214_v25, %v3239_v57  ;;  %v3241_v51 = vrot.slane %v2724_v43, 3 }
  0x96   : > { %v877_v7 = vadd.f32 %v869_v42, %v853_v12  ;;  %v980_v30 = vrot.slane %v961_v18, 5  ;;  %v1519_v25 = vmul.f32 %v2554_v3, %v3239_v57  ;;  %v941_v39 = vrot.slane %v933_v9, 4  ;;  %v3243_v42 = vld [vmem:[#allocation46_spill] sm:$0xff]  ;;  %v3245_v18 = vld [vmem:[#allocation47_spill] sm:$0xff] }
  0x97   : > { %v1086_v38 = vadd.f32 %v1078_v44, %v1062_v48  ;;  %v979_v44 = vrot.slane %v960_v33, 5  ;;  %v1518_v48 = vmul.f32 %v2554_v3, %v3236_v32  ;;  %v3242_v8 = vrot.slane %v2728_v62, 4  ;;  %v3246_v3 = vld [vmem:[#allocation35_spill] sm:$0xff] }
  0x98   : > { %v901_v52 = vadd.f32 %v893_v15, %v877_v7  ;;  %v1558_v34 = vmul.f32 %v3243_v42, %v3236_v32  ;;  %v1019_v43 = vrot.slane %v1000_v54, 6  ;;  %v1020_v12 = vrot.slane %v1001_v37, 6 }
  0x99   : > { %v1110_v19 = vadd.f32 %v3241_v51, %v1086_v38  ;;  %v3244_v38 = vld [vmem:[#allocation45_spill] sm:$0xff]  ;;  %v2842_v51 = vmul.f32 %v3245_v18, %v3236_v32  ;;  %v1559_v7 = vmul.f32 %v3243_v42, %v3239_v57  ;;  %v2849_v9 = vsel %vm445_vm1, %v1386_v61, %v1387_v63 }
  0x9a   : > { %v2838_v33 = vmul.f32 %v3244_v38, %v3236_v32  ;;  %v925_v15 = vadd.f32 %v917_v31, %v901_v52  ;;  %v981_v54 = vsel %vm404_vm0, %v979_v44, %v980_v30  ;;  %v1454_v37 = vrot.slane %v2823_v13, 2 }
  0x9b   : > { %v1134_v27 = vadd.f32 %v3242_v8, %v1110_v19  ;;  %v1348_v8 = vsel %vm404_vm0, %v1346_v55, %v1347_v28  ;;  %v1534_v19 = vrot.slane %v1518_v48, 5  ;;  %v1049_v32 = vmul.f32 %v3222_v11, %v3246_v3  ;;  %v3247_v48 = vld [vmem:[#allocation39_spill] sm:$0xff] }
  0x9c   : > { %v949_v60 = vadd.f32 %v941_v39, %v925_v15  ;;  %v1535_v57 = vrot.slane %v1519_v25, 5  ;;  %v1574_v31 = vrot.slane %v1558_v34, 6  ;;  %v1037_v63 = vmul.f32 %v3226_v45, %v3246_v3 }
  0x9d   : > { %v1174_v62 = vadd.f32 %v2761_v0, %v1134_v27  ;;  %v1021_v27 = vsel %vm445_vm1, %v1019_v43, %v1020_v12  ;;  %v1575_v0 = vrot.slane %v1559_v7, 6  ;;  %v1073_v28 = vmul.f32 %v3223_v16, %v3246_v3 }
  0x9e   : > { %v989_v55 = vadd.f32 %v981_v54, %v949_v60  ;;  %v1097_v39 = vmul.f32 %v3224_v50, %v3246_v3  ;;  %v1148_v25 = vmul.f32 %v3220_v1, %v3246_v3  ;;  %v1478_v44 = vrot.slane %v2838_v33, 3 }
  0x9f   : > { %v1214_v18 = vadd.f32 %v2776_v35, %v1174_v62  ;;  %v1121_v35 = vmul.f32 %v3225_v56, %v3246_v3  ;;  %v1057_v30 = vrot.slane %v1049_v32, 1  ;;  %v1149_v52 = vmul.f32 %v3220_v1, %v3247_v48 }
  0xa0   : > { %v1029_v60 = vadd.f32 %v1021_v27, %v989_v55  ;;  %v3248_v34 = vrot.slane %v2742_v24, 1  ;;  %v1502_v43 = vrot.slane %v2842_v51, 4  ;;  %v2875_v12 = vsel %vm404_vm0, %v1534_v19, %v1535_v57  ;;  %v3261_v51 = vld [vmem:[#allocation43_spill] sm:$0xff] }
  0xa1   : > { %v1226_v61 = vadd.f32 %v2752_v53, %v1214_v18  ;;  %v1188_v18 = vmul.f32 %v3227_v46, %v3246_v3  ;;  %v2880_v7 = vsel %vm445_vm1, %v1574_v31, %v1575_v0  ;;  %v1081_v62 = vrot.slane %v1073_v28, 2  ;;  %v1984_v3 = vld [vmem:[%s2068_s25 + $0x30] sm:$0xff] }
  0xa2   : > { %v1041_v15 = vadd.f32 %v1037_v63, %v1029_v60  ;;  %v1189_v54 = vmul.f32 %v3227_v46, %v3247_v48  ;;  %v3249_v24 = vrot.slane %v2746_v2, 2  ;;  %v1105_v27 = vrot.slane %v1097_v39, 3 }
  0xa3   : > { %v1250_v53 = vadd.f32 %v3248_v34, %v1226_v61  ;;  %v1129_v55 = vrot.slane %v1121_v35, 4  ;;  %v1167_v61 = vrot.slane %v1148_v25, 5  ;;  %v1168_v19 = vrot.slane %v1149_v52, 5 }
  0xa4   : > { %v1065_v34 = vadd.f32 %v1057_v30, %v1041_v15  ;;  %v1225_v57 = vmul.f32 %v3231_v20, %v2490_v23  ;;  %v719_v31 = vmul.f32 %v1984_v3, %v3202_v29  ;;  %v3250_v0 = vrot.slane %v2756_v10, 3 }
  0xa5   : > { %v1274_v32 = vadd.f32 %v3249_v24, %v1250_v53  ;;  %v1207_v28 = vrot.slane %v1188_v18, 6  ;;  %v1237_v2 = vmul.f32 %v3229_v49, %v2490_v23  ;;  %v743_v39 = vmul.f32 %v1984_v3, %v3205_v59 }
  0xa6   : > { %v1089_v35 = vadd.f32 %v1081_v62, %v1065_v34  ;;  %v1208_v25 = vrot.slane %v1189_v54, 6  ;;  %v1261_v60 = vmul.f32 %v3230_v14, %v2490_v23  ;;  %v727_v30 = vrot.slane %v719_v31, 3  ;;  %v1985_v62 = vld [vmem:[%s2068_s25 + $0x38] sm:$0x3] }
  0xa7   : > { %v1298_v63 = vadd.f32 %v3250_v0, %v1274_v32  ;;  %v3251_v48 = vrot.slane %v2773_v4, 4  ;;  %v2901_v29 = vmul.f32 %v3232_v58, %v2490_v23  ;;  %v751_v10 = vrot.slane %v743_v39, 4 }
  0xa8   : > { %v768_v53 = vmul.f32 %v1984_v3, %v3203_v36  ;;  %v1113_v18 = vadd.f32 %v1105_v27, %v1089_v35  ;;  %v1169_v59 = vsel %vm404_vm0, %v1167_v61, %v1168_v19  ;;  %v735_v15 = vadd.f32 %v727_v30, %v2682_v6  ;;  %v1986_v19 = vld [vmem:[%s2068_s25 + $0x40] sm:$0xff] }
  0xa9   : > { %v1322_v52 = vadd.f32 %v3251_v48, %v1298_v63  ;;  %v769_v54 = vmul.f32 %v1985_v62, %v3203_v36  ;;  %v808_v4 = vmul.f32 %v1984_v3, %v3206_v22  ;;  %v809_v34 = vmul.f32 %v1985_v62, %v3206_v22  ;;  %v3255_v62 = vld [vmem:[#allocation17_spill] sm:$0xff] }
  0xaa   : > { %v785_v32 = vrot.slane %v768_v53, 5  ;;  %v1137_v31 = vadd.f32 %v1129_v55, %v1113_v18  ;;  %v1209_v0 = vsel %vm445_vm1, %v1207_v28, %v1208_v25  ;;  %v759_v63 = vadd.f32 %v751_v10, %v735_v15  ;;  %v3253_v18 = vld [vmem:[#allocation16_spill] sm:$0xff]  ;;  %v3254_v15 = vld [vmem:[#allocation41_spill] sm:$0xff] }
  0xab   : > { %v1362_v24 = vadd.f32 %v1348_v8, %v1322_v52  ;;  %v786_v39 = vrot.slane %v769_v54, 5  ;;  %v825_v35 = vrot.slane %v808_v4, 6  ;;  %v826_v61 = vrot.slane %v809_v34, 6  ;;  %v1987_v54 = vld [vmem:[%s2068_s25 + $0x48] sm:$0x3]  ;;  %v3256_v34 = vld [vmem:[#allocation18_spill] sm:$0xff] }
  0xac   : > { %v859_v6 = vmul.f32 %v1986_v19, %v3211_v41  ;;  %v1177_v30 = vadd.f32 %v1169_v59, %v1137_v31  ;;  %v1245_v36 = vrot.slane %v1237_v2, 1  ;;  %v847_v3 = vmul.f32 %v1986_v19, %v3217_v5 }
  0xad   : > { %v1402_v27 = vadd.f32 %v2849_v9, %v1362_v24  ;;  %v787_v8 = vsel %vm404_vm0, %v785_v32, %v786_v39  ;;  %v827_v28 = vsel %vm445_vm1, %v825_v35, %v826_v61  ;;  %v883_v25 = vmul.f32 %v1986_v19, %v3215_v26  ;;  %v3257_v39 = vld [vmem:[#allocation19_spill] sm:$0xff]  ;;  %v267_v35 = vld [vmem:[%s2068_s25 + $0x90] sm:$0xff] }
  0xae   : > { %v799_v55 = vadd.f32 %v787_v8, %v759_v63  ;;  %v1217_v9 = vadd.f32 %v1209_v0, %v1177_v30  ;;  %v1269_v48 = vrot.slane %v1261_v60, 2  ;;  %v1309_v52 = vmul.f32 %v3234_v40, %v2490_v23 }
  0xaf   : > { %v1414_v22 = vadd.f32 %v2803_v17, %v1402_v27  ;;  %v1336_v41 = vmul.f32 %v3207_v47, %v2490_v23  ;;  %v3252_v2 = vrot.slane %v2809_v21, 1  ;;  %v867_v53 = vrot.slane %v859_v6, 1 }
  0xb0   : > { %v839_v5 = vadd.f32 %v827_v28, %v799_v55  ;;  %v907_v17 = vmul.f32 %v1986_v19, %v3253_v18  ;;  %v1229_v59 = vadd.f32 %v1225_v57, %v1217_v9  ;;  %v1376_v26 = vmul.f32 %v3254_v15, %v2490_v23  ;;  %v3258_v28 = vld [vmem:[#allocation42_spill] sm:$0xff] }
  0xb1   : > { %v1438_v10 = vadd.f32 %v3252_v2, %v1414_v22  ;;  %v956_v60 = vmul.f32 %v1986_v19, %v3255_v62  ;;  %v957_v24 = vmul.f32 %v1987_v54, %v3255_v62  ;;  %v891_v21 = vrot.slane %v883_v25, 2 }
  0xb2   : > { %v851_v4 = vadd.f32 %v847_v3, %v839_v5  ;;  %v931_v31 = vmul.f32 %v1986_v19, %v3256_v34  ;;  %v1253_v0 = vadd.f32 %v1245_v36, %v1229_v59  ;;  %v1293_v63 = vrot.slane %v2901_v29, 3  ;;  %v3262_v5 = vld [vmem:[#allocation44_spill] sm:$0xff]  ;;  %v3263_v59 = vld [vmem:[#allocation23_spill] sm:$0xff] }
  0xb3   : > { %v1462_v32 = vadd.f32 %v1454_v37, %v1438_v10  ;;  %v996_v57 = vmul.f32 %v1986_v19, %v3257_v39  ;;  %v997_v27 = vmul.f32 %v1987_v54, %v3257_v39  ;;  %v1355_v61 = vrot.slane %v1336_v41, 5  ;;  %v3259_v41 = vld [vmem:[#allocation24_spill] sm:$0xff] }
  0xb4   : > { %v875_v6 = vadd.f32 %v867_v53, %v851_v4  ;;  %v915_v30 = vrot.slane %v907_v17, 3  ;;  %v1277_v13 = vadd.f32 %v1269_v48, %v1253_v0  ;;  %v1317_v37 = vrot.slane %v1309_v52, 4 }
  0xb5   : > { %v1486_v23 = vadd.f32 %v1478_v44, %v1462_v32  ;;  %v973_v8 = vrot.slane %v956_v60, 5  ;;  %v974_v3 = vrot.slane %v957_v24, 5  ;;  %v1395_v22 = vrot.slane %v1376_v26, 6  ;;  %v268_v24 = vld [vmem:[%s2068_s25 + $0x98] sm:$0x3] }
  0xb6   : > { %v899_v29 = vadd.f32 %v891_v21, %v875_v6  ;;  %v939_v19 = vrot.slane %v931_v31, 4  ;;  %v1301_v55 = vadd.f32 %v1293_v63, %v1277_v13  ;;  %v1425_v33 = vmul.f32 %v3258_v28, %v267_v35 }
  0xb7   : > { %v1510_v36 = vadd.f32 %v1502_v43, %v1486_v23  ;;  %v1013_v44 = vrot.slane %v996_v57, 6  ;;  %v1014_v25 = vrot.slane %v997_v27, 6  ;;  %v3260_v48 = vrot.slane %v3259_v41, 5  ;;  %v3265_v27 = vld [vmem:[#allocation47_spill] sm:$0xff]  ;;  %v3266_v23 = vld [vmem:[#allocation48_spill] sm:$0xff] }
  0xb8   : > { %v923_v2 = vadd.f32 %v915_v30, %v899_v29  ;;  %v1325_v10 = vadd.f32 %v1317_v37, %v1301_v55  ;;  %v1413_v43 = vmul.f32 %v3261_v51, %v267_v35  ;;  %v1449_v53 = vmul.f32 %v3262_v5, %v267_v35 }
  0xb9   : > { %v1550_v9 = vadd.f32 %v2875_v12, %v1510_v36  ;;  %v1357_v52 = vsel %vm404_vm0, %v1355_v61, %v3260_v48  ;;  %v975_v18 = vsel %vm404_vm0, %v973_v8, %v974_v3  ;;  %v3264_v26 = vrot.slane %v3263_v59, 6  ;;  %v1988_v12 = vld [vmem:[%s2068_s25 + $0x50] sm:$0xff]  ;;  %v1989_v36 = vld [vmem:[%s2068_s25 + $0x58] sm:$0x3] }
  0xba   : > { %v947_v60 = vadd.f32 %v939_v19, %v923_v2  ;;  %v1047_v54 = vmul.f32 %v1988_v12, %v3222_v11  ;;  %v1365_v32 = vadd.f32 %v1357_v52, %v1325_v10  ;;  %v1433_v4 = vrot.slane %v1425_v33, 1 }
  0xbb   : > { %v1590_v17 = vadd.f32 %v2880_v7, %v1550_v9  ;;  %v1397_v62 = vsel %vm445_vm1, %v1395_v22, %v3264_v26  ;;  %v1473_v21 = vmul.f32 %v3244_v38, %v267_v35  ;;  %v1015_v34 = vsel %vm445_vm1, %v1013_v44, %v1014_v25 }
  0xbc   : > { %v987_v0 = vadd.f32 %v975_v18, %v947_v60  ;;  %v1035_v7 = vmul.f32 %v1988_v12, %v3226_v45  ;;  %v1071_v63 = vmul.f32 %v1988_v12, %v3223_v16  ;;  %v1405_v39 = vadd.f32 %v1397_v62, %v1365_v32  ;;  %v1990_v32 = vld [vmem:[%s2068_s25 + $0x60] sm:$0xff] }
  0xbd   : > { %v1595_v31 = vsel %vm1594_vm2, %v1590_v17, 0.0  ;;  %v1457_v57 = vrot.slane %v1449_v53, 2  ;;  %v1497_v11 = vmul.f32 %v3265_v27, %v267_v35  ;;  %v1524_v61 = vmul.f32 %v3266_v23, %v267_v35 }
  0xbe   : > { %1596 = vadd.xlane.f32.xlu0 %v1595_v31  ;;  %v1525_v6 = vmul.f32 %v3266_v23, %v268_v24  ;;  %v1027_v30 = vadd.f32 %v1015_v34, %v987_v0  ;;  %v1055_v13 = vrot.slane %v1047_v54, 1  ;;  %v1095_v37 = vmul.f32 %v1988_v12, %v3224_v50 }
  0xbf   : > { %v1417_v8 = vadd.f32 %v1413_v43, %v1405_v39  ;;  %v1564_v3 = vmul.f32 %v3243_v42, %v267_v35  ;;  %v1144_v45 = vmul.f32 %v1988_v12, %v3220_v1  ;;  %v1145_v16 = vmul.f32 %v1989_v36, %v3220_v1 }
  0xc0   : > { %v1565_v22 = vmul.f32 %v3243_v42, %v268_v24  ;;  %v1039_v29 = vadd.f32 %v1035_v7, %v1027_v30  ;;  %v1079_v19 = vrot.slane %v1071_v63, 2  ;;  %v1119_v55 = vmul.f32 %v1988_v12, %v3225_v56  ;;  %v1991_v30 = vld [vmem:[%s2068_s25 + $0x68] sm:$0x3] }
  0xc1   : > { %v1441_v33 = vadd.f32 %v1433_v4, %v1417_v8  ;;  %v1481_v44 = vrot.slane %v1473_v21, 3  ;;  %v1184_v25 = vmul.f32 %v1988_v12, %v3227_v46  ;;  %v1185_v50 = vmul.f32 %v1989_v36, %v3227_v46 }
  0xc2   : > { %v1543_v9 = vrot.slane %v1524_v61, 5  ;;  %v1544_v41 = vrot.slane %v1525_v6, 5  ;;  %v1063_v35 = vadd.f32 %v1055_v13, %v1039_v29  ;;  %v1103_v48 = vrot.slane %v1095_v37, 3 }
  0xc3   : > { %v1465_v52 = vadd.f32 %v1457_v57, %v1441_v33  ;;  %v1505_v2 = vrot.slane %v1497_v11, 4  ;;  %v1161_v1 = vrot.slane %v1144_v45, 5  ;;  %v1162_v10 = vrot.slane %v1145_v16, 5 }
  0xc4   : > { %v1583_v43 = vrot.slane %v1564_v3, 6  ;;  %v1584_v53 = vrot.slane %v1565_v22, 6  ;;  %v1087_v18 = vadd.f32 %v1079_v19, %v1063_v35  ;;  %v1127_v17 = vrot.slane %v1119_v55, 4 }
  0xc5   : > { %v1489_v56 = vadd.f32 %v1481_v44, %v1465_v52  ;;  %v1201_v59 = vrot.slane %v1184_v25, 6  ;;  %v1202_v26 = vrot.slane %v1185_v50, 6  ;;  %v1545_v62 = vsel %vm404_vm0, %v1543_v9, %v1544_v41  ;;  %v1992_v44 = vld [vmem:[%s2068_s25 + $0x70] sm:$0xff] }
  0xc6   : > { %v1111_v60 = vadd.f32 %v1103_v48, %v1087_v18  ;;  %v1163_v12 = vsel %vm404_vm0, %v1161_v1, %v1162_v10  ;;  %v1585_v54 = vsel %vm445_vm1, %v1583_v43, %v1584_v53  ;;  %v1235_v4 = vmul.f32 %v1990_v32, %v3229_v49 }
  0xc7   : > { %v1513_v46 = vadd.f32 %v1505_v2, %v1489_v56  ;;  %v1203_v34 = vsel %vm445_vm1, %v1201_v59, %v1202_v26  ;;  %v1223_v0 = vmul.f32 %v1990_v32, %v3231_v20  ;;  %v1259_v7 = vmul.f32 %v1990_v32, %v3230_v14  ;;  %v1993_v2 = vld [vmem:[%s2068_s25 + $0x78] sm:$0x3] }
  0xc8   : > { %v1135_v24 = vadd.f32 %v1127_v17, %v1111_v60  ;;  %v1243_v57 = vrot.slane %v1235_v4, 1  ;;  %v1283_v11 = vmul.f32 %v1990_v32, %v3232_v58  ;;  %v1332_v6 = vmul.f32 %v1990_v32, %v3207_v47  ;;  %v1657_v4 = vld [vmem:[%s3045_s3 + $0x10] sm:$0xff] }
  0xc9   : > { %v1553_v21 = vadd.f32 %v1545_v62, %v1513_v46  ;;  %v1333_v49 = vmul.f32 %v1991_v30, %v3207_v47  ;;  %v1267_v37 = vrot.slane %v1259_v7, 2  ;;  %v1307_v20 = vmul.f32 %v1990_v32, %v3234_v40 }
  0xca   : > { %v1175_v31 = vadd.f32 %v1163_v12, %v1135_v24  ;;  %v1372_v14 = vmul.f32 %v1990_v32, %v3254_v15  ;;  %v1373_v8 = vmul.f32 %v1991_v30, %v3254_v15  ;;  %v1291_v45 = vrot.slane %v1283_v11, 3  ;;  %v1656_v32 = vld [vmem:[%s3045_s3 + $0x8] sm:$0xff] }
  0xcb   : > { %v1593_v63 = vadd.f32 %v1585_v54, %v1553_v21  ;;  %v1349_v58 = vrot.slane %v1332_v6, 5  ;;  %v1350_v36 = vrot.slane %v1333_v49, 5  ;;  %v1315_v22 = vrot.slane %v1307_v20, 4 }
  0xcc   : > { %v1215_v39 = vadd.f32 %v1203_v34, %v1175_v31  ;;  %v1389_v29 = vrot.slane %v1372_v14, 6  ;;  %v1390_v19 = vrot.slane %v1373_v8, 6  ;;  %v1423_v40 = vmul.f32 %v1992_v44, %v3258_v28  ;;  %v1658_v31 = vld [vmem:[%s3045_s3 + $0x18] sm:$0xff] }
  0xcd   : > { %v1604_v61 = vsel %vm1594_vm2, %v1593_v63, 0.0  ;;  %v1351_v55 = vsel %vm404_vm0, %v1349_v58, %v1350_v36  ;;  %v1411_v15 = vmul.f32 %v1992_v44, %v3261_v51  ;;  %v1447_v9 = vmul.f32 %v1992_v44, %v3262_v5 }
  0xce   : > { %1605 = vadd.xlane.f32.xlu1 %v1604_v61  ;;  %v1227_v13 = vadd.f32 %v1223_v0, %v1215_v39  ;;  %v1391_v25 = vsel %vm445_vm1, %v1389_v29, %v1390_v19  ;;  %v1431_v35 = vrot.slane %v1423_v40, 1  ;;  %v1471_v48 = vmul.f32 %v1992_v44, %v3244_v38 }
  0xcf   : > { %v1520_v52 = vmul.f32 %v1992_v44, %v3266_v23  ;;  %v1521_v1 = vmul.f32 %v1993_v2, %v3266_v23  ;;  %v1455_v43 = vrot.slane %v1447_v9, 2  ;;  %v1495_v28 = vmul.f32 %v1992_v44, %v3265_v27 }
  0xd0   : > { %v1251_v3 = vadd.f32 %v1243_v57, %v1227_v13  ;;  %v1560_v53 = vmul.f32 %v1992_v44, %v3243_v42  ;;  %v1561_v18 = vmul.f32 %v1993_v2, %v3243_v42  ;;  %v1479_v17 = vrot.slane %v1471_v48, 3  ;;  %v1655_v42 = vld [vmem:[%s3045_s3] sm:$0xff] }
  0xd1   : > { %v1537_v5 = vrot.slane %v1520_v52, 5  ;;  %v1538_v56 = vrot.slane %v1521_v1, 5  ;;  %v1503_v26 = vrot.slane %v1495_v28, 4  ;;  %v2002_v21 = vmov 0.0|0.0  }
  0xd2   : > { %v1275_v16 = vadd.f32 %v1267_v37, %v1251_v3  ;;  %v1577_v38 = vrot.slane %v1560_v53, 6  ;;  %v1578_v62 = vrot.slane %v1561_v18, 6  ;;  %1946 = vmatprep.subr.bf16.mxu0 %v2002_v21  ;;  %v1947_v34 = vpack.c.bf16 %v1656_v32, %v1655_v42 }
  0xd3   : > { %v1539_v46 = vsel %vm404_vm0, %v1537_v5, %v1538_v56  ;;  %v2004_v0 = vmov 0.0   ;;  %v1950_v7 = vpack.c.bf16 %v1658_v31, %v1657_v4  ;;  %v1733_v56 = vld [vmem:[%s3046_s4] sm:$0x3] }
  0xd4   : > { %v1299_v47 = vadd.f32 %v1291_v45, %v1275_v16  ;;  %v1579_v12 = vsel %vm445_vm1, %v1577_v38, %v1578_v62  ;;  %1938 = vmatprep.mubr.msk.f32.mxu0 %vm2003_vm3, %v2004_v0  ;;  %1941 = vmatprep.subr.mxu1 %v2004_v0 }
  0xd5   : > { %1943 = vmatprep.mubr.msk.f32.mxu1 %vm2003_vm3, %v2004_v0  ;;  %1948 = vmatpush3.bf16.msra.mxu0 %v1947_v34 }
  0xd6   : > { %v1323_v33 = vadd.f32 %v1315_v22, %v1299_v47  ;;  %1949 = vmatprep.subr.bf16.mxu0 %v2002_v21  ;;  %v248_v47 = vld [vmem:[%s234_s26 + $0xc] sm:$0xf]  ;;  %1942 = vmatpush3.msk.msra.mxu1 %vm445_vm1, %v1733_v56 }
  0xd8   : > { %v1363_v50 = vadd.f32 %v1351_v55, %v1323_v33  ;;  %v247_v33 = vld [vmem:[%s234_s26 + $0x8] sm:$0xf] }
  0xd9   : > { %1951 = vmatpush3.bf16.msra.mxu0 %v1950_v7 }
  0xda   : > { %v1403_v41 = vadd.f32 %v1391_v25, %v1363_v50  ;;  %v245_v50 = vld [vmem:[%s234_s26] sm:$0xf] }
  0xdc   : > { %v1415_v10 = vadd.f32 %v1411_v15, %v1403_v41  ;;  %v246_v15 = vld [vmem:[%s234_s26 + $0x4] sm:$0xf] }
  0xde   : > { %v1439_v51 = vadd.f32 %v1431_v35, %v1415_v10 }
  0xe0   : > { %v1463_v59 = vadd.f32 %v1455_v43, %v1439_v51 }
  0xe2   : > { %v1487_v60 = vadd.f32 %v1479_v17, %v1463_v59 }
  0xe4   : > { %v1511_v23 = vadd.f32 %v1503_v26, %v1487_v60 }
  0xe6   : > { %v1551_v54 = vadd.f32 %v1539_v46, %v1511_v23 }
  0xe8   : > { %v1591_v27 = vadd.f32 %v1579_v12, %v1551_v54 }
  0xea   : > { %v1598_v24 = vsel %vm1594_vm2, %v1591_v27, 0.0 }
  0xeb   : > { %1599 = vadd.xlane.f32.xlu0 %v1598_v24  ;;  %v3267_v24 = vld [vmem:[#allocation2_spill] sm:$0xff] }
 0x109   : > { %v1603_v63 = vpop.xlane.xlu1 %1602 }
 0x10a   : > { %v1609_v11 = vsub.f32 0.0, %v1603_v63 }
 0x10c   : > { %v1615_v30 = vmul.f32 1.442695, %v1609_v11 }
 0x14b   : > { %v1597_v61 = vpop.xlane.xlu0 %1596 }
 0x14c   : > { %v1607_v49 = vsub.f32 0.0, %v1597_v61 }
 0x14e   : > { %v1611_v13 = vmul.f32 1.442695, %v1607_v49 }
 0x15b   : > { %v1606_v39 = vpop.xlane.xlu1 %1605 }
 0x15c   : > { %v1610_v57 = vsub.f32 0.0, %v1606_v39 }
 0x15e   : > { %v1617_v6 = vmul.f32 1.442695, %v1610_v57 }
 0x160   : > { %1964 = vpow2.f32 %v1617_v6 }
 0x161   : > { %1966 = vpow2.f32 %v1615_v30 }
 0x162   : > { %1968 = vpow2.f32 %v1611_v13 }
 0x16a   : > { %v1965_v14 = vpop.eup %1964 }
 0x16b   : > { %v1967_v3 = vpop.eup %1966  ;;  %v1622_v45 = vadd.f32 1.0, %v1965_v14 }
 0x16c   : > { %v1621_v58 = vadd.f32 1.0, %v1967_v3  ;;  %v1969_v36 = vpop.eup %1968 }
 0x16d   : > { %v1619_v16 = vadd.f32 1.0, %v1969_v36 }
 0x178   : > { %v1600_v37 = vpop.xlane.xlu0 %1599 }
 0x179   : > { %v1608_v20 = vsub.f32 0.0, %v1600_v37 }
 0x17b   : > { %v1613_v8 = vmul.f32 1.442695, %v1608_v20 }
 0x17d   : > { %1970 = vpow2.f32 %v1613_v8 }
 0x17e   : > { %1972 = vrcp.f32 %v1622_v45 }
 0x17f   : > { %1974 = vrcp.f32 %v1621_v58 }
 0x180   : > { %1976 = vrcp.f32 %v1619_v16 }
 0x187   : > { %v1971_v22 = vpop.eup %1970 }
 0x188   : > { %v1620_v29 = vadd.f32 1.0, %v1971_v22  ;;  %v1973_v19 = vpop.eup %1972 }
 0x189   : > { %v1975_v55 = vpop.eup %1974  ;;  %v1634_v44 = vmul.f32 %v1973_v19, %v248_v47 }
 0x18a   : > { %1978 = vrcp.f32 %v1620_v29  ;;  %v1633_v40 = vmul.f32 %v1975_v55, %v247_v33  ;;  %v1977_v25 = vpop.eup %1976 }
 0x18b   : > { %v1631_v35 = vmul.f32 %v1977_v25, %v245_v50 }
 0x18c   : > { %v1640_v9 = vcombine.low %v1633_v40, %v1634_v44 }
 0x18e   : > { %v1645_v2 = vsel %vm1643_vm4, %v1640_v9, 0.0 }
 0x194   : > { %v1979_v41 = vpop.eup %1978 }
 0x195   : > { %v1632_v48 = vmul.f32 %v1979_v41, %v246_v15 }
 0x197   : > { %v1639_v52 = vcombine.low %v1631_v35, %v1632_v48 }
 0x199   : > { %v1644_v1 = vsel %vm1643_vm4, %v1639_v52, 0.0 }
 0x19a   : > { %v1646_v10 = vadd.f32 %v1645_v2, %v1644_v1 }
 0x19c   : > { %v1647_v43 = vrot.slane %v1646_v10, 4 }
 0x19e   : > { %v1648_v28 = vadd.f32 %v1647_v43, %v1646_v10 }
 0x1a0   : > { %v1649_v53 = vrot.slane %v1648_v28, 2 }
 0x1a2   : > { %v1650_v18 = vadd.f32 %v1649_v53, %v1648_v28 }
 0x1a4   : > { %v1651_v51 = vrot.slane %v1650_v18, 1 }
 0x1a6   : > { %v1652_v17 = vadd.f32 %v1651_v51, %v1650_v18 }
 0x1a8   : > { %v1654_v5 = vmul.f32 0.0625, %v1652_v17 }
 0x1aa   : > { %1939 = vmatmul.mubr.msk.f32.vlgmr.msra.gmra.mrb[0].mxu0 %vm1643_vm4, %v1654_v5 }
 0x27d   : > { %v1728_v59 = vpop.f32.mrb[0].mxu0 }
 0x27e   : > { %v1732_v26 = vmax.f32 %v1728_v59, 0.0  ;;  %v1940_v38 = vpop.f32.mrb[1].mxu0 }
 0x280   : > { %1944 = vmatmul.mubr.msk.f32.vlgmr.msra.gmra.mrb[0].mxu1 %vm1734_vm5, %v1732_v26 }
 0x353   : > { %v1807_v62 = vpop.f32.mrb[0].mxu1 }
 0x354   : > { %v1811_v60 = vsub.f32 0.0, %v1807_v62  ;;  %v1945_v46 = vpop.f32.mrb[1].mxu1 }
 0x356   : > { %v1812_v23 = vmul.f32 1.442695, %v1811_v60 }
 0x358   : > { %1980 = vpow2.f32 %v1812_v23 }
 0x362   : > { %v1981_v12 = vpop.eup %1980 }
 0x363   : > { %v1814_v54 = vadd.f32 1.0, %v1981_v12 }
 0x365   : > { %1982 = vrcp.f32 %v1814_v54 }
 0x36f   : > { %v1983_v27 = vpop.eup %1982 }
 0x370   : > { %v1820_v42 = vrot.slane %v1983_v27, %v3267_v24 }
 0x372   : > { %v1822_v32 = vcombine.high %v1820_v42, %v1820_v42  ;;  %v1824_v4 = vmul.f32 %v1820_v42, %v1631_v35  ;;  %v1826_v34 = vmul.f32 %v1820_v42, %v1633_v40 }
 0x374   : > { %v1825_v21 = vmul.f32 %v1822_v32, %v1632_v48  ;;  %v1827_v31 = vmul.f32 %v1822_v32, %v1634_v44 }
 0x376   : > { %v1832_v0 = vcombine.low %v1824_v4, %v1825_v21  ;;  %v1833_v7 = vcombine.low %v1826_v34, %v1827_v31 }
 0x378   : > { %1836 = vst.msk [vmem:[%s244_s6] sm:$0xff] %vm1643_vm4, %v1832_v0  ;;  %1837 = vst.msk [vmem:[%s244_s6 + $0x8] sm:$0xff] %vm1643_vm4, %v1833_v7 }
 0x379 PF: > { %s15_s18 = sadd.s32 1, %s2000_s18  }
 0x37a   : > { %p12_p4 = scmp.ge.s32.totalorder %s15_s18, 4  }
 0x37c   :  { %14 = sbr.rel (!%p12_p4) target bundleno = 1 (0x1), region = 73 }

</bundles_post_ra>
